<compile_context>
chip_gen: v7x
topology: tpu7x:2x2x1
jax: 0.10.0
libtpu: 0.0.40
codegen_flags: <defaults>
</compile_context>

<pallas_src>
import functools

import jax
import jax.numpy as jnp
from jax.experimental import pallas as pl
from jax.experimental.pallas import tpu as pltpu


def _round_up(x, m):
    return (x + m - 1) // m * m


# --------------------------------------------------------------------------
# Kernel 1: fused backbone stem
#   (tb, Ho, K1p) cols --(conv1 + hswish)--> (tb*Ho, stem)
#                      --(conv2 + hswish)--> (tb*Ho, mid)
#                      --(mean over Ho)----> (tb, mid)
# All intermediates stay in VMEM/vregs; bf16 MXU operands, f32 accum/elementwise.
# --------------------------------------------------------------------------
def _backbone_kernel(cols_ref, w1_ref, b1_ref, w2_ref, b2_ref, o_ref, *, inv_h):
    tb, Ho, K1 = cols_ref.shape
    x = cols_ref[...].reshape(tb * Ho, K1)                       # bf16
    y = jnp.dot(x, w1_ref[...], preferred_element_type=jnp.float32) + b1_ref[...]
    y = y * jnp.clip(y + 3.0, 0.0, 6.0) * (1.0 / 6.0)            # hardswish (f32)
    z = jnp.dot(y.astype(jnp.bfloat16), w2_ref[...],
                preferred_element_type=jnp.float32) + b2_ref[...]
    z = z * jnp.clip(z + 3.0, 0.0, 6.0) * (1.0 / 6.0)            # hardswish (f32)
    mid = z.shape[1]
    # AdaptiveAvgPool2d((None, 1)) == mean over the original H axis.
    o_ref[...] = (z.reshape(tb, Ho, mid).sum(axis=1) * inv_h).astype(o_ref.dtype)


def _choose_row_tile(R, max_rows=128):
    if R <= 8:
        return R
    # Multiple of 8, capped, and sized so the "parallel" row axis has >= 2
    # grid blocks (keeps both v7x TensorCores busy).
    t = min(max_rows, _round_up(R, 8) // 2)
    return max(8, t - t % 8)


def backbone_pool(cols_bf16, w1, b1, w2, b2):
    R, Ho, K1 = cols_bf16.shape
    stem = w1.shape[1]
    mid = w2.shape[1]
    tb = _choose_row_tile(R)
    Rp = tb * pl.cdiv(R, tb)                       # padded cdiv grid, no full-block fallback
    if Rp != R:
        cols_bf16 = jnp.pad(cols_bf16, ((0, Rp - R), (0, 0), (0, 0)))
    kernel = functools.partial(_backbone_kernel, inv_h=1.0 / Ho)
    out = pl.pallas_call(
        kernel,
        out_shape=jax.ShapeDtypeStruct((Rp, mid), jnp.float32),
        grid=(Rp // tb,),
        in_specs=[
            pl.BlockSpec((tb, Ho, K1), lambda i: (i, 0, 0)),
            pl.BlockSpec((K1, stem), lambda i: (0, 0)),
            pl.BlockSpec((1, stem), lambda i: (0, 0)),
            pl.BlockSpec((stem, mid), lambda i: (0, 0)),
            pl.BlockSpec((1, mid), lambda i: (0, 0)),
        ],
        out_specs=pl.BlockSpec((tb, mid), lambda i: (i, 0)),
        compiler_params=pltpu.CompilerParams(
            dimension_semantics=("parallel",),
            vmem_limit_bytes=32 * 1024 * 1024),
    )(cols_bf16, w1, b1.reshape(1, stem), w2, b2.reshape(1, mid))
    return out[:R] if Rp != R else out


# --------------------------------------------------------------------------
# Kernel 2: fused sequence model + CTC head (single pallas_call).
#   layer-1 input projection (both directions in one MXU matmul)
#   -> layer-1 BiLSTM recurrence (fwd/bwd interleaved, statically unrolled)
#   -> layer-2 input projection -> layer-2 BiLSTM -> CTC linear head.
# Everything lives in VMEM scratch; only the lane-padded logits hit HBM.
# --------------------------------------------------------------------------
def _lstm_cell(gates, c_prev, H):
    # One full-lane sigmoid + one full-lane tanh over (N, 4H), then slice.
    sig = jax.nn.sigmoid(gates)
    th = jnp.tanh(gates)
    i_g = sig[:, 0 * H:1 * H]
    f_g = sig[:, 1 * H:2 * H]
    g_g = th[:, 2 * H:3 * H]
    o_g = sig[:, 3 * H:4 * H]
    c_new = f_g * c_prev + i_g * g_g
    h_new = o_g * jnp.tanh(c_new)
    return h_new, c_new


def _bilstm_pass(xp_ref, whh_ref, out_ref, *, T, N, H):
    # xp_ref: (T*N, 8H) f32   [cols 0:4H fwd gates-x, 4H:8H bwd gates-x]
    # out_ref: (T*N, 2H) f32  [cols 0:H fwd hidden, H:2H bwd hidden]
    whh_f = whh_ref[0]  # (H, 4H) bf16, hoisted out of the time loop
    whh_b = whh_ref[1]
    zero = jnp.zeros((N, H), jnp.float32)
    h_f, c_f, h_b, c_b = zero, zero, zero, zero
    for j in range(T):                      # static unroll; all slices static
        tf = j
        tb = T - 1 - j
        # Forward and backward chains are independent -> their MXU/EUP/VPU ops
        # interleave and hide each other's latency (single-TC v5e/v6e win).
        g_f = xp_ref[tf * N:(tf + 1) * N, 0:4 * H] + jnp.dot(
            h_f.astype(jnp.bfloat16), whh_f, preferred_element_type=jnp.float32)
        g_b = xp_ref[tb * N:(tb + 1) * N, 4 * H:8 * H] + jnp.dot(
            h_b.astype(jnp.bfloat16), whh_b, preferred_element_type=jnp.float32)
        h_f, c_f = _lstm_cell(g_f, c_f, H)
        h_b, c_b = _lstm_cell(g_b, c_b, H)
        out_ref[tf * N:(tf + 1) * N, 0:H] = h_f
        out_ref[tb * N:(tb + 1) * N, H:2 * H] = h_b


def _seq_head_kernel(seq_ref, wih1_ref, b1_ref, whh1_ref,
                     wih2_ref, b2_ref, whh2_ref,
                     fcw_ref, fcb_ref,
                     logits_ref,
                     xp_ref, h1_ref, h2_ref, *, T, N, H):
    # ---- layer 1: input projection for BOTH directions in one MXU matmul ----
    x = seq_ref[...].astype(jnp.bfloat16)                        # (T*N, mid)
    xp_ref[...] = (jnp.dot(x, wih1_ref[...], preferred_element_type=jnp.float32)
                   + b1_ref[...])
    _bilstm_pass(xp_ref, whh1_ref, h1_ref, T=T, N=N, H=H)

    # ---- layer 2: same, fed directly from the layer-1 VMEM scratch ----
    xp_ref[...] = (jnp.dot(h1_ref[...].astype(jnp.bfloat16), wih2_ref[...],
                           preferred_element_type=jnp.float32) + b2_ref[...])
    _bilstm_pass(xp_ref, whh2_ref, h2_ref, T=T, N=N, H=H)

    # ---- CTC head: lane-padded (128) linear, unmasked stores ----
    logits_ref[...] = (jnp.dot(h2_ref[...].astype(jnp.bfloat16), fcw_ref[...],
                               preferred_element_type=jnp.float32) + fcb_ref[...])


def seq_model_head(seq, params, *, T, N, hidden):
    H = hidden
    TN = T * N
    mid = seq.shape[1]
    l1, l2 = params["lstm"]
    Cpad = params["fc_w"].shape[1]
    kernel = functools.partial(_seq_head_kernel, T=T, N=N, H=H)
    return pl.pallas_call(
        kernel,
        out_shape=jax.ShapeDtypeStruct((TN, Cpad), jnp.float32),
        grid=(1,),
        in_specs=[
            pl.BlockSpec((TN, mid), lambda i: (0, 0)),
            pl.BlockSpec((mid, 8 * H), lambda i: (0, 0)),
            pl.BlockSpec((1, 8 * H), lambda i: (0, 0)),
            pl.BlockSpec((2, H, 4 * H), lambda i: (0, 0, 0)),
            pl.BlockSpec((2 * H, 8 * H), lambda i: (0, 0)),
            pl.BlockSpec((1, 8 * H), lambda i: (0, 0)),
            pl.BlockSpec((2, H, 4 * H), lambda i: (0, 0, 0)),
            pl.BlockSpec((2 * H, Cpad), lambda i: (0, 0)),
            pl.BlockSpec((1, Cpad), lambda i: (0, 0)),
        ],
        out_specs=pl.BlockSpec((TN, Cpad), lambda i: (0, 0)),
        scratch_shapes=[
            pltpu.VMEM((TN, 8 * H), jnp.float32),   # xp (reused by both layers)
            pltpu.VMEM((TN, 2 * H), jnp.float32),   # layer-1 output
            pltpu.VMEM((TN, 2 * H), jnp.float32),   # layer-2 output
        ],
        compiler_params=pltpu.CompilerParams(
            vmem_limit_bytes=32 * 1024 * 1024),
    )(seq,
      l1["w_ih"], l1["b"].reshape(1, 8 * H), l1["w_hh"],
      l2["w_ih"], l2["b"].reshape(1, 8 * H), l2["w_hh"],
      params["fc_w"], params["fc_b"].reshape(1, Cpad))


# --------------------------------------------------------------------------
# XLA glue: im2col for the 3x3 stride-2 pad-1 stem conv, laid out so the
# fused backbone kernel emits the time-major (T=Wo, N, mid) sequence directly.
# Contraction dim is zero-padded to k_pad for aligned MXU loads.
# --------------------------------------------------------------------------
def im2col_3x3_s2_wnh(x_nhwc, k_pad):
    N, H, W, C = x_nhwc.shape
    x_p = jnp.pad(x_nhwc, ((0, 0), (1, 1), (1, 1), (0, 0)))
    Ho = (H + 2 - 3) // 2 + 1
    Wo = (W + 2 - 3) // 2 + 1
    patches = [x_p[:, i:i + 2 * Ho:2, j:j + 2 * Wo:2, :]
               for i in range(3) for j in range(3)]
    p = jnp.stack(patches, axis=3)            # (N, Ho, Wo, 9, C)
    p = jnp.transpose(p, (2, 0, 1, 3, 4))     # (Wo, N, Ho, 9, C)
    cols = p.reshape(Wo * N, Ho, 9 * C)
    if k_pad > 9 * C:
        cols = jnp.pad(cols, ((0, 0), (0, 0), (0, k_pad - 9 * C)))
    return cols, Ho, Wo


# --------------------------------------------------------------------------
# Parameters (deterministic synthetic init; shapes follow the module).
# --------------------------------------------------------------------------
def init_params(key, input_channel, mid_channel, output_channel, num_class):
    hidden = output_channel // 2
    stem = 16
    k_pad = _round_up(9 * input_channel, 32)
    keys = iter(jax.random.split(key, 64))

    def nrm(shape, scale=0.1, dtype=jnp.float32):
        v = scale * jax.random.normal(next(keys), shape, dtype=jnp.float32)
        return v.astype(dtype)

    num_class_pad = _round_up(num_class, 128)
    conv1_w = nrm((9 * input_channel, stem))
    fc_w = nrm((output_channel, num_class))
    fc_b = nrm((num_class,))
    p = {
        # 3x3/s2 conv as padded im2col matmul weight (zero rows for K padding).
        "conv1_w": jnp.pad(conv1_w, ((0, k_pad - 9 * input_channel), (0, 0))
                           ).astype(jnp.bfloat16),
        "conv1_b": nrm((stem,)),
        "conv2_w": nrm((stem, mid_channel), dtype=jnp.bfloat16),
        "conv2_b": nrm((mid_channel,)),
        # CTC head zero-padded to 128 output lanes (lane-dense stores);
        # sliced back to num_class outside the kernel.
        "fc_w": jnp.pad(fc_w, ((0, 0), (0, num_class_pad - num_class))
                        ).astype(jnp.bfloat16),
        "fc_b": jnp.pad(fc_b, (0, num_class_pad - num_class)),
        "lstm": [],
    }
    for layer_in in (mid_channel, output_channel):  # 2 stacked BiLSTM layers
        w_ih = nrm((layer_in, 2, 4 * hidden))       # [fwd | bwd] W_ih^T
        b = nrm((2, 4 * hidden))                    # b_ih + b_hh folded
        w_hh = nrm((2, hidden, 4 * hidden), dtype=jnp.bfloat16)
        p["lstm"].append({
            "w_ih": w_ih.reshape(layer_in, 8 * hidden).astype(jnp.bfloat16),
            "b": b.reshape(8 * hidden),
            "w_hh": w_hh,
        })
    return p, hidden


# --------------------------------------------------------------------------
# Forward pass mirroring CRNN.forward.
# --------------------------------------------------------------------------
def crnn_forward(x_nchw, params, *, hidden, num_class):
    x = jnp.transpose(x_nchw, (0, 2, 3, 1)).astype(jnp.float32)  # NCHW -> NHWC
    N = x.shape[0]
    k_pad = params["conv1_w"].shape[0]

    # FeatureExtraction (fused stem) + AdaptiveAvgPool2d((None,1)) + squeeze(3)
    cols, Ho, Wo = im2col_3x3_s2_wnh(x, k_pad)
    seq = backbone_pool(cols.astype(jnp.bfloat16),
                        params["conv1_w"], params["conv1_b"],
                        params["conv2_w"], params["conv2_b"])    # (Wo*N, mid)

    # SequenceModeling (2-layer BiLSTM) + Prediction (CTC head), fully fused.
    logits = seq_model_head(seq, params, T=Wo, N=N, hidden=hidden)  # (Wo*N, 128)

    Cpad = logits.shape[-1]
    logits = logits.reshape(Wo, N, Cpad).transpose(1, 0, 2)      # (N, T, 128)
    return logits[:, :, :num_class]


if __name__ == "__main__":
    key = jax.random.PRNGKey(0)
    k_in, k_p = jax.random.split(key)

    input_channel, mid_channel, output_channel, num_class = 3, 32, 64, 37
    # small NCHW image batch: (batch=2, C=3, H=32, W=16)
    x = jax.random.normal(k_in, (2, input_channel, 32, 16), dtype=jnp.float32)

    params, hidden = init_params(k_p, input_channel, mid_channel,
                                 output_channel, num_class)

    fwd = jax.jit(functools.partial(crnn_forward, hidden=hidden,
                                    num_class=num_class))
    out = jax.block_until_ready(fwd(x, params))

    # stem conv stride 2 -> W/2 = 8 timesteps
    assert out.shape == (2, 8, num_class), out.shape
    assert out.dtype == jnp.float32
    assert bool(jnp.all(jnp.isfinite(out)))
    print("KERNEL_OK")
</pallas_src>

<mosaic_0001>
module attributes {stable_mosaic.version = 11 : i64} {
  func.func @_backbone_kernel(%arg0: i32, %arg1: memref<8x16x32xbf16, #tpu.memory_space<vmem>>, %arg2: memref<32x16xbf16, #tpu.memory_space<vmem>>, %arg3: memref<1x16xf32, #tpu.memory_space<vmem>>, %arg4: memref<16x32xbf16, #tpu.memory_space<vmem>>, %arg5: memref<1x32xf32, #tpu.memory_space<vmem>>, %arg6: memref<8x32xf32, #tpu.memory_space<vmem>>) attributes {dimension_semantics = [#tpu.dimension_semantics<parallel>], iteration_bounds = array<i64: 2>, scalar_prefetch = 0 : i64, scratch_operands = 0 : i64, tpu.core_type = #tpu.core_type<tc>, window_params = [{transform_indices = @transform_0, window_bounds = array<i64: 8, 16, 32>}, {pipeline_mode = #tpu.pipeline_mode<synchronous>, transform_indices = @transform_1, window_bounds = array<i64: 32, 16>}, {pipeline_mode = #tpu.pipeline_mode<synchronous>, transform_indices = @transform_2, window_bounds = array<i64: 1, 16>}, {pipeline_mode = #tpu.pipeline_mode<synchronous>, transform_indices = @transform_3, window_bounds = array<i64: 16, 32>}, {pipeline_mode = #tpu.pipeline_mode<synchronous>, transform_indices = @transform_4, window_bounds = array<i64: 1, 32>}, {transform_indices = @transform_5, window_bounds = array<i64: 8, 32>}]} {
    %c0 = arith.constant 0 : index
    %c0_0 = arith.constant 0 : index
    %c0_1 = arith.constant 0 : index
    %0 = vector.load %arg1[%c0, %c0_0, %c0_1] : memref<8x16x32xbf16, #tpu.memory_space<vmem>>, vector<8x16x32xbf16>
    %1 = vector.shape_cast %0 : vector<8x16x32xbf16> to vector<128x32xbf16>
    %c0_2 = arith.constant 0 : index
    %c0_3 = arith.constant 0 : index
    %2 = vector.load %arg2[%c0_2, %c0_3] : memref<32x16xbf16, #tpu.memory_space<vmem>>, vector<32x16xbf16>
    %cst = arith.constant dense<0.000000e+00> : vector<128x16xf32>
    %3 = tpu.matmul %1, %2, %cst {dimension_numbers = #tpu.dot_dimension_numbers<[1], [0], [0], [1], [0, 0, 1, 1], [], []>} : vector<128x32xbf16>, vector<32x16xbf16>, vector<128x16xf32> -> vector<128x16xf32>
    %c0_4 = arith.constant 0 : index
    %c0_5 = arith.constant 0 : index
    %4 = vector.load %arg3[%c0_4, %c0_5] : memref<1x16xf32, #tpu.memory_space<vmem>>, vector<1x16xf32>
    %5 = vector.broadcast %4 : vector<1x16xf32> to vector<128x16xf32>
    %6 = arith.addf %3, %5 : vector<128x16xf32>
    %cst_6 = arith.constant 3.000000e+00 : f32
    %7 = vector.broadcast %cst_6 : f32 to vector<128x16xf32>
    %8 = arith.addf %6, %7 : vector<128x16xf32>
    %cst_7 = arith.constant 0.000000e+00 : f32
    %cst_8 = arith.constant 6.000000e+00 : f32
    %9 = vector.broadcast %cst_7 : f32 to vector<128x16xf32>
    %10 = arith.maximumf %9, %8 : vector<128x16xf32>
    %11 = vector.broadcast %cst_8 : f32 to vector<128x16xf32>
    %12 = arith.minimumf %11, %10 : vector<128x16xf32>
    %13 = arith.mulf %6, %12 : vector<128x16xf32>
    %cst_9 = arith.constant 0.166666672 : f32
    %14 = vector.broadcast %cst_9 : f32 to vector<128x16xf32>
    %15 = arith.mulf %13, %14 : vector<128x16xf32>
    %16 = arith.truncf %15 : vector<128x16xf32> to vector<128x16xbf16>
    %c0_10 = arith.constant 0 : index
    %c0_11 = arith.constant 0 : index
    %17 = vector.load %arg4[%c0_10, %c0_11] : memref<16x32xbf16, #tpu.memory_space<vmem>>, vector<16x32xbf16>
    %cst_12 = arith.constant dense<0.000000e+00> : vector<128x32xf32>
    %18 = tpu.matmul %16, %17, %cst_12 {dimension_numbers = #tpu.dot_dimension_numbers<[1], [0], [0], [1], [0, 0, 1, 1], [], []>} : vector<128x16xbf16>, vector<16x32xbf16>, vector<128x32xf32> -> vector<128x32xf32>
    %c0_13 = arith.constant 0 : index
    %c0_14 = arith.constant 0 : index
    %19 = vector.load %arg5[%c0_13, %c0_14] : memref<1x32xf32, #tpu.memory_space<vmem>>, vector<1x32xf32>
    %20 = vector.broadcast %19 : vector<1x32xf32> to vector<128x32xf32>
    %21 = arith.addf %18, %20 : vector<128x32xf32>
    %cst_15 = arith.constant 3.000000e+00 : f32
    %22 = vector.broadcast %cst_15 : f32 to vector<128x32xf32>
    %23 = arith.addf %21, %22 : vector<128x32xf32>
    %cst_16 = arith.constant 0.000000e+00 : f32
    %cst_17 = arith.constant 6.000000e+00 : f32
    %24 = vector.broadcast %cst_16 : f32 to vector<128x32xf32>
    %25 = arith.maximumf %24, %23 : vector<128x32xf32>
    %26 = vector.broadcast %cst_17 : f32 to vector<128x32xf32>
    %27 = arith.minimumf %26, %25 : vector<128x32xf32>
    %28 = arith.mulf %21, %27 : vector<128x32xf32>
    %cst_18 = arith.constant 0.166666672 : f32
    %29 = vector.broadcast %cst_18 : f32 to vector<128x32xf32>
    %30 = arith.mulf %28, %29 : vector<128x32xf32>
    %31 = vector.shape_cast %30 : vector<128x32xf32> to vector<8x16x32xf32>
    %cst_19 = arith.constant dense<0.000000e+00> : vector<8x32xf32>
    %32 = vector.multi_reduction <add>, %31, %cst_19 [1] : vector<8x16x32xf32> to vector<8x32xf32>
    %cst_20 = arith.constant 6.250000e-02 : f32
    %33 = vector.broadcast %cst_20 : f32 to vector<8x32xf32>
    %34 = arith.mulf %32, %33 : vector<8x32xf32>
    %c0_21 = arith.constant 0 : index
    %c0_22 = arith.constant 0 : index
    %35 = vector.load %arg6[%c0_21, %c0_22] : memref<8x32xf32, #tpu.memory_space<vmem>>, vector<8x32xf32>
    tpu.vector_store %arg6[%c0_21, %c0_22], %34 {strides = array<i32>} : memref<8x32xf32, #tpu.memory_space<vmem>>, vector<8x32xf32>,
    return
  }
  func.func @transform_0(%arg0: i32) -> (i32, i32, i32) {
    %c0_i32 = arith.constant 0 : i32
    %c0_i32_0 = arith.constant 0 : i32
    %c0_i32_1 = arith.constant 0 : i32
    return %arg0, %c0_i32, %c0_i32_0 : i32, i32, i32
  }
  func.func @transform_1(%arg0: i32) -> (i32, i32) {
    %c0_i32 = arith.constant 0 : i32
    %c0_i32_0 = arith.constant 0 : i32
    %c0_i32_1 = arith.constant 0 : i32
    return %c0_i32, %c0_i32_0 : i32, i32
  }
  func.func @transform_2(%arg0: i32) -> (i32, i32) {
    %c0_i32 = arith.constant 0 : i32
    %c0_i32_0 = arith.constant 0 : i32
    %c0_i32_1 = arith.constant 0 : i32
    return %c0_i32, %c0_i32_0 : i32, i32
  }
  func.func @transform_3(%arg0: i32) -> (i32, i32) {
    %c0_i32 = arith.constant 0 : i32
    %c0_i32_0 = arith.constant 0 : i32
    %c0_i32_1 = arith.constant 0 : i32
    return %c0_i32, %c0_i32_0 : i32, i32
  }
  func.func @transform_4(%arg0: i32) -> (i32, i32) {
    %c0_i32 = arith.constant 0 : i32
    %c0_i32_0 = arith.constant 0 : i32
    %c0_i32_1 = arith.constant 0 : i32
    return %c0_i32, %c0_i32_0 : i32, i32
  }
  func.func @transform_5(%arg0: i32) -> (i32, i32) {
    %c0_i32 = arith.constant 0 : i32
    %c0_i32_0 = arith.constant 0 : i32
    return %arg0, %c0_i32 : i32, i32
  }
}

module attributes {stable_mosaic.version = 11 : i64} {
  func.func @_seq_head_kernel(%arg0: i32, %arg1: memref<16x32xf32, #tpu.memory_space<vmem>>, %arg2: memref<32x256xbf16, #tpu.memory_space<vmem>>, %arg3: memref<1x256xf32, #tpu.memory_space<vmem>>, %arg4: memref<2x32x128xbf16, #tpu.memory_space<vmem>>, %arg5: memref<64x256xbf16, #tpu.memory_space<vmem>>, %arg6: memref<1x256xf32, #tpu.memory_space<vmem>>, %arg7: memref<2x32x128xbf16, #tpu.memory_space<vmem>>, %arg8: memref<64x128xbf16, #tpu.memory_space<vmem>>, %arg9: memref<1x128xf32, #tpu.memory_space<vmem>>, %arg10: memref<16x128xf32, #tpu.memory_space<vmem>>, %arg11: memref<16x256xf32, #tpu.memory_space<vmem>>, %arg12: memref<16x64xf32, #tpu.memory_space<vmem>>, %arg13: memref<16x64xf32, #tpu.memory_space<vmem>>) attributes {dimension_semantics = [#tpu.dimension_semantics<arbitrary>], iteration_bounds = array<i64: 1>, scalar_prefetch = 0 : i64, scratch_operands = 3 : i64, tpu.core_type = #tpu.core_type<tc>, window_params = [{pipeline_mode = #tpu.pipeline_mode<synchronous>, transform_indices = @transform_0, window_bounds = array<i64: 16, 32>}, {pipeline_mode = #tpu.pipeline_mode<synchronous>, transform_indices = @transform_1, window_bounds = array<i64: 32, 256>}, {pipeline_mode = #tpu.pipeline_mode<synchronous>, transform_indices = @transform_2, window_bounds = array<i64: 1, 256>}, {pipeline_mode = #tpu.pipeline_mode<synchronous>, transform_indices = @transform_3, window_bounds = array<i64: 2, 32, 128>}, {pipeline_mode = #tpu.pipeline_mode<synchronous>, transform_indices = @transform_4, window_bounds = array<i64: 64, 256>}, {pipeline_mode = #tpu.pipeline_mode<synchronous>, transform_indices = @transform_5, window_bounds = array<i64: 1, 256>}, {pipeline_mode = #tpu.pipeline_mode<synchronous>, transform_indices = @transform_6, window_bounds = array<i64: 2, 32, 128>}, {pipeline_mode = #tpu.pipeline_mode<synchronous>, transform_indices = @transform_7, window_bounds = array<i64: 64, 128>}, {pipeline_mode = #tpu.pipeline_mode<synchronous>, transform_indices = @transform_8, window_bounds = array<i64: 1, 128>}, {pipeline_mode = #tpu.pipeline_mode<synchronous>, transform_indices = @transform_9, window_bounds = array<i64: 16, 128>}]} {
    %c0 = arith.constant 0 : index
    %c0_0 = arith.constant 0 : index
    %0 = vector.load %arg1[%c0, %c0_0] : memref<16x32xf32, #tpu.memory_space<vmem>>, vector<16x32xf32>
    %1 = arith.truncf %0 : vector<16x32xf32> to vector<16x32xbf16>
    %c0_1 = arith.constant 0 : index
    %c0_2 = arith.constant 0 : index
    %2 = vector.load %arg2[%c0_1, %c0_2] : memref<32x256xbf16, #tpu.memory_space<vmem>>, vector<32x256xbf16>
    %cst = arith.constant dense<0.000000e+00> : vector<16x256xf32>
    %3 = tpu.matmul %1, %2, %cst {dimension_numbers = #tpu.dot_dimension_numbers<[1], [0], [0], [1], [0, 0, 1, 1], [], []>} : vector<16x32xbf16>, vector<32x256xbf16>, vector<16x256xf32> -> vector<16x256xf32>
    %c0_3 = arith.constant 0 : index
    %c0_4 = arith.constant 0 : index
    %4 = vector.load %arg3[%c0_3, %c0_4] : memref<1x256xf32, #tpu.memory_space<vmem>>, vector<1x256xf32>
    %5 = vector.broadcast %4 : vector<1x256xf32> to vector<16x256xf32>
    %6 = arith.addf %3, %5 : vector<16x256xf32>
    %c0_5 = arith.constant 0 : index
    %c0_6 = arith.constant 0 : index
    %7 = vector.load %arg11[%c0_5, %c0_6] : memref<16x256xf32, #tpu.memory_space<vmem>>, vector<16x256xf32>
    tpu.vector_store %arg11[%c0_5, %c0_6], %6 {strides = array<i32>} : memref<16x256xf32, #tpu.memory_space<vmem>>, vector<16x256xf32>,
    %c0_7 = arith.constant 0 : index
    %c0_8 = arith.constant 0 : index
    %c0_9 = arith.constant 0 : index
    %8 = vector.load %arg4[%c0_7, %c0_8, %c0_9] : memref<2x32x128xbf16, #tpu.memory_space<vmem>>, vector<1x32x128xbf16>
    %9 = vector.shape_cast %8 : vector<1x32x128xbf16> to vector<32x128xbf16>
    %c1 = arith.constant 1 : index
    %c0_10 = arith.constant 0 : index
    %c0_11 = arith.constant 0 : index
    %10 = vector.load %arg4[%c1, %c0_10, %c0_11] : memref<2x32x128xbf16, #tpu.memory_space<vmem>>, vector<1x32x128xbf16>
    %11 = vector.shape_cast %10 : vector<1x32x128xbf16> to vector<32x128xbf16>
    %cst_12 = arith.constant 0.000000e+00 : f32
    %12 = vector.broadcast %cst_12 : f32 to vector<2x32xf32>
    %c0_13 = arith.constant 0 : index
    %c0_14 = arith.constant 0 : index
    %13 = vector.load %arg11[%c0_13, %c0_14] : memref<16x256xf32, #tpu.memory_space<vmem>>, vector<2x128xf32>
    %14 = arith.truncf %12 : vector<2x32xf32> to vector<2x32xbf16>
    %cst_15 = arith.constant dense<0.000000e+00> : vector<2x128xf32>
    %15 = tpu.matmul %14, %9, %cst_15 {dimension_numbers = #tpu.dot_dimension_numbers<[1], [0], [0], [1], [0, 0, 1, 1], [], []>} : vector<2x32xbf16>, vector<32x128xbf16>, vector<2x128xf32> -> vector<2x128xf32>
    %16 = arith.addf %13, %15 : vector<2x128xf32>
    %c14 = arith.constant 14 : index
    %c128 = arith.constant 128 : index
    %17 = vector.load %arg11[%c14, %c128] : memref<16x256xf32, #tpu.memory_space<vmem>>, vector<2x128xf32>
    %18 = arith.truncf %12 : vector<2x32xf32> to vector<2x32xbf16>
    %cst_16 = arith.constant dense<0.000000e+00> : vector<2x128xf32>
    %19 = tpu.matmul %18, %11, %cst_16 {dimension_numbers = #tpu.dot_dimension_numbers<[1], [0], [0], [1], [0, 0, 1, 1], [], []>} : vector<2x32xbf16>, vector<32x128xbf16>, vector<2x128xf32> -> vector<2x128xf32>
    %20 = arith.addf %17, %19 : vector<2x128xf32>
    %21 = arith.negf %16 : vector<2x128xf32>
    %22 = math.exp %21 : vector<2x128xf32>
    %cst_17 = arith.constant 1.000000e+00 : f32
    %23 = vector.broadcast %cst_17 : f32 to vector<2x128xf32>
    %24 = arith.addf %23, %22 : vector<2x128xf32>
    %25 = arith.divf %23, %24 : vector<2x128xf32>
    %26 = math.tanh %16 : vector<2x128xf32>
    %27 = vector.extract_strided_slice %25 {offsets = [0, 0], sizes = [2, 32], strides = [1, 1]} : vector<2x128xf32> to vector<2x32xf32>
    %28 = vector.extract_strided_slice %25 {offsets = [0, 32], sizes = [2, 32], strides = [1, 1]} : vector<2x128xf32> to vector<2x32xf32>
    %29 = vector.extract_strided_slice %26 {offsets = [0, 64], sizes = [2, 32], strides = [1, 1]} : vector<2x128xf32> to vector<2x32xf32>
    %30 = vector.extract_strided_slice %25 {offsets = [0, 96], sizes = [2, 32], strides = [1, 1]} : vector<2x128xf32> to vector<2x32xf32>
    %31 = arith.mulf %28, %12 : vector<2x32xf32>
    %32 = arith.mulf %27, %29 : vector<2x32xf32>
    %33 = arith.addf %31, %32 : vector<2x32xf32>
    %34 = math.tanh %33 : vector<2x32xf32>
    %35 = arith.mulf %30, %34 : vector<2x32xf32>
    %36 = arith.negf %20 : vector<2x128xf32>
    %37 = math.exp %36 : vector<2x128xf32>
    %cst_18 = arith.constant 1.000000e+00 : f32
    %38 = vector.broadcast %cst_18 : f32 to vector<2x128xf32>
    %39 = arith.addf %38, %37 : vector<2x128xf32>
    %40 = arith.divf %38, %39 : vector<2x128xf32>
    %41 = math.tanh %20 : vector<2x128xf32>
    %42 = vector.extract_strided_slice %40 {offsets = [0, 0], sizes = [2, 32], strides = [1, 1]} : vector<2x128xf32> to vector<2x32xf32>
    %43 = vector.extract_strided_slice %40 {offsets = [0, 32], sizes = [2, 32], strides = [1, 1]} : vector<2x128xf32> to vector<2x32xf32>
    %44 = vector.extract_strided_slice %41 {offsets = [0, 64], sizes = [2, 32], strides = [1, 1]} : vector<2x128xf32> to vector<2x32xf32>
    %45 = vector.extract_strided_slice %40 {offsets = [0, 96], sizes = [2, 32], strides = [1, 1]} : vector<2x128xf32> to vector<2x32xf32>
    %46 = arith.mulf %43, %12 : vector<2x32xf32>
    %47 = arith.mulf %42, %44 : vector<2x32xf32>
    %48 = arith.addf %46, %47 : vector<2x32xf32>
    %49 = math.tanh %48 : vector<2x32xf32>
    %50 = arith.mulf %45, %49 : vector<2x32xf32>
    %c0_19 = arith.constant 0 : index
    %c0_20 = arith.constant 0 : index
    %51 = vector.load %arg12[%c0_19, %c0_20] : memref<16x64xf32, #tpu.memory_space<vmem>>, vector<2x32xf32>
    tpu.vector_store %arg12[%c0_19, %c0_20], %35 {strides = array<i32>} : memref<16x64xf32, #tpu.memory_space<vmem>>, vector<2x32xf32>,
    %c14_21 = arith.constant 14 : index
    %c32 = arith.constant 32 : index
    %52 = vector.load %arg12[%c14_21, %c32] : memref<16x64xf32, #tpu.memory_space<vmem>>, vector<2x32xf32>
    tpu.vector_store %arg12[%c14_21, %c32], %50 {strides = array<i32>} : memref<16x64xf32, #tpu.memory_space<vmem>>, vector<2x32xf32>,
    %c2 = arith.constant 2 : index
    %c0_22 = arith.constant 0 : index
    %53 = vector.load %arg11[%c2, %c0_22] : memref<16x256xf32, #tpu.memory_space<vmem>>, vector<2x128xf32>
    %54 = arith.truncf %35 : vector<2x32xf32> to vector<2x32xbf16>
    %cst_23 = arith.constant dense<0.000000e+00> : vector<2x128xf32>
    %55 = tpu.matmul %54, %9, %cst_23 {dimension_numbers = #tpu.dot_dimension_numbers<[1], [0], [0], [1], [0, 0, 1, 1], [], []>} : vector<2x32xbf16>, vector<32x128xbf16>, vector<2x128xf32> -> vector<2x128xf32>
    %56 = arith.addf %53, %55 : vector<2x128xf32>
    %c12 = arith.constant 12 : index
    %c128_24 = arith.constant 128 : index
    %57 = vector.load %arg11[%c12, %c128_24] : memref<16x256xf32, #tpu.memory_space<vmem>>, vector<2x128xf32>
    %58 = arith.truncf %50 : vector<2x32xf32> to vector<2x32xbf16>
    %cst_25 = arith.constant dense<0.000000e+00> : vector<2x128xf32>
    %59 = tpu.matmul %58, %11, %cst_25 {dimension_numbers = #tpu.dot_dimension_numbers<[1], [0], [0], [1], [0, 0, 1, 1], [], []>} : vector<2x32xbf16>, vector<32x128xbf16>, vector<2x128xf32> -> vector<2x128xf32>
    %60 = arith.addf %57, %59 : vector<2x128xf32>
    %61 = arith.negf %56 : vector<2x128xf32>
    %62 = math.exp %61 : vector<2x128xf32>
    %cst_26 = arith.constant 1.000000e+00 : f32
    %63 = vector.broadcast %cst_26 : f32 to vector<2x128xf32>
    %64 = arith.addf %63, %62 : vector<2x128xf32>
    %65 = arith.divf %63, %64 : vector<2x128xf32>
    %66 = math.tanh %56 : vector<2x128xf32>
    %67 = vector.extract_strided_slice %65 {offsets = [0, 0], sizes = [2, 32], strides = [1, 1]} : vector<2x128xf32> to vector<2x32xf32>
    %68 = vector.extract_strided_slice %65 {offsets = [0, 32], sizes = [2, 32], strides = [1, 1]} : vector<2x128xf32> to vector<2x32xf32>
    %69 = vector.extract_strided_slice %66 {offsets = [0, 64], sizes = [2, 32], strides = [1, 1]} : vector<2x128xf32> to vector<2x32xf32>
    %70 = vector.extract_strided_slice %65 {offsets = [0, 96], sizes = [2, 32], strides = [1, 1]} : vector<2x128xf32> to vector<2x32xf32>
    %71 = arith.mulf %68, %33 : vector<2x32xf32>
    %72 = arith.mulf %67, %69 : vector<2x32xf32>
    %73 = arith.addf %71, %72 : vector<2x32xf32>
    %74 = math.tanh %73 : vector<2x32xf32>
    %75 = arith.mulf %70, %74 : vector<2x32xf32>
    %76 = arith.negf %60 : vector<2x128xf32>
    %77 = math.exp %76 : vector<2x128xf32>
    %cst_27 = arith.constant 1.000000e+00 : f32
    %78 = vector.broadcast %cst_27 : f32 to vector<2x128xf32>
    %79 = arith.addf %78, %77 : vector<2x128xf32>
    %80 = arith.divf %78, %79 : vector<2x128xf32>
    %81 = math.tanh %60 : vector<2x128xf32>
    %82 = vector.extract_strided_slice %80 {offsets = [0, 0], sizes = [2, 32], strides = [1, 1]} : vector<2x128xf32> to vector<2x32xf32>
    %83 = vector.extract_strided_slice %80 {offsets = [0, 32], sizes = [2, 32], strides = [1, 1]} : vector<2x128xf32> to vector<2x32xf32>
    %84 = vector.extract_strided_slice %81 {offsets = [0, 64], sizes = [2, 32], strides = [1, 1]} : vector<2x128xf32> to vector<2x32xf32>
    %85 = vector.extract_strided_slice %80 {offsets = [0, 96], sizes = [2, 32], strides = [1, 1]} : vector<2x128xf32> to vector<2x32xf32>
    %86 = arith.mulf %83, %48 : vector<2x32xf32>
    %87 = arith.mulf %82, %84 : vector<2x32xf32>
    %88 = arith.addf %86, %87 : vector<2x32xf32>
    %89 = math.tanh %88 : vector<2x32xf32>
    %90 = arith.mulf %85, %89 : vector<2x32xf32>
    %c2_28 = arith.constant 2 : index
    %c0_29 = arith.constant 0 : index
    %91 = vector.load %arg12[%c2_28, %c0_29] : memref<16x64xf32, #tpu.memory_space<vmem>>, vector<2x32xf32>
    tpu.vector_store %arg12[%c2_28, %c0_29], %75 {strides = array<i32>} : memref<16x64xf32, #tpu.memory_space<vmem>>, vector<2x32xf32>,
    %c12_30 = arith.constant 12 : index
    %c32_31 = arith.constant 32 : index
    %92 = vector.load %arg12[%c12_30, %c32_31] : memref<16x64xf32, #tpu.memory_space<vmem>>, vector<2x32xf32>
    tpu.vector_store %arg12[%c12_30, %c32_31], %90 {strides = array<i32>} : memref<16x64xf32, #tpu.memory_space<vmem>>, vector<2x32xf32>,
    %c4 = arith.constant 4 : index
    %c0_32 = arith.constant 0 : index
    %93 = vector.load %arg11[%c4, %c0_32] : memref<16x256xf32, #tpu.memory_space<vmem>>, vector<2x128xf32>
    %94 = arith.truncf %75 : vector<2x32xf32> to vector<2x32xbf16>
    %cst_33 = arith.constant dense<0.000000e+00> : vector<2x128xf32>
    %95 = tpu.matmul %94, %9, %cst_33 {dimension_numbers = #tpu.dot_dimension_numbers<[1], [0], [0], [1], [0, 0, 1, 1], [], []>} : vector<2x32xbf16>, vector<32x128xbf16>, vector<2x128xf32> -> vector<2x128xf32>
    %96 = arith.addf %93, %95 : vector<2x128xf32>
    %c10 = arith.constant 10 : index
    %c128_34 = arith.constant 128 : index
    %97 = vector.load %arg11[%c10, %c128_34] : memref<16x256xf32, #tpu.memory_space<vmem>>, vector<2x128xf32>
    %98 = arith.truncf %90 : vector<2x32xf32> to vector<2x32xbf16>
    %cst_35 = arith.constant dense<0.000000e+00> : vector<2x128xf32>
    %99 = tpu.matmul %98, %11, %cst_35 {dimension_numbers = #tpu.dot_dimension_numbers<[1], [0], [0], [1], [0, 0, 1, 1], [], []>} : vector<2x32xbf16>, vector<32x128xbf16>, vector<2x128xf32> -> vector<2x128xf32>
    %100 = arith.addf %97, %99 : vector<2x128xf32>
    %101 = arith.negf %96 : vector<2x128xf32>
    %102 = math.exp %101 : vector<2x128xf32>
    %cst_36 = arith.constant 1.000000e+00 : f32
    %103 = vector.broadcast %cst_36 : f32 to vector<2x128xf32>
    %104 = arith.addf %103, %102 : vector<2x128xf32>
    %105 = arith.divf %103, %104 : vector<2x128xf32>
    %106 = math.tanh %96 : vector<2x128xf32>
    %107 = vector.extract_strided_slice %105 {offsets = [0, 0], sizes = [2, 32], strides = [1, 1]} : vector<2x128xf32> to vector<2x32xf32>
    %108 = vector.extract_strided_slice %105 {offsets = [0, 32], sizes = [2, 32], strides = [1, 1]} : vector<2x128xf32> to vector<2x32xf32>
    %109 = vector.extract_strided_slice %106 {offsets = [0, 64], sizes = [2, 32], strides = [1, 1]} : vector<2x128xf32> to vector<2x32xf32>
    %110 = vector.extract_strided_slice %105 {offsets = [0, 96], sizes = [2, 32], strides = [1, 1]} : vector<2x128xf32> to vector<2x32xf32>
    %111 = arith.mulf %108, %73 : vector<2x32xf32>
    %112 = arith.mulf %107, %109 : vector<2x32xf32>
    %113 = arith.addf %111, %112 : vector<2x32xf32>
    %114 = math.tanh %113 : vector<2x32xf32>
    %115 = arith.mulf %110, %114 : vector<2x32xf32>
    %116 = arith.negf %100 : vector<2x128xf32>
    %117 = math.exp %116 : vector<2x128xf32>
    %cst_37 = arith.constant 1.000000e+00 : f32
    %118 = vector.broadcast %cst_37 : f32 to vector<2x128xf32>
    %119 = arith.addf %118, %117 : vector<2x128xf32>
    %120 = arith.divf %118, %119 : vector<2x128xf32>
    %121 = math.tanh %100 : vector<2x128xf32>
    %122 = vector.extract_strided_slice %120 {offsets = [0, 0], sizes = [2, 32], strides = [1, 1]} : vector<2x128xf32> to vector<2x32xf32>
    %123 = vector.extract_strided_slice %120 {offsets = [0, 32], sizes = [2, 32], strides = [1, 1]} : vector<2x128xf32> to vector<2x32xf32>
    %124 = vector.extract_strided_slice %121 {offsets = [0, 64], sizes = [2, 32], strides = [1, 1]} : vector<2x128xf32> to vector<2x32xf32>
    %125 = vector.extract_strided_slice %120 {offsets = [0, 96], sizes = [2, 32], strides = [1, 1]} : vector<2x128xf32> to vector<2x32xf32>
    %126 = arith.mulf %123, %88 : vector<2x32xf32>
    %127 = arith.mulf %122, %124 : vector<2x32xf32>
    %128 = arith.addf %126, %127 : vector<2x32xf32>
    %129 = math.tanh %128 : vector<2x32xf32>
    %130 = arith.mulf %125, %129 : vector<2x32xf32>
    %c4_38 = arith.constant 4 : index
    %c0_39 = arith.constant 0 : index
    %131 = vector.load %arg12[%c4_38, %c0_39] : memref<16x64xf32, #tpu.memory_space<vmem>>, vector<2x32xf32>
    tpu.vector_store %arg12[%c4_38, %c0_39], %115 {strides = array<i32>} : memref<16x64xf32, #tpu.memory_space<vmem>>, vector<2x32xf32>,
    %c10_40 = arith.constant 10 : index
    %c32_41 = arith.constant 32 : index
    %132 = vector.load %arg12[%c10_40, %c32_41] : memref<16x64xf32, #tpu.memory_space<vmem>>, vector<2x32xf32>
    tpu.vector_store %arg12[%c10_40, %c32_41], %130 {strides = array<i32>} : memref<16x64xf32, #tpu.memory_space<vmem>>, vector<2x32xf32>,
    %c6 = arith.constant 6 : index
    %c0_42 = arith.constant 0 : index
    %133 = vector.load %arg11[%c6, %c0_42] : memref<16x256xf32, #tpu.memory_space<vmem>>, vector<2x128xf32>
    %134 = arith.truncf %115 : vector<2x32xf32> to vector<2x32xbf16>
    %cst_43 = arith.constant dense<0.000000e+00> : vector<2x128xf32>
    %135 = tpu.matmul %134, %9, %cst_43 {dimension_numbers = #tpu.dot_dimension_numbers<[1], [0], [0], [1], [0, 0, 1, 1], [], []>} : vector<2x32xbf16>, vector<32x128xbf16>, vector<2x128xf32> -> vector<2x128xf32>
    %136 = arith.addf %133, %135 : vector<2x128xf32>
    %c8 = arith.constant 8 : index
    %c128_44 = arith.constant 128 : index
    %137 = vector.load %arg11[%c8, %c128_44] : memref<16x256xf32, #tpu.memory_space<vmem>>, vector<2x128xf32>
    %138 = arith.truncf %130 : vector<2x32xf32> to vector<2x32xbf16>
    %cst_45 = arith.constant dense<0.000000e+00> : vector<2x128xf32>
    %139 = tpu.matmul %138, %11, %cst_45 {dimension_numbers = #tpu.dot_dimension_numbers<[1], [0], [0], [1], [0, 0, 1, 1], [], []>} : vector<2x32xbf16>, vector<32x128xbf16>, vector<2x128xf32> -> vector<2x128xf32>
    %140 = arith.addf %137, %139 : vector<2x128xf32>
    %141 = arith.negf %136 : vector<2x128xf32>
    %142 = math.exp %141 : vector<2x128xf32>
    %cst_46 = arith.constant 1.000000e+00 : f32
    %143 = vector.broadcast %cst_46 : f32 to vector<2x128xf32>
    %144 = arith.addf %143, %142 : vector<2x128xf32>
    %145 = arith.divf %143, %144 : vector<2x128xf32>
    %146 = math.tanh %136 : vector<2x128xf32>
    %147 = vector.extract_strided_slice %145 {offsets = [0, 0], sizes = [2, 32], strides = [1, 1]} : vector<2x128xf32> to vector<2x32xf32>
    %148 = vector.extract_strided_slice %145 {offsets = [0, 32], sizes = [2, 32], strides = [1, 1]} : vector<2x128xf32> to vector<2x32xf32>
    %149 = vector.extract_strided_slice %146 {offsets = [0, 64], sizes = [2, 32], strides = [1, 1]} : vector<2x128xf32> to vector<2x32xf32>
    %150 = vector.extract_strided_slice %145 {offsets = [0, 96], sizes = [2, 32], strides = [1, 1]} : vector<2x128xf32> to vector<2x32xf32>
    %151 = arith.mulf %148, %113 : vector<2x32xf32>
    %152 = arith.mulf %147, %149 : vector<2x32xf32>
    %153 = arith.addf %151, %152 : vector<2x32xf32>
    %154 = math.tanh %153 : vector<2x32xf32>
    %155 = arith.mulf %150, %154 : vector<2x32xf32>
    %156 = arith.negf %140 : vector<2x128xf32>
    %157 = math.exp %156 : vector<2x128xf32>
    %cst_47 = arith.constant 1.000000e+00 : f32
    %158 = vector.broadcast %cst_47 : f32 to vector<2x128xf32>
    %159 = arith.addf %158, %157 : vector<2x128xf32>
    %160 = arith.divf %158, %159 : vector<2x128xf32>
    %161 = math.tanh %140 : vector<2x128xf32>
    %162 = vector.extract_strided_slice %160 {offsets = [0, 0], sizes = [2, 32], strides = [1, 1]} : vector<2x128xf32> to vector<2x32xf32>
    %163 = vector.extract_strided_slice %160 {offsets = [0, 32], sizes = [2, 32], strides = [1, 1]} : vector<2x128xf32> to vector<2x32xf32>
    %164 = vector.extract_strided_slice %161 {offsets = [0, 64], sizes = [2, 32], strides = [1, 1]} : vector<2x128xf32> to vector<2x32xf32>
    %165 = vector.extract_strided_slice %160 {offsets = [0, 96], sizes = [2, 32], strides = [1, 1]} : vector<2x128xf32> to vector<2x32xf32>
    %166 = arith.mulf %163, %128 : vector<2x32xf32>
    %167 = arith.mulf %162, %164 : vector<2x32xf32>
    %168 = arith.addf %166, %167 : vector<2x32xf32>
    %169 = math.tanh %168 : vector<2x32xf32>
    %170 = arith.mulf %165, %169 : vector<2x32xf32>
    %c6_48 = arith.constant 6 : index
    %c0_49 = arith.constant 0 : index
    %171 = vector.load %arg12[%c6_48, %c0_49] : memref<16x64xf32, #tpu.memory_space<vmem>>, vector<2x32xf32>
    tpu.vector_store %arg12[%c6_48, %c0_49], %155 {strides = array<i32>} : memref<16x64xf32, #tpu.memory_space<vmem>>, vector<2x32xf32>,
    %c8_50 = arith.constant 8 : index
    %c32_51 = arith.constant 32 : index
    %172 = vector.load %arg12[%c8_50, %c32_51] : memref<16x64xf32, #tpu.memory_space<vmem>>, vector<2x32xf32>
    tpu.vector_store %arg12[%c8_50, %c32_51], %170 {strides = array<i32>} : memref<16x64xf32, #tpu.memory_space<vmem>>, vector<2x32xf32>,
    %c8_52 = arith.constant 8 : index
    %c0_53 = arith.constant 0 : index
    %173 = vector.load %arg11[%c8_52, %c0_53] : memref<16x256xf32, #tpu.memory_space<vmem>>, vector<2x128xf32>
    %174 = arith.truncf %155 : vector<2x32xf32> to vector<2x32xbf16>
    %cst_54 = arith.constant dense<0.000000e+00> : vector<2x128xf32>
    %175 = tpu.matmul %174, %9, %cst_54 {dimension_numbers = #tpu.dot_dimension_numbers<[1], [0], [0], [1], [0, 0, 1, 1], [], []>} : vector<2x32xbf16>, vector<32x128xbf16>, vector<2x128xf32> -> vector<2x128xf32>
    %176 = arith.addf %173, %175 : vector<2x128xf32>
    %c6_55 = arith.constant 6 : index
    %c128_56 = arith.constant 128 : index
    %177 = vector.load %arg11[%c6_55, %c128_56] : memref<16x256xf32, #tpu.memory_space<vmem>>, vector<2x128xf32>
    %178 = arith.truncf %170 : vector<2x32xf32> to vector<2x32xbf16>
    %cst_57 = arith.constant dense<0.000000e+00> : vector<2x128xf32>
    %179 = tpu.matmul %178, %11, %cst_57 {dimension_numbers = #tpu.dot_dimension_numbers<[1], [0], [0], [1], [0, 0, 1, 1], [], []>} : vector<2x32xbf16>, vector<32x128xbf16>, vector<2x128xf32> -> vector<2x128xf32>
    %180 = arith.addf %177, %179 : vector<2x128xf32>
    %181 = arith.negf %176 : vector<2x128xf32>
    %182 = math.exp %181 : vector<2x128xf32>
    %cst_58 = arith.constant 1.000000e+00 : f32
    %183 = vector.broadcast %cst_58 : f32 to vector<2x128xf32>
    %184 = arith.addf %183, %182 : vector<2x128xf32>
    %185 = arith.divf %183, %184 : vector<2x128xf32>
    %186 = math.tanh %176 : vector<2x128xf32>
    %187 = vector.extract_strided_slice %185 {offsets = [0, 0], sizes = [2, 32], strides = [1, 1]} : vector<2x128xf32> to vector<2x32xf32>
    %188 = vector.extract_strided_slice %185 {offsets = [0, 32], sizes = [2, 32], strides = [1, 1]} : vector<2x128xf32> to vector<2x32xf32>
    %189 = vector.extract_strided_slice %186 {offsets = [0, 64], sizes = [2, 32], strides = [1, 1]} : vector<2x128xf32> to vector<2x32xf32>
    %190 = vector.extract_strided_slice %185 {offsets = [0, 96], sizes = [2, 32], strides = [1, 1]} : vector<2x128xf32> to vector<2x32xf32>
    %191 = arith.mulf %188, %153 : vector<2x32xf32>
    %192 = arith.mulf %187, %189 : vector<2x32xf32>
    %193 = arith.addf %191, %192 : vector<2x32xf32>
    %194 = math.tanh %193 : vector<2x32xf32>
    %195 = arith.mulf %190, %194 : vector<2x32xf32>
    %196 = arith.negf %180 : vector<2x128xf32>
    %197 = math.exp %196 : vector<2x128xf32>
    %cst_59 = arith.constant 1.000000e+00 : f32
    %198 = vector.broadcast %cst_59 : f32 to vector<2x128xf32>
    %199 = arith.addf %198, %197 : vector<2x128xf32>
    %200 = arith.divf %198, %199 : vector<2x128xf32>
    %201 = math.tanh %180 : vector<2x128xf32>
    %202 = vector.extract_strided_slice %200 {offsets = [0, 0], sizes = [2, 32], strides = [1, 1]} : vector<2x128xf32> to vector<2x32xf32>
    %203 = vector.extract_strided_slice %200 {offsets = [0, 32], sizes = [2, 32], strides = [1, 1]} : vector<2x128xf32> to vector<2x32xf32>
    %204 = vector.extract_strided_slice %201 {offsets = [0, 64], sizes = [2, 32], strides = [1, 1]} : vector<2x128xf32> to vector<2x32xf32>
    %205 = vector.extract_strided_slice %200 {offsets = [0, 96], sizes = [2, 32], strides = [1, 1]} : vector<2x128xf32> to vector<2x32xf32>
    %206 = arith.mulf %203, %168 : vector<2x32xf32>
    %207 = arith.mulf %202, %204 : vector<2x32xf32>
    %208 = arith.addf %206, %207 : vector<2x32xf32>
    %209 = math.tanh %208 : vector<2x32xf32>
    %210 = arith.mulf %205, %209 : vector<2x32xf32>
    %c8_60 = arith.constant 8 : index
    %c0_61 = arith.constant 0 : index
    %211 = vector.load %arg12[%c8_60, %c0_61] : memref<16x64xf32, #tpu.memory_space<vmem>>, vector<2x32xf32>
    tpu.vector_store %arg12[%c8_60, %c0_61], %195 {strides = array<i32>} : memref<16x64xf32, #tpu.memory_space<vmem>>, vector<2x32xf32>,
    %c6_62 = arith.constant 6 : index
    %c32_63 = arith.constant 32 : index
    %212 = vector.load %arg12[%c6_62, %c32_63] : memref<16x64xf32, #tpu.memory_space<vmem>>, vector<2x32xf32>
    tpu.vector_store %arg12[%c6_62, %c32_63], %210 {strides = array<i32>} : memref<16x64xf32, #tpu.memory_space<vmem>>, vector<2x32xf32>,
    %c10_64 = arith.constant 10 : index
    %c0_65 = arith.constant 0 : index
    %213 = vector.load %arg11[%c10_64, %c0_65] : memref<16x256xf32, #tpu.memory_space<vmem>>, vector<2x128xf32>
    %214 = arith.truncf %195 : vector<2x32xf32> to vector<2x32xbf16>
    %cst_66 = arith.constant dense<0.000000e+00> : vector<2x128xf32>
    %215 = tpu.matmul %214, %9, %cst_66 {dimension_numbers = #tpu.dot_dimension_numbers<[1], [0], [0], [1], [0, 0, 1, 1], [], []>} : vector<2x32xbf16>, vector<32x128xbf16>, vector<2x128xf32> -> vector<2x128xf32>
    %216 = arith.addf %213, %215 : vector<2x128xf32>
    %c4_67 = arith.constant 4 : index
    %c128_68 = arith.constant 128 : index
    %217 = vector.load %arg11[%c4_67, %c128_68] : memref<16x256xf32, #tpu.memory_space<vmem>>, vector<2x128xf32>
    %218 = arith.truncf %210 : vector<2x32xf32> to vector<2x32xbf16>
    %cst_69 = arith.constant dense<0.000000e+00> : vector<2x128xf32>
    %219 = tpu.matmul %218, %11, %cst_69 {dimension_numbers = #tpu.dot_dimension_numbers<[1], [0], [0], [1], [0, 0, 1, 1], [], []>} : vector<2x32xbf16>, vector<32x128xbf16>, vector<2x128xf32> -> vector<2x128xf32>
    %220 = arith.addf %217, %219 : vector<2x128xf32>
    %221 = arith.negf %216 : vector<2x128xf32>
    %222 = math.exp %221 : vector<2x128xf32>
    %cst_70 = arith.constant 1.000000e+00 : f32
    %223 = vector.broadcast %cst_70 : f32 to vector<2x128xf32>
    %224 = arith.addf %223, %222 : vector<2x128xf32>
    %225 = arith.divf %223, %224 : vector<2x128xf32>
    %226 = math.tanh %216 : vector<2x128xf32>
    %227 = vector.extract_strided_slice %225 {offsets = [0, 0], sizes = [2, 32], strides = [1, 1]} : vector<2x128xf32> to vector<2x32xf32>
    %228 = vector.extract_strided_slice %225 {offsets = [0, 32], sizes = [2, 32], strides = [1, 1]} : vector<2x128xf32> to vector<2x32xf32>
    %229 = vector.extract_strided_slice %226 {offsets = [0, 64], sizes = [2, 32], strides = [1, 1]} : vector<2x128xf32> to vector<2x32xf32>
    %230 = vector.extract_strided_slice %225 {offsets = [0, 96], sizes = [2, 32], strides = [1, 1]} : vector<2x128xf32> to vector<2x32xf32>
    %231 = arith.mulf %228, %193 : vector<2x32xf32>
    %232 = arith.mulf %227, %229 : vector<2x32xf32>
    %233 = arith.addf %231, %232 : vector<2x32xf32>
    %234 = math.tanh %233 : vector<2x32xf32>
    %235 = arith.mulf %230, %234 : vector<2x32xf32>
    %236 = arith.negf %220 : vector<2x128xf32>
    %237 = math.exp %236 : vector<2x128xf32>
    %cst_71 = arith.constant 1.000000e+00 : f32
    %238 = vector.broadcast %cst_71 : f32 to vector<2x128xf32>
    %239 = arith.addf %238, %237 : vector<2x128xf32>
    %240 = arith.divf %238, %239 : vector<2x128xf32>
    %241 = math.tanh %220 : vector<2x128xf32>
    %242 = vector.extract_strided_slice %240 {offsets = [0, 0], sizes = [2, 32], strides = [1, 1]} : vector<2x128xf32> to vector<2x32xf32>
    %243 = vector.extract_strided_slice %240 {offsets = [0, 32], sizes = [2, 32], strides = [1, 1]} : vector<2x128xf32> to vector<2x32xf32>
    %244 = vector.extract_strided_slice %241 {offsets = [0, 64], sizes = [2, 32], strides = [1, 1]} : vector<2x128xf32> to vector<2x32xf32>
    %245 = vector.extract_strided_slice %240 {offsets = [0, 96], sizes = [2, 32], strides = [1, 1]} : vector<2x128xf32> to vector<2x32xf32>
    %246 = arith.mulf %243, %208 : vector<2x32xf32>
    %247 = arith.mulf %242, %244 : vector<2x32xf32>
    %248 = arith.addf %246, %247 : vector<2x32xf32>
    %249 = math.tanh %248 : vector<2x32xf32>
    %250 = arith.mulf %245, %249 : vector<2x32xf32>
    %c10_72 = arith.constant 10 : index
    %c0_73 = arith.constant 0 : index
    %251 = vector.load %arg12[%c10_72, %c0_73] : memref<16x64xf32, #tpu.memory_space<vmem>>, vector<2x32xf32>
    tpu.vector_store %arg12[%c10_72, %c0_73], %235 {strides = array<i32>} : memref<16x64xf32, #tpu.memory_space<vmem>>, vector<2x32xf32>,
    %c4_74 = arith.constant 4 : index
    %c32_75 = arith.constant 32 : index
    %252 = vector.load %arg12[%c4_74, %c32_75] : memref<16x64xf32, #tpu.memory_space<vmem>>, vector<2x32xf32>
    tpu.vector_store %arg12[%c4_74, %c32_75], %250 {strides = array<i32>} : memref<16x64xf32, #tpu.memory_space<vmem>>, vector<2x32xf32>,
    %c12_76 = arith.constant 12 : index
    %c0_77 = arith.constant 0 : index
    %253 = vector.load %arg11[%c12_76, %c0_77] : memref<16x256xf32, #tpu.memory_space<vmem>>, vector<2x128xf32>
    %254 = arith.truncf %235 : vector<2x32xf32> to vector<2x32xbf16>
    %cst_78 = arith.constant dense<0.000000e+00> : vector<2x128xf32>
    %255 = tpu.matmul %254, %9, %cst_78 {dimension_numbers = #tpu.dot_dimension_numbers<[1], [0], [0], [1], [0, 0, 1, 1], [], []>} : vector<2x32xbf16>, vector<32x128xbf16>, vector<2x128xf32> -> vector<2x128xf32>
    %256 = arith.addf %253, %255 : vector<2x128xf32>
    %c2_79 = arith.constant 2 : index
    %c128_80 = arith.constant 128 : index
    %257 = vector.load %arg11[%c2_79, %c128_80] : memref<16x256xf32, #tpu.memory_space<vmem>>, vector<2x128xf32>
    %258 = arith.truncf %250 : vector<2x32xf32> to vector<2x32xbf16>
    %cst_81 = arith.constant dense<0.000000e+00> : vector<2x128xf32>
    %259 = tpu.matmul %258, %11, %cst_81 {dimension_numbers = #tpu.dot_dimension_numbers<[1], [0], [0], [1], [0, 0, 1, 1], [], []>} : vector<2x32xbf16>, vector<32x128xbf16>, vector<2x128xf32> -> vector<2x128xf32>
    %260 = arith.addf %257, %259 : vector<2x128xf32>
    %261 = arith.negf %256 : vector<2x128xf32>
    %262 = math.exp %261 : vector<2x128xf32>
    %cst_82 = arith.constant 1.000000e+00 : f32
    %263 = vector.broadcast %cst_82 : f32 to vector<2x128xf32>
    %264 = arith.addf %263, %262 : vector<2x128xf32>
    %265 = arith.divf %263, %264 : vector<2x128xf32>
    %266 = math.tanh %256 : vector<2x128xf32>
    %267 = vector.extract_strided_slice %265 {offsets = [0, 0], sizes = [2, 32], strides = [1, 1]} : vector<2x128xf32> to vector<2x32xf32>
    %268 = vector.extract_strided_slice %265 {offsets = [0, 32], sizes = [2, 32], strides = [1, 1]} : vector<2x128xf32> to vector<2x32xf32>
    %269 = vector.extract_strided_slice %266 {offsets = [0, 64], sizes = [2, 32], strides = [1, 1]} : vector<2x128xf32> to vector<2x32xf32>
    %270 = vector.extract_strided_slice %265 {offsets = [0, 96], sizes = [2, 32], strides = [1, 1]} : vector<2x128xf32> to vector<2x32xf32>
    %271 = arith.mulf %268, %233 : vector<2x32xf32>
    %272 = arith.mulf %267, %269 : vector<2x32xf32>
    %273 = arith.addf %271, %272 : vector<2x32xf32>
    %274 = math.tanh %273 : vector<2x32xf32>
    %275 = arith.mulf %270, %274 : vector<2x32xf32>
    %276 = arith.negf %260 : vector<2x128xf32>
    %277 = math.exp %276 : vector<2x128xf32>
    %cst_83 = arith.constant 1.000000e+00 : f32
    %278 = vector.broadcast %cst_83 : f32 to vector<2x128xf32>
    %279 = arith.addf %278, %277 : vector<2x128xf32>
    %280 = arith.divf %278, %279 : vector<2x128xf32>
    %281 = math.tanh %260 : vector<2x128xf32>
    %282 = vector.extract_strided_slice %280 {offsets = [0, 0], sizes = [2, 32], strides = [1, 1]} : vector<2x128xf32> to vector<2x32xf32>
    %283 = vector.extract_strided_slice %280 {offsets = [0, 32], sizes = [2, 32], strides = [1, 1]} : vector<2x128xf32> to vector<2x32xf32>
    %284 = vector.extract_strided_slice %281 {offsets = [0, 64], sizes = [2, 32], strides = [1, 1]} : vector<2x128xf32> to vector<2x32xf32>
    %285 = vector.extract_strided_slice %280 {offsets = [0, 96], sizes = [2, 32], strides = [1, 1]} : vector<2x128xf32> to vector<2x32xf32>
    %286 = arith.mulf %283, %248 : vector<2x32xf32>
    %287 = arith.mulf %282, %284 : vector<2x32xf32>
    %288 = arith.addf %286, %287 : vector<2x32xf32>
    %289 = math.tanh %288 : vector<2x32xf32>
    %290 = arith.mulf %285, %289 : vector<2x32xf32>
    %c12_84 = arith.constant 12 : index
    %c0_85 = arith.constant 0 : index
    %291 = vector.load %arg12[%c12_84, %c0_85] : memref<16x64xf32, #tpu.memory_space<vmem>>, vector<2x32xf32>
    tpu.vector_store %arg12[%c12_84, %c0_85], %275 {strides = array<i32>} : memref<16x64xf32, #tpu.memory_space<vmem>>, vector<2x32xf32>,
    %c2_86 = arith.constant 2 : index
    %c32_87 = arith.constant 32 : index
    %292 = vector.load %arg12[%c2_86, %c32_87] : memref<16x64xf32, #tpu.memory_space<vmem>>, vector<2x32xf32>
    tpu.vector_store %arg12[%c2_86, %c32_87], %290 {strides = array<i32>} : memref<16x64xf32, #tpu.memory_space<vmem>>, vector<2x32xf32>,
    %c14_88 = arith.constant 14 : index
    %c0_89 = arith.constant 0 : index
    %293 = vector.load %arg11[%c14_88, %c0_89] : memref<16x256xf32, #tpu.memory_space<vmem>>, vector<2x128xf32>
    %294 = arith.truncf %275 : vector<2x32xf32> to vector<2x32xbf16>
    %cst_90 = arith.constant dense<0.000000e+00> : vector<2x128xf32>
    %295 = tpu.matmul %294, %9, %cst_90 {dimension_numbers = #tpu.dot_dimension_numbers<[1], [0], [0], [1], [0, 0, 1, 1], [], []>} : vector<2x32xbf16>, vector<32x128xbf16>, vector<2x128xf32> -> vector<2x128xf32>
    %296 = arith.addf %293, %295 : vector<2x128xf32>
    %c0_91 = arith.constant 0 : index
    %c128_92 = arith.constant 128 : index
    %297 = vector.load %arg11[%c0_91, %c128_92] : memref<16x256xf32, #tpu.memory_space<vmem>>, vector<2x128xf32>
    %298 = arith.truncf %290 : vector<2x32xf32> to vector<2x32xbf16>
    %cst_93 = arith.constant dense<0.000000e+00> : vector<2x128xf32>
    %299 = tpu.matmul %298, %11, %cst_93 {dimension_numbers = #tpu.dot_dimension_numbers<[1], [0], [0], [1], [0, 0, 1, 1], [], []>} : vector<2x32xbf16>, vector<32x128xbf16>, vector<2x128xf32> -> vector<2x128xf32>
    %300 = arith.addf %297, %299 : vector<2x128xf32>
    %301 = arith.negf %296 : vector<2x128xf32>
    %302 = math.exp %301 : vector<2x128xf32>
    %cst_94 = arith.constant 1.000000e+00 : f32
    %303 = vector.broadcast %cst_94 : f32 to vector<2x128xf32>
    %304 = arith.addf %303, %302 : vector<2x128xf32>
    %305 = arith.divf %303, %304 : vector<2x128xf32>
    %306 = math.tanh %296 : vector<2x128xf32>
    %307 = vector.extract_strided_slice %305 {offsets = [0, 0], sizes = [2, 32], strides = [1, 1]} : vector<2x128xf32> to vector<2x32xf32>
    %308 = vector.extract_strided_slice %305 {offsets = [0, 32], sizes = [2, 32], strides = [1, 1]} : vector<2x128xf32> to vector<2x32xf32>
    %309 = vector.extract_strided_slice %306 {offsets = [0, 64], sizes = [2, 32], strides = [1, 1]} : vector<2x128xf32> to vector<2x32xf32>
    %310 = vector.extract_strided_slice %305 {offsets = [0, 96], sizes = [2, 32], strides = [1, 1]} : vector<2x128xf32> to vector<2x32xf32>
    %311 = arith.mulf %308, %273 : vector<2x32xf32>
    %312 = arith.mulf %307, %309 : vector<2x32xf32>
    %313 = arith.addf %311, %312 : vector<2x32xf32>
    %314 = math.tanh %313 : vector<2x32xf32>
    %315 = arith.mulf %310, %314 : vector<2x32xf32>
    %316 = arith.negf %300 : vector<2x128xf32>
    %317 = math.exp %316 : vector<2x128xf32>
    %cst_95 = arith.constant 1.000000e+00 : f32
    %318 = vector.broadcast %cst_95 : f32 to vector<2x128xf32>
    %319 = arith.addf %318, %317 : vector<2x128xf32>
    %320 = arith.divf %318, %319 : vector<2x128xf32>
    %321 = math.tanh %300 : vector<2x128xf32>
    %322 = vector.extract_strided_slice %320 {offsets = [0, 0], sizes = [2, 32], strides = [1, 1]} : vector<2x128xf32> to vector<2x32xf32>
    %323 = vector.extract_strided_slice %320 {offsets = [0, 32], sizes = [2, 32], strides = [1, 1]} : vector<2x128xf32> to vector<2x32xf32>
    %324 = vector.extract_strided_slice %321 {offsets = [0, 64], sizes = [2, 32], strides = [1, 1]} : vector<2x128xf32> to vector<2x32xf32>
    %325 = vector.extract_strided_slice %320 {offsets = [0, 96], sizes = [2, 32], strides = [1, 1]} : vector<2x128xf32> to vector<2x32xf32>
    %326 = arith.mulf %323, %288 : vector<2x32xf32>
    %327 = arith.mulf %322, %324 : vector<2x32xf32>
    %328 = arith.addf %326, %327 : vector<2x32xf32>
    %329 = math.tanh %328 : vector<2x32xf32>
    %330 = arith.mulf %325, %329 : vector<2x32xf32>
    %c14_96 = arith.constant 14 : index
    %c0_97 = arith.constant 0 : index
    %331 = vector.load %arg12[%c14_96, %c0_97] : memref<16x64xf32, #tpu.memory_space<vmem>>, vector<2x32xf32>
    tpu.vector_store %arg12[%c14_96, %c0_97], %315 {strides = array<i32>} : memref<16x64xf32, #tpu.memory_space<vmem>>, vector<2x32xf32>,
    %c0_98 = arith.constant 0 : index
    %c32_99 = arith.constant 32 : index
    %332 = vector.load %arg12[%c0_98, %c32_99] : memref<16x64xf32, #tpu.memory_space<vmem>>, vector<2x32xf32>
    tpu.vector_store %arg12[%c0_98, %c32_99], %330 {strides = array<i32>} : memref<16x64xf32, #tpu.memory_space<vmem>>, vector<2x32xf32>,
    %c0_100 = arith.constant 0 : index
    %c0_101 = arith.constant 0 : index
    %333 = vector.load %arg12[%c0_100, %c0_101] : memref<16x64xf32, #tpu.memory_space<vmem>>, vector<16x64xf32>
    %334 = arith.truncf %333 : vector<16x64xf32> to vector<16x64xbf16>
    %c0_102 = arith.constant 0 : index
    %c0_103 = arith.constant 0 : index
    %335 = vector.load %arg5[%c0_102, %c0_103] : memref<64x256xbf16, #tpu.memory_space<vmem>>, vector<64x256xbf16>
    %cst_104 = arith.constant dense<0.000000e+00> : vector<16x256xf32>
    %336 = tpu.matmul %334, %335, %cst_104 {dimension_numbers = #tpu.dot_dimension_numbers<[1], [0], [0], [1], [0, 0, 1, 1], [], []>} : vector<16x64xbf16>, vector<64x256xbf16>, vector<16x256xf32> -> vector<16x256xf32>
    %c0_105 = arith.constant 0 : index
    %c0_106 = arith.constant 0 : index
    %337 = vector.load %arg6[%c0_105, %c0_106] : memref<1x256xf32, #tpu.memory_space<vmem>>, vector<1x256xf32>
    %338 = vector.broadcast %337 : vector<1x256xf32> to vector<16x256xf32>
    %339 = arith.addf %336, %338 : vector<16x256xf32>
    %c0_107 = arith.constant 0 : index
    %c0_108 = arith.constant 0 : index
    %340 = vector.load %arg11[%c0_107, %c0_108] : memref<16x256xf32, #tpu.memory_space<vmem>>, vector<16x256xf32>
    tpu.vector_store %arg11[%c0_107, %c0_108], %339 {strides = array<i32>} : memref<16x256xf32, #tpu.memory_space<vmem>>, vector<16x256xf32>,
    %c0_109 = arith.constant 0 : index
    %c0_110 = arith.constant 0 : index
    %c0_111 = arith.constant 0 : index
    %341 = vector.load %arg7[%c0_109, %c0_110, %c0_111] : memref<2x32x128xbf16, #tpu.memory_space<vmem>>, vector<1x32x128xbf16>
    %342 = vector.shape_cast %341 : vector<1x32x128xbf16> to vector<32x128xbf16>
    %c1_112 = arith.constant 1 : index
    %c0_113 = arith.constant 0 : index
    %c0_114 = arith.constant 0 : index
    %343 = vector.load %arg7[%c1_112, %c0_113, %c0_114] : memref<2x32x128xbf16, #tpu.memory_space<vmem>>, vector<1x32x128xbf16>
    %344 = vector.shape_cast %343 : vector<1x32x128xbf16> to vector<32x128xbf16>
    %cst_115 = arith.constant 0.000000e+00 : f32
    %345 = vector.broadcast %cst_115 : f32 to vector<2x32xf32>
    %c0_116 = arith.constant 0 : index
    %c0_117 = arith.constant 0 : index
    %346 = vector.load %arg11[%c0_116, %c0_117] : memref<16x256xf32, #tpu.memory_space<vmem>>, vector<2x128xf32>
    %347 = arith.truncf %345 : vector<2x32xf32> to vector<2x32xbf16>
    %cst_118 = arith.constant dense<0.000000e+00> : vector<2x128xf32>
    %348 = tpu.matmul %347, %342, %cst_118 {dimension_numbers = #tpu.dot_dimension_numbers<[1], [0], [0], [1], [0, 0, 1, 1], [], []>} : vector<2x32xbf16>, vector<32x128xbf16>, vector<2x128xf32> -> vector<2x128xf32>
    %349 = arith.addf %346, %348 : vector<2x128xf32>
    %c14_119 = arith.constant 14 : index
    %c128_120 = arith.constant 128 : index
    %350 = vector.load %arg11[%c14_119, %c128_120] : memref<16x256xf32, #tpu.memory_space<vmem>>, vector<2x128xf32>
    %351 = arith.truncf %345 : vector<2x32xf32> to vector<2x32xbf16>
    %cst_121 = arith.constant dense<0.000000e+00> : vector<2x128xf32>
    %352 = tpu.matmul %351, %344, %cst_121 {dimension_numbers = #tpu.dot_dimension_numbers<[1], [0], [0], [1], [0, 0, 1, 1], [], []>} : vector<2x32xbf16>, vector<32x128xbf16>, vector<2x128xf32> -> vector<2x128xf32>
    %353 = arith.addf %350, %352 : vector<2x128xf32>
    %354 = arith.negf %349 : vector<2x128xf32>
    %355 = math.exp %354 : vector<2x128xf32>
    %cst_122 = arith.constant 1.000000e+00 : f32
    %356 = vector.broadcast %cst_122 : f32 to vector<2x128xf32>
    %357 = arith.addf %356, %355 : vector<2x128xf32>
    %358 = arith.divf %356, %357 : vector<2x128xf32>
    %359 = math.tanh %349 : vector<2x128xf32>
    %360 = vector.extract_strided_slice %358 {offsets = [0, 0], sizes = [2, 32], strides = [1, 1]} : vector<2x128xf32> to vector<2x32xf32>
    %361 = vector.extract_strided_slice %358 {offsets = [0, 32], sizes = [2, 32], strides = [1, 1]} : vector<2x128xf32> to vector<2x32xf32>
    %362 = vector.extract_strided_slice %359 {offsets = [0, 64], sizes = [2, 32], strides = [1, 1]} : vector<2x128xf32> to vector<2x32xf32>
    %363 = vector.extract_strided_slice %358 {offsets = [0, 96], sizes = [2, 32], strides = [1, 1]} : vector<2x128xf32> to vector<2x32xf32>
    %364 = arith.mulf %361, %345 : vector<2x32xf32>
    %365 = arith.mulf %360, %362 : vector<2x32xf32>
    %366 = arith.addf %364, %365 : vector<2x32xf32>
    %367 = math.tanh %366 : vector<2x32xf32>
    %368 = arith.mulf %363, %367 : vector<2x32xf32>
    %369 = arith.negf %353 : vector<2x128xf32>
    %370 = math.exp %369 : vector<2x128xf32>
    %cst_123 = arith.constant 1.000000e+00 : f32
    %371 = vector.broadcast %cst_123 : f32 to vector<2x128xf32>
    %372 = arith.addf %371, %370 : vector<2x128xf32>
    %373 = arith.divf %371, %372 : vector<2x128xf32>
    %374 = math.tanh %353 : vector<2x128xf32>
    %375 = vector.extract_strided_slice %373 {offsets = [0, 0], sizes = [2, 32], strides = [1, 1]} : vector<2x128xf32> to vector<2x32xf32>
    %376 = vector.extract_strided_slice %373 {offsets = [0, 32], sizes = [2, 32], strides = [1, 1]} : vector<2x128xf32> to vector<2x32xf32>
    %377 = vector.extract_strided_slice %374 {offsets = [0, 64], sizes = [2, 32], strides = [1, 1]} : vector<2x128xf32> to vector<2x32xf32>
    %378 = vector.extract_strided_slice %373 {offsets = [0, 96], sizes = [2, 32], strides = [1, 1]} : vector<2x128xf32> to vector<2x32xf32>
    %379 = arith.mulf %376, %345 : vector<2x32xf32>
    %380 = arith.mulf %375, %377 : vector<2x32xf32>
    %381 = arith.addf %379, %380 : vector<2x32xf32>
    %382 = math.tanh %381 : vector<2x32xf32>
    %383 = arith.mulf %378, %382 : vector<2x32xf32>
    %c0_124 = arith.constant 0 : index
    %c0_125 = arith.constant 0 : index
    %384 = vector.load %arg13[%c0_124, %c0_125] : memref<16x64xf32, #tpu.memory_space<vmem>>, vector<2x32xf32>
    tpu.vector_store %arg13[%c0_124, %c0_125], %368 {strides = array<i32>} : memref<16x64xf32, #tpu.memory_space<vmem>>, vector<2x32xf32>,
    %c14_126 = arith.constant 14 : index
    %c32_127 = arith.constant 32 : index
    %385 = vector.load %arg13[%c14_126, %c32_127] : memref<16x64xf32, #tpu.memory_space<vmem>>, vector<2x32xf32>
    tpu.vector_store %arg13[%c14_126, %c32_127], %383 {strides = array<i32>} : memref<16x64xf32, #tpu.memory_space<vmem>>, vector<2x32xf32>,
    %c2_128 = arith.constant 2 : index
    %c0_129 = arith.constant 0 : index
    %386 = vector.load %arg11[%c2_128, %c0_129] : memref<16x256xf32, #tpu.memory_space<vmem>>, vector<2x128xf32>
    %387 = arith.truncf %368 : vector<2x32xf32> to vector<2x32xbf16>
    %cst_130 = arith.constant dense<0.000000e+00> : vector<2x128xf32>
    %388 = tpu.matmul %387, %342, %cst_130 {dimension_numbers = #tpu.dot_dimension_numbers<[1], [0], [0], [1], [0, 0, 1, 1], [], []>} : vector<2x32xbf16>, vector<32x128xbf16>, vector<2x128xf32> -> vector<2x128xf32>
    %389 = arith.addf %386, %388 : vector<2x128xf32>
    %c12_131 = arith.constant 12 : index
    %c128_132 = arith.constant 128 : index
    %390 = vector.load %arg11[%c12_131, %c128_132] : memref<16x256xf32, #tpu.memory_space<vmem>>, vector<2x128xf32>
    %391 = arith.truncf %383 : vector<2x32xf32> to vector<2x32xbf16>
    %cst_133 = arith.constant dense<0.000000e+00> : vector<2x128xf32>
    %392 = tpu.matmul %391, %344, %cst_133 {dimension_numbers = #tpu.dot_dimension_numbers<[1], [0], [0], [1], [0, 0, 1, 1], [], []>} : vector<2x32xbf16>, vector<32x128xbf16>, vector<2x128xf32> -> vector<2x128xf32>
    %393 = arith.addf %390, %392 : vector<2x128xf32>
    %394 = arith.negf %389 : vector<2x128xf32>
    %395 = math.exp %394 : vector<2x128xf32>
    %cst_134 = arith.constant 1.000000e+00 : f32
    %396 = vector.broadcast %cst_134 : f32 to vector<2x128xf32>
    %397 = arith.addf %396, %395 : vector<2x128xf32>
    %398 = arith.divf %396, %397 : vector<2x128xf32>
    %399 = math.tanh %389 : vector<2x128xf32>
    %400 = vector.extract_strided_slice %398 {offsets = [0, 0], sizes = [2, 32], strides = [1, 1]} : vector<2x128xf32> to vector<2x32xf32>
    %401 = vector.extract_strided_slice %398 {offsets = [0, 32], sizes = [2, 32], strides = [1, 1]} : vector<2x128xf32> to vector<2x32xf32>
    %402 = vector.extract_strided_slice %399 {offsets = [0, 64], sizes = [2, 32], strides = [1, 1]} : vector<2x128xf32> to vector<2x32xf32>
    %403 = vector.extract_strided_slice %398 {offsets = [0, 96], sizes = [2, 32], strides = [1, 1]} : vector<2x128xf32> to vector<2x32xf32>
    %404 = arith.mulf %401, %366 : vector<2x32xf32>
    %405 = arith.mulf %400, %402 : vector<2x32xf32>
    %406 = arith.addf %404, %405 : vector<2x32xf32>
    %407 = math.tanh %406 : vector<2x32xf32>
    %408 = arith.mulf %403, %407 : vector<2x32xf32>
    %409 = arith.negf %393 : vector<2x128xf32>
    %410 = math.exp %409 : vector<2x128xf32>
    %cst_135 = arith.constant 1.000000e+00 : f32
    %411 = vector.broadcast %cst_135 : f32 to vector<2x128xf32>
    %412 = arith.addf %411, %410 : vector<2x128xf32>
    %413 = arith.divf %411, %412 : vector<2x128xf32>
    %414 = math.tanh %393 : vector<2x128xf32>
    %415 = vector.extract_strided_slice %413 {offsets = [0, 0], sizes = [2, 32], strides = [1, 1]} : vector<2x128xf32> to vector<2x32xf32>
    %416 = vector.extract_strided_slice %413 {offsets = [0, 32], sizes = [2, 32], strides = [1, 1]} : vector<2x128xf32> to vector<2x32xf32>
    %417 = vector.extract_strided_slice %414 {offsets = [0, 64], sizes = [2, 32], strides = [1, 1]} : vector<2x128xf32> to vector<2x32xf32>
    %418 = vector.extract_strided_slice %413 {offsets = [0, 96], sizes = [2, 32], strides = [1, 1]} : vector<2x128xf32> to vector<2x32xf32>
    %419 = arith.mulf %416, %381 : vector<2x32xf32>
    %420 = arith.mulf %415, %417 : vector<2x32xf32>
    %421 = arith.addf %419, %420 : vector<2x32xf32>
    %422 = math.tanh %421 : vector<2x32xf32>
    %423 = arith.mulf %418, %422 : vector<2x32xf32>
    %c2_136 = arith.constant 2 : index
    %c0_137 = arith.constant 0 : index
    %424 = vector.load %arg13[%c2_136, %c0_137] : memref<16x64xf32, #tpu.memory_space<vmem>>, vector<2x32xf32>
    tpu.vector_store %arg13[%c2_136, %c0_137], %408 {strides = array<i32>} : memref<16x64xf32, #tpu.memory_space<vmem>>, vector<2x32xf32>,
    %c12_138 = arith.constant 12 : index
    %c32_139 = arith.constant 32 : index
    %425 = vector.load %arg13[%c12_138, %c32_139] : memref<16x64xf32, #tpu.memory_space<vmem>>, vector<2x32xf32>
    tpu.vector_store %arg13[%c12_138, %c32_139], %423 {strides = array<i32>} : memref<16x64xf32, #tpu.memory_space<vmem>>, vector<2x32xf32>,
    %c4_140 = arith.constant 4 : index
    %c0_141 = arith.constant 0 : index
    %426 = vector.load %arg11[%c4_140, %c0_141] : memref<16x256xf32, #tpu.memory_space<vmem>>, vector<2x128xf32>
    %427 = arith.truncf %408 : vector<2x32xf32> to vector<2x32xbf16>
    %cst_142 = arith.constant dense<0.000000e+00> : vector<2x128xf32>
    %428 = tpu.matmul %427, %342, %cst_142 {dimension_numbers = #tpu.dot_dimension_numbers<[1], [0], [0], [1], [0, 0, 1, 1], [], []>} : vector<2x32xbf16>, vector<32x128xbf16>, vector<2x128xf32> -> vector<2x128xf32>
    %429 = arith.addf %426, %428 : vector<2x128xf32>
    %c10_143 = arith.constant 10 : index
    %c128_144 = arith.constant 128 : index
    %430 = vector.load %arg11[%c10_143, %c128_144] : memref<16x256xf32, #tpu.memory_space<vmem>>, vector<2x128xf32>
    %431 = arith.truncf %423 : vector<2x32xf32> to vector<2x32xbf16>
    %cst_145 = arith.constant dense<0.000000e+00> : vector<2x128xf32>
    %432 = tpu.matmul %431, %344, %cst_145 {dimension_numbers = #tpu.dot_dimension_numbers<[1], [0], [0], [1], [0, 0, 1, 1], [], []>} : vector<2x32xbf16>, vector<32x128xbf16>, vector<2x128xf32> -> vector<2x128xf32>
    %433 = arith.addf %430, %432 : vector<2x128xf32>
    %434 = arith.negf %429 : vector<2x128xf32>
    %435 = math.exp %434 : vector<2x128xf32>
    %cst_146 = arith.constant 1.000000e+00 : f32
    %436 = vector.broadcast %cst_146 : f32 to vector<2x128xf32>
    %437 = arith.addf %436, %435 : vector<2x128xf32>
    %438 = arith.divf %436, %437 : vector<2x128xf32>
    %439 = math.tanh %429 : vector<2x128xf32>
    %440 = vector.extract_strided_slice %438 {offsets = [0, 0], sizes = [2, 32], strides = [1, 1]} : vector<2x128xf32> to vector<2x32xf32>
    %441 = vector.extract_strided_slice %438 {offsets = [0, 32], sizes = [2, 32], strides = [1, 1]} : vector<2x128xf32> to vector<2x32xf32>
    %442 = vector.extract_strided_slice %439 {offsets = [0, 64], sizes = [2, 32], strides = [1, 1]} : vector<2x128xf32> to vector<2x32xf32>
    %443 = vector.extract_strided_slice %438 {offsets = [0, 96], sizes = [2, 32], strides = [1, 1]} : vector<2x128xf32> to vector<2x32xf32>
    %444 = arith.mulf %441, %406 : vector<2x32xf32>
    %445 = arith.mulf %440, %442 : vector<2x32xf32>
    %446 = arith.addf %444, %445 : vector<2x32xf32>
    %447 = math.tanh %446 : vector<2x32xf32>
    %448 = arith.mulf %443, %447 : vector<2x32xf32>
    %449 = arith.negf %433 : vector<2x128xf32>
    %450 = math.exp %449 : vector<2x128xf32>
    %cst_147 = arith.constant 1.000000e+00 : f32
    %451 = vector.broadcast %cst_147 : f32 to vector<2x128xf32>
    %452 = arith.addf %451, %450 : vector<2x128xf32>
    %453 = arith.divf %451, %452 : vector<2x128xf32>
    %454 = math.tanh %433 : vector<2x128xf32>
    %455 = vector.extract_strided_slice %453 {offsets = [0, 0], sizes = [2, 32], strides = [1, 1]} : vector<2x128xf32> to vector<2x32xf32>
    %456 = vector.extract_strided_slice %453 {offsets = [0, 32], sizes = [2, 32], strides = [1, 1]} : vector<2x128xf32> to vector<2x32xf32>
    %457 = vector.extract_strided_slice %454 {offsets = [0, 64], sizes = [2, 32], strides = [1, 1]} : vector<2x128xf32> to vector<2x32xf32>
    %458 = vector.extract_strided_slice %453 {offsets = [0, 96], sizes = [2, 32], strides = [1, 1]} : vector<2x128xf32> to vector<2x32xf32>
    %459 = arith.mulf %456, %421 : vector<2x32xf32>
    %460 = arith.mulf %455, %457 : vector<2x32xf32>
    %461 = arith.addf %459, %460 : vector<2x32xf32>
    %462 = math.tanh %461 : vector<2x32xf32>
    %463 = arith.mulf %458, %462 : vector<2x32xf32>
    %c4_148 = arith.constant 4 : index
    %c0_149 = arith.constant 0 : index
    %464 = vector.load %arg13[%c4_148, %c0_149] : memref<16x64xf32, #tpu.memory_space<vmem>>, vector<2x32xf32>
    tpu.vector_store %arg13[%c4_148, %c0_149], %448 {strides = array<i32>} : memref<16x64xf32, #tpu.memory_space<vmem>>, vector<2x32xf32>,
    %c10_150 = arith.constant 10 : index
    %c32_151 = arith.constant 32 : index
    %465 = vector.load %arg13[%c10_150, %c32_151] : memref<16x64xf32, #tpu.memory_space<vmem>>, vector<2x32xf32>
    tpu.vector_store %arg13[%c10_150, %c32_151], %463 {strides = array<i32>} : memref<16x64xf32, #tpu.memory_space<vmem>>, vector<2x32xf32>,
    %c6_152 = arith.constant 6 : index
    %c0_153 = arith.constant 0 : index
    %466 = vector.load %arg11[%c6_152, %c0_153] : memref<16x256xf32, #tpu.memory_space<vmem>>, vector<2x128xf32>
    %467 = arith.truncf %448 : vector<2x32xf32> to vector<2x32xbf16>
    %cst_154 = arith.constant dense<0.000000e+00> : vector<2x128xf32>
    %468 = tpu.matmul %467, %342, %cst_154 {dimension_numbers = #tpu.dot_dimension_numbers<[1], [0], [0], [1], [0, 0, 1, 1], [], []>} : vector<2x32xbf16>, vector<32x128xbf16>, vector<2x128xf32> -> vector<2x128xf32>
    %469 = arith.addf %466, %468 : vector<2x128xf32>
    %c8_155 = arith.constant 8 : index
    %c128_156 = arith.constant 128 : index
    %470 = vector.load %arg11[%c8_155, %c128_156] : memref<16x256xf32, #tpu.memory_space<vmem>>, vector<2x128xf32>
    %471 = arith.truncf %463 : vector<2x32xf32> to vector<2x32xbf16>
    %cst_157 = arith.constant dense<0.000000e+00> : vector<2x128xf32>
    %472 = tpu.matmul %471, %344, %cst_157 {dimension_numbers = #tpu.dot_dimension_numbers<[1], [0], [0], [1], [0, 0, 1, 1], [], []>} : vector<2x32xbf16>, vector<32x128xbf16>, vector<2x128xf32> -> vector<2x128xf32>
    %473 = arith.addf %470, %472 : vector<2x128xf32>
    %474 = arith.negf %469 : vector<2x128xf32>
    %475 = math.exp %474 : vector<2x128xf32>
    %cst_158 = arith.constant 1.000000e+00 : f32
    %476 = vector.broadcast %cst_158 : f32 to vector<2x128xf32>
    %477 = arith.addf %476, %475 : vector<2x128xf32>
    %478 = arith.divf %476, %477 : vector<2x128xf32>
    %479 = math.tanh %469 : vector<2x128xf32>
    %480 = vector.extract_strided_slice %478 {offsets = [0, 0], sizes = [2, 32], strides = [1, 1]} : vector<2x128xf32> to vector<2x32xf32>
    %481 = vector.extract_strided_slice %478 {offsets = [0, 32], sizes = [2, 32], strides = [1, 1]} : vector<2x128xf32> to vector<2x32xf32>
    %482 = vector.extract_strided_slice %479 {offsets = [0, 64], sizes = [2, 32], strides = [1, 1]} : vector<2x128xf32> to vector<2x32xf32>
    %483 = vector.extract_strided_slice %478 {offsets = [0, 96], sizes = [2, 32], strides = [1, 1]} : vector<2x128xf32> to vector<2x32xf32>
    %484 = arith.mulf %481, %446 : vector<2x32xf32>
    %485 = arith.mulf %480, %482 : vector<2x32xf32>
    %486 = arith.addf %484, %485 : vector<2x32xf32>
    %487 = math.tanh %486 : vector<2x32xf32>
    %488 = arith.mulf %483, %487 : vector<2x32xf32>
    %489 = arith.negf %473 : vector<2x128xf32>
    %490 = math.exp %489 : vector<2x128xf32>
    %cst_159 = arith.constant 1.000000e+00 : f32
    %491 = vector.broadcast %cst_159 : f32 to vector<2x128xf32>
    %492 = arith.addf %491, %490 : vector<2x128xf32>
    %493 = arith.divf %491, %492 : vector<2x128xf32>
    %494 = math.tanh %473 : vector<2x128xf32>
    %495 = vector.extract_strided_slice %493 {offsets = [0, 0], sizes = [2, 32], strides = [1, 1]} : vector<2x128xf32> to vector<2x32xf32>
    %496 = vector.extract_strided_slice %493 {offsets = [0, 32], sizes = [2, 32], strides = [1, 1]} : vector<2x128xf32> to vector<2x32xf32>
    %497 = vector.extract_strided_slice %494 {offsets = [0, 64], sizes = [2, 32], strides = [1, 1]} : vector<2x128xf32> to vector<2x32xf32>
    %498 = vector.extract_strided_slice %493 {offsets = [0, 96], sizes = [2, 32], strides = [1, 1]} : vector<2x128xf32> to vector<2x32xf32>
    %499 = arith.mulf %496, %461 : vector<2x32xf32>
    %500 = arith.mulf %495, %497 : vector<2x32xf32>
    %501 = arith.addf %499, %500 : vector<2x32xf32>
    %502 = math.tanh %501 : vector<2x32xf32>
    %503 = arith.mulf %498, %502 : vector<2x32xf32>
    %c6_160 = arith.constant 6 : index
    %c0_161 = arith.constant 0 : index
    %504 = vector.load %arg13[%c6_160, %c0_161] : memref<16x64xf32, #tpu.memory_space<vmem>>, vector<2x32xf32>
    tpu.vector_store %arg13[%c6_160, %c0_161], %488 {strides = array<i32>} : memref<16x64xf32, #tpu.memory_space<vmem>>, vector<2x32xf32>,
    %c8_162 = arith.constant 8 : index
    %c32_163 = arith.constant 32 : index
    %505 = vector.load %arg13[%c8_162, %c32_163] : memref<16x64xf32, #tpu.memory_space<vmem>>, vector<2x32xf32>
    tpu.vector_store %arg13[%c8_162, %c32_163], %503 {strides = array<i32>} : memref<16x64xf32, #tpu.memory_space<vmem>>, vector<2x32xf32>,
    %c8_164 = arith.constant 8 : index
    %c0_165 = arith.constant 0 : index
    %506 = vector.load %arg11[%c8_164, %c0_165] : memref<16x256xf32, #tpu.memory_space<vmem>>, vector<2x128xf32>
    %507 = arith.truncf %488 : vector<2x32xf32> to vector<2x32xbf16>
    %cst_166 = arith.constant dense<0.000000e+00> : vector<2x128xf32>
    %508 = tpu.matmul %507, %342, %cst_166 {dimension_numbers = #tpu.dot_dimension_numbers<[1], [0], [0], [1], [0, 0, 1, 1], [], []>} : vector<2x32xbf16>, vector<32x128xbf16>, vector<2x128xf32> -> vector<2x128xf32>
    %509 = arith.addf %506, %508 : vector<2x128xf32>
    %c6_167 = arith.constant 6 : index
    %c128_168 = arith.constant 128 : index
    %510 = vector.load %arg11[%c6_167, %c128_168] : memref<16x256xf32, #tpu.memory_space<vmem>>, vector<2x128xf32>
    %511 = arith.truncf %503 : vector<2x32xf32> to vector<2x32xbf16>
    %cst_169 = arith.constant dense<0.000000e+00> : vector<2x128xf32>
    %512 = tpu.matmul %511, %344, %cst_169 {dimension_numbers = #tpu.dot_dimension_numbers<[1], [0], [0], [1], [0, 0, 1, 1], [], []>} : vector<2x32xbf16>, vector<32x128xbf16>, vector<2x128xf32> -> vector<2x128xf32>
    %513 = arith.addf %510, %512 : vector<2x128xf32>
    %514 = arith.negf %509 : vector<2x128xf32>
    %515 = math.exp %514 : vector<2x128xf32>
    %cst_170 = arith.constant 1.000000e+00 : f32
    %516 = vector.broadcast %cst_170 : f32 to vector<2x128xf32>
    %517 = arith.addf %516, %515 : vector<2x128xf32>
    %518 = arith.divf %516, %517 : vector<2x128xf32>
    %519 = math.tanh %509 : vector<2x128xf32>
    %520 = vector.extract_strided_slice %518 {offsets = [0, 0], sizes = [2, 32], strides = [1, 1]} : vector<2x128xf32> to vector<2x32xf32>
    %521 = vector.extract_strided_slice %518 {offsets = [0, 32], sizes = [2, 32], strides = [1, 1]} : vector<2x128xf32> to vector<2x32xf32>
    %522 = vector.extract_strided_slice %519 {offsets = [0, 64], sizes = [2, 32], strides = [1, 1]} : vector<2x128xf32> to vector<2x32xf32>
    %523 = vector.extract_strided_slice %518 {offsets = [0, 96], sizes = [2, 32], strides = [1, 1]} : vector<2x128xf32> to vector<2x32xf32>
    %524 = arith.mulf %521, %486 : vector<2x32xf32>
    %525 = arith.mulf %520, %522 : vector<2x32xf32>
    %526 = arith.addf %524, %525 : vector<2x32xf32>
    %527 = math.tanh %526 : vector<2x32xf32>
    %528 = arith.mulf %523, %527 : vector<2x32xf32>
    %529 = arith.negf %513 : vector<2x128xf32>
    %530 = math.exp %529 : vector<2x128xf32>
    %cst_171 = arith.constant 1.000000e+00 : f32
    %531 = vector.broadcast %cst_171 : f32 to vector<2x128xf32>
    %532 = arith.addf %531, %530 : vector<2x128xf32>
    %533 = arith.divf %531, %532 : vector<2x128xf32>
    %534 = math.tanh %513 : vector<2x128xf32>
    %535 = vector.extract_strided_slice %533 {offsets = [0, 0], sizes = [2, 32], strides = [1, 1]} : vector<2x128xf32> to vector<2x32xf32>
    %536 = vector.extract_strided_slice %533 {offsets = [0, 32], sizes = [2, 32], strides = [1, 1]} : vector<2x128xf32> to vector<2x32xf32>
    %537 = vector.extract_strided_slice %534 {offsets = [0, 64], sizes = [2, 32], strides = [1, 1]} : vector<2x128xf32> to vector<2x32xf32>
    %538 = vector.extract_strided_slice %533 {offsets = [0, 96], sizes = [2, 32], strides = [1, 1]} : vector<2x128xf32> to vector<2x32xf32>
    %539 = arith.mulf %536, %501 : vector<2x32xf32>
    %540 = arith.mulf %535, %537 : vector<2x32xf32>
    %541 = arith.addf %539, %540 : vector<2x32xf32>
    %542 = math.tanh %541 : vector<2x32xf32>
    %543 = arith.mulf %538, %542 : vector<2x32xf32>
    %c8_172 = arith.constant 8 : index
    %c0_173 = arith.constant 0 : index
    %544 = vector.load %arg13[%c8_172, %c0_173] : memref<16x64xf32, #tpu.memory_space<vmem>>, vector<2x32xf32>
    tpu.vector_store %arg13[%c8_172, %c0_173], %528 {strides = array<i32>} : memref<16x64xf32, #tpu.memory_space<vmem>>, vector<2x32xf32>,
    %c6_174 = arith.constant 6 : index
    %c32_175 = arith.constant 32 : index
    %545 = vector.load %arg13[%c6_174, %c32_175] : memref<16x64xf32, #tpu.memory_space<vmem>>, vector<2x32xf32>
    tpu.vector_store %arg13[%c6_174, %c32_175], %543 {strides = array<i32>} : memref<16x64xf32, #tpu.memory_space<vmem>>, vector<2x32xf32>,
    %c10_176 = arith.constant 10 : index
    %c0_177 = arith.constant 0 : index
    %546 = vector.load %arg11[%c10_176, %c0_177] : memref<16x256xf32, #tpu.memory_space<vmem>>, vector<2x128xf32>
    %547 = arith.truncf %528 : vector<2x32xf32> to vector<2x32xbf16>
    %cst_178 = arith.constant dense<0.000000e+00> : vector<2x128xf32>
    %548 = tpu.matmul %547, %342, %cst_178 {dimension_numbers = #tpu.dot_dimension_numbers<[1], [0], [0], [1], [0, 0, 1, 1], [], []>} : vector<2x32xbf16>, vector<32x128xbf16>, vector<2x128xf32> -> vector<2x128xf32>
    %549 = arith.addf %546, %548 : vector<2x128xf32>
    %c4_179 = arith.constant 4 : index
    %c128_180 = arith.constant 128 : index
    %550 = vector.load %arg11[%c4_179, %c128_180] : memref<16x256xf32, #tpu.memory_space<vmem>>, vector<2x128xf32>
    %551 = arith.truncf %543 : vector<2x32xf32> to vector<2x32xbf16>
    %cst_181 = arith.constant dense<0.000000e+00> : vector<2x128xf32>
    %552 = tpu.matmul %551, %344, %cst_181 {dimension_numbers = #tpu.dot_dimension_numbers<[1], [0], [0], [1], [0, 0, 1, 1], [], []>} : vector<2x32xbf16>, vector<32x128xbf16>, vector<2x128xf32> -> vector<2x128xf32>
    %553 = arith.addf %550, %552 : vector<2x128xf32>
    %554 = arith.negf %549 : vector<2x128xf32>
    %555 = math.exp %554 : vector<2x128xf32>
    %cst_182 = arith.constant 1.000000e+00 : f32
    %556 = vector.broadcast %cst_182 : f32 to vector<2x128xf32>
    %557 = arith.addf %556, %555 : vector<2x128xf32>
    %558 = arith.divf %556, %557 : vector<2x128xf32>
    %559 = math.tanh %549 : vector<2x128xf32>
    %560 = vector.extract_strided_slice %558 {offsets = [0, 0], sizes = [2, 32], strides = [1, 1]} : vector<2x128xf32> to vector<2x32xf32>
    %561 = vector.extract_strided_slice %558 {offsets = [0, 32], sizes = [2, 32], strides = [1, 1]} : vector<2x128xf32> to vector<2x32xf32>
    %562 = vector.extract_strided_slice %559 {offsets = [0, 64], sizes = [2, 32], strides = [1, 1]} : vector<2x128xf32> to vector<2x32xf32>
    %563 = vector.extract_strided_slice %558 {offsets = [0, 96], sizes = [2, 32], strides = [1, 1]} : vector<2x128xf32> to vector<2x32xf32>
    %564 = arith.mulf %561, %526 : vector<2x32xf32>
    %565 = arith.mulf %560, %562 : vector<2x32xf32>
    %566 = arith.addf %564, %565 : vector<2x32xf32>
    %567 = math.tanh %566 : vector<2x32xf32>
    %568 = arith.mulf %563, %567 : vector<2x32xf32>
    %569 = arith.negf %553 : vector<2x128xf32>
    %570 = math.exp %569 : vector<2x128xf32>
    %cst_183 = arith.constant 1.000000e+00 : f32
    %571 = vector.broadcast %cst_183 : f32 to vector<2x128xf32>
    %572 = arith.addf %571, %570 : vector<2x128xf32>
    %573 = arith.divf %571, %572 : vector<2x128xf32>
    %574 = math.tanh %553 : vector<2x128xf32>
    %575 = vector.extract_strided_slice %573 {offsets = [0, 0], sizes = [2, 32], strides = [1, 1]} : vector<2x128xf32> to vector<2x32xf32>
    %576 = vector.extract_strided_slice %573 {offsets = [0, 32], sizes = [2, 32], strides = [1, 1]} : vector<2x128xf32> to vector<2x32xf32>
    %577 = vector.extract_strided_slice %574 {offsets = [0, 64], sizes = [2, 32], strides = [1, 1]} : vector<2x128xf32> to vector<2x32xf32>
    %578 = vector.extract_strided_slice %573 {offsets = [0, 96], sizes = [2, 32], strides = [1, 1]} : vector<2x128xf32> to vector<2x32xf32>
    %579 = arith.mulf %576, %541 : vector<2x32xf32>
    %580 = arith.mulf %575, %577 : vector<2x32xf32>
    %581 = arith.addf %579, %580 : vector<2x32xf32>
    %582 = math.tanh %581 : vector<2x32xf32>
    %583 = arith.mulf %578, %582 : vector<2x32xf32>
    %c10_184 = arith.constant 10 : index
    %c0_185 = arith.constant 0 : index
    %584 = vector.load %arg13[%c10_184, %c0_185] : memref<16x64xf32, #tpu.memory_space<vmem>>, vector<2x32xf32>
    tpu.vector_store %arg13[%c10_184, %c0_185], %568 {strides = array<i32>} : memref<16x64xf32, #tpu.memory_space<vmem>>, vector<2x32xf32>,
    %c4_186 = arith.constant 4 : index
    %c32_187 = arith.constant 32 : index
    %585 = vector.load %arg13[%c4_186, %c32_187] : memref<16x64xf32, #tpu.memory_space<vmem>>, vector<2x32xf32>
    tpu.vector_store %arg13[%c4_186, %c32_187], %583 {strides = array<i32>} : memref<16x64xf32, #tpu.memory_space<vmem>>, vector<2x32xf32>,
    %c12_188 = arith.constant 12 : index
    %c0_189 = arith.constant 0 : index
    %586 = vector.load %arg11[%c12_188, %c0_189] : memref<16x256xf32, #tpu.memory_space<vmem>>, vector<2x128xf32>
    %587 = arith.truncf %568 : vector<2x32xf32> to vector<2x32xbf16>
    %cst_190 = arith.constant dense<0.000000e+00> : vector<2x128xf32>
    %588 = tpu.matmul %587, %342, %cst_190 {dimension_numbers = #tpu.dot_dimension_numbers<[1], [0], [0], [1], [0, 0, 1, 1], [], []>} : vector<2x32xbf16>, vector<32x128xbf16>, vector<2x128xf32> -> vector<2x128xf32>
    %589 = arith.addf %586, %588 : vector<2x128xf32>
    %c2_191 = arith.constant 2 : index
    %c128_192 = arith.constant 128 : index
    %590 = vector.load %arg11[%c2_191, %c128_192] : memref<16x256xf32, #tpu.memory_space<vmem>>, vector<2x128xf32>
    %591 = arith.truncf %583 : vector<2x32xf32> to vector<2x32xbf16>
    %cst_193 = arith.constant dense<0.000000e+00> : vector<2x128xf32>
    %592 = tpu.matmul %591, %344, %cst_193 {dimension_numbers = #tpu.dot_dimension_numbers<[1], [0], [0], [1], [0, 0, 1, 1], [], []>} : vector<2x32xbf16>, vector<32x128xbf16>, vector<2x128xf32> -> vector<2x128xf32>
    %593 = arith.addf %590, %592 : vector<2x128xf32>
    %594 = arith.negf %589 : vector<2x128xf32>
    %595 = math.exp %594 : vector<2x128xf32>
    %cst_194 = arith.constant 1.000000e+00 : f32
    %596 = vector.broadcast %cst_194 : f32 to vector<2x128xf32>
    %597 = arith.addf %596, %595 : vector<2x128xf32>
    %598 = arith.divf %596, %597 : vector<2x128xf32>
    %599 = math.tanh %589 : vector<2x128xf32>
    %600 = vector.extract_strided_slice %598 {offsets = [0, 0], sizes = [2, 32], strides = [1, 1]} : vector<2x128xf32> to vector<2x32xf32>
    %601 = vector.extract_strided_slice %598 {offsets = [0, 32], sizes = [2, 32], strides = [1, 1]} : vector<2x128xf32> to vector<2x32xf32>
    %602 = vector.extract_strided_slice %599 {offsets = [0, 64], sizes = [2, 32], strides = [1, 1]} : vector<2x128xf32> to vector<2x32xf32>
    %603 = vector.extract_strided_slice %598 {offsets = [0, 96], sizes = [2, 32], strides = [1, 1]} : vector<2x128xf32> to vector<2x32xf32>
    %604 = arith.mulf %601, %566 : vector<2x32xf32>
    %605 = arith.mulf %600, %602 : vector<2x32xf32>
    %606 = arith.addf %604, %605 : vector<2x32xf32>
    %607 = math.tanh %606 : vector<2x32xf32>
    %608 = arith.mulf %603, %607 : vector<2x32xf32>
    %609 = arith.negf %593 : vector<2x128xf32>
    %610 = math.exp %609 : vector<2x128xf32>
    %cst_195 = arith.constant 1.000000e+00 : f32
    %611 = vector.broadcast %cst_195 : f32 to vector<2x128xf32>
    %612 = arith.addf %611, %610 : vector<2x128xf32>
    %613 = arith.divf %611, %612 : vector<2x128xf32>
    %614 = math.tanh %593 : vector<2x128xf32>
    %615 = vector.extract_strided_slice %613 {offsets = [0, 0], sizes = [2, 32], strides = [1, 1]} : vector<2x128xf32> to vector<2x32xf32>
    %616 = vector.extract_strided_slice %613 {offsets = [0, 32], sizes = [2, 32], strides = [1, 1]} : vector<2x128xf32> to vector<2x32xf32>
    %617 = vector.extract_strided_slice %614 {offsets = [0, 64], sizes = [2, 32], strides = [1, 1]} : vector<2x128xf32> to vector<2x32xf32>
    %618 = vector.extract_strided_slice %613 {offsets = [0, 96], sizes = [2, 32], strides = [1, 1]} : vector<2x128xf32> to vector<2x32xf32>
    %619 = arith.mulf %616, %581 : vector<2x32xf32>
    %620 = arith.mulf %615, %617 : vector<2x32xf32>
    %621 = arith.addf %619, %620 : vector<2x32xf32>
    %622 = math.tanh %621 : vector<2x32xf32>
    %623 = arith.mulf %618, %622 : vector<2x32xf32>
    %c12_196 = arith.constant 12 : index
    %c0_197 = arith.constant 0 : index
    %624 = vector.load %arg13[%c12_196, %c0_197] : memref<16x64xf32, #tpu.memory_space<vmem>>, vector<2x32xf32>
    tpu.vector_store %arg13[%c12_196, %c0_197], %608 {strides = array<i32>} : memref<16x64xf32, #tpu.memory_space<vmem>>, vector<2x32xf32>,
    %c2_198 = arith.constant 2 : index
    %c32_199 = arith.constant 32 : index
    %625 = vector.load %arg13[%c2_198, %c32_199] : memref<16x64xf32, #tpu.memory_space<vmem>>, vector<2x32xf32>
    tpu.vector_store %arg13[%c2_198, %c32_199], %623 {strides = array<i32>} : memref<16x64xf32, #tpu.memory_space<vmem>>, vector<2x32xf32>,
    %c14_200 = arith.constant 14 : index
    %c0_201 = arith.constant 0 : index
    %626 = vector.load %arg11[%c14_200, %c0_201] : memref<16x256xf32, #tpu.memory_space<vmem>>, vector<2x128xf32>
    %627 = arith.truncf %608 : vector<2x32xf32> to vector<2x32xbf16>
    %cst_202 = arith.constant dense<0.000000e+00> : vector<2x128xf32>
    %628 = tpu.matmul %627, %342, %cst_202 {dimension_numbers = #tpu.dot_dimension_numbers<[1], [0], [0], [1], [0, 0, 1, 1], [], []>} : vector<2x32xbf16>, vector<32x128xbf16>, vector<2x128xf32> -> vector<2x128xf32>
    %629 = arith.addf %626, %628 : vector<2x128xf32>
    %c0_203 = arith.constant 0 : index
    %c128_204 = arith.constant 128 : index
    %630 = vector.load %arg11[%c0_203, %c128_204] : memref<16x256xf32, #tpu.memory_space<vmem>>, vector<2x128xf32>
    %631 = arith.truncf %623 : vector<2x32xf32> to vector<2x32xbf16>
    %cst_205 = arith.constant dense<0.000000e+00> : vector<2x128xf32>
    %632 = tpu.matmul %631, %344, %cst_205 {dimension_numbers = #tpu.dot_dimension_numbers<[1], [0], [0], [1], [0, 0, 1, 1], [], []>} : vector<2x32xbf16>, vector<32x128xbf16>, vector<2x128xf32> -> vector<2x128xf32>
    %633 = arith.addf %630, %632 : vector<2x128xf32>
    %634 = arith.negf %629 : vector<2x128xf32>
    %635 = math.exp %634 : vector<2x128xf32>
    %cst_206 = arith.constant 1.000000e+00 : f32
    %636 = vector.broadcast %cst_206 : f32 to vector<2x128xf32>
    %637 = arith.addf %636, %635 : vector<2x128xf32>
    %638 = arith.divf %636, %637 : vector<2x128xf32>
    %639 = math.tanh %629 : vector<2x128xf32>
    %640 = vector.extract_strided_slice %638 {offsets = [0, 0], sizes = [2, 32], strides = [1, 1]} : vector<2x128xf32> to vector<2x32xf32>
    %641 = vector.extract_strided_slice %638 {offsets = [0, 32], sizes = [2, 32], strides = [1, 1]} : vector<2x128xf32> to vector<2x32xf32>
    %642 = vector.extract_strided_slice %639 {offsets = [0, 64], sizes = [2, 32], strides = [1, 1]} : vector<2x128xf32> to vector<2x32xf32>
    %643 = vector.extract_strided_slice %638 {offsets = [0, 96], sizes = [2, 32], strides = [1, 1]} : vector<2x128xf32> to vector<2x32xf32>
    %644 = arith.mulf %641, %606 : vector<2x32xf32>
    %645 = arith.mulf %640, %642 : vector<2x32xf32>
    %646 = arith.addf %644, %645 : vector<2x32xf32>
    %647 = math.tanh %646 : vector<2x32xf32>
    %648 = arith.mulf %643, %647 : vector<2x32xf32>
    %649 = arith.negf %633 : vector<2x128xf32>
    %650 = math.exp %649 : vector<2x128xf32>
    %cst_207 = arith.constant 1.000000e+00 : f32
    %651 = vector.broadcast %cst_207 : f32 to vector<2x128xf32>
    %652 = arith.addf %651, %650 : vector<2x128xf32>
    %653 = arith.divf %651, %652 : vector<2x128xf32>
    %654 = math.tanh %633 : vector<2x128xf32>
    %655 = vector.extract_strided_slice %653 {offsets = [0, 0], sizes = [2, 32], strides = [1, 1]} : vector<2x128xf32> to vector<2x32xf32>
    %656 = vector.extract_strided_slice %653 {offsets = [0, 32], sizes = [2, 32], strides = [1, 1]} : vector<2x128xf32> to vector<2x32xf32>
    %657 = vector.extract_strided_slice %654 {offsets = [0, 64], sizes = [2, 32], strides = [1, 1]} : vector<2x128xf32> to vector<2x32xf32>
    %658 = vector.extract_strided_slice %653 {offsets = [0, 96], sizes = [2, 32], strides = [1, 1]} : vector<2x128xf32> to vector<2x32xf32>
    %659 = arith.mulf %656, %621 : vector<2x32xf32>
    %660 = arith.mulf %655, %657 : vector<2x32xf32>
    %661 = arith.addf %659, %660 : vector<2x32xf32>
    %662 = math.tanh %661 : vector<2x32xf32>
    %663 = arith.mulf %658, %662 : vector<2x32xf32>
    %c14_208 = arith.constant 14 : index
    %c0_209 = arith.constant 0 : index
    %664 = vector.load %arg13[%c14_208, %c0_209] : memref<16x64xf32, #tpu.memory_space<vmem>>, vector<2x32xf32>
    tpu.vector_store %arg13[%c14_208, %c0_209], %648 {strides = array<i32>} : memref<16x64xf32, #tpu.memory_space<vmem>>, vector<2x32xf32>,
    %c0_210 = arith.constant 0 : index
    %c32_211 = arith.constant 32 : index
    %665 = vector.load %arg13[%c0_210, %c32_211] : memref<16x64xf32, #tpu.memory_space<vmem>>, vector<2x32xf32>
    tpu.vector_store %arg13[%c0_210, %c32_211], %663 {strides = array<i32>} : memref<16x64xf32, #tpu.memory_space<vmem>>, vector<2x32xf32>,
    %c0_212 = arith.constant 0 : index
    %c0_213 = arith.constant 0 : index
    %666 = vector.load %arg13[%c0_212, %c0_213] : memref<16x64xf32, #tpu.memory_space<vmem>>, vector<16x64xf32>
    %667 = arith.truncf %666 : vector<16x64xf32> to vector<16x64xbf16>
    %c0_214 = arith.constant 0 : index
    %c0_215 = arith.constant 0 : index
    %668 = vector.load %arg8[%c0_214, %c0_215] : memref<64x128xbf16, #tpu.memory_space<vmem>>, vector<64x128xbf16>
    %cst_216 = arith.constant dense<0.000000e+00> : vector<16x128xf32>
    %669 = tpu.matmul %667, %668, %cst_216 {dimension_numbers = #tpu.dot_dimension_numbers<[1], [0], [0], [1], [0, 0, 1, 1], [], []>} : vector<16x64xbf16>, vector<64x128xbf16>, vector<16x128xf32> -> vector<16x128xf32>
    %c0_217 = arith.constant 0 : index
    %c0_218 = arith.constant 0 : index
    %670 = vector.load %arg9[%c0_217, %c0_218] : memref<1x128xf32, #tpu.memory_space<vmem>>, vector<1x128xf32>
    %671 = vector.broadcast %670 : vector<1x128xf32> to vector<16x128xf32>
    %672 = arith.addf %669, %671 : vector<16x128xf32>
    %c0_219 = arith.constant 0 : index
    %c0_220 = arith.constant 0 : index
    %673 = vector.load %arg10[%c0_219, %c0_220] : memref<16x128xf32, #tpu.memory_space<vmem>>, vector<16x128xf32>
    tpu.vector_store %arg10[%c0_219, %c0_220], %672 {strides = array<i32>} : memref<16x128xf32, #tpu.memory_space<vmem>>, vector<16x128xf32>,
    return
  }
  func.func @transform_0(%arg0: i32) -> (i32, i32) {
    %c0_i32 = arith.constant 0 : i32
    %c0_i32_0 = arith.constant 0 : i32
    %c0_i32_1 = arith.constant 0 : i32
    return %c0_i32, %c0_i32_0 : i32, i32
  }
  func.func @transform_1(%arg0: i32) -> (i32, i32) {
    %c0_i32 = arith.constant 0 : i32
    %c0_i32_0 = arith.constant 0 : i32
    %c0_i32_1 = arith.constant 0 : i32
    return %c0_i32, %c0_i32_0 : i32, i32
  }
  func.func @transform_2(%arg0: i32) -> (i32, i32) {
    %c0_i32 = arith.constant 0 : i32
    %c0_i32_0 = arith.constant 0 : i32
    %c0_i32_1 = arith.constant 0 : i32
    return %c0_i32, %c0_i32_0 : i32, i32
  }
  func.func @transform_3(%arg0: i32) -> (i32, i32, i32) {
    %c0_i32 = arith.constant 0 : i32
    %c0_i32_0 = arith.constant 0 : i32
    %c0_i32_1 = arith.constant 0 : i32
    %c0_i32_2 = arith.constant 0 : i32
    return %c0_i32, %c0_i32_0, %c0_i32_1 : i32, i32, i32
  }
  func.func @transform_4(%arg0: i32) -> (i32, i32) {
    %c0_i32 = arith.constant 0 : i32
    %c0_i32_0 = arith.constant 0 : i32
    %c0_i32_1 = arith.constant 0 : i32
    return %c0_i32, %c0_i32_0 : i32, i32
  }
  func.func @transform_5(%arg0: i32) -> (i32, i32) {
    %c0_i32 = arith.constant 0 : i32
    %c0_i32_0 = arith.constant 0 : i32
    %c0_i32_1 = arith.constant 0 : i32
    return %c0_i32, %c0_i32_0 : i32, i32
  }
  func.func @transform_6(%arg0: i32) -> (i32, i32, i32) {
    %c0_i32 = arith.constant 0 : i32
    %c0_i32_0 = arith.constant 0 : i32
    %c0_i32_1 = arith.constant 0 : i32
    %c0_i32_2 = arith.constant 0 : i32
    return %c0_i32, %c0_i32_0, %c0_i32_1 : i32, i32, i32
  }
  func.func @transform_7(%arg0: i32) -> (i32, i32) {
    %c0_i32 = arith.constant 0 : i32
    %c0_i32_0 = arith.constant 0 : i32
    %c0_i32_1 = arith.constant 0 : i32
    return %c0_i32, %c0_i32_0 : i32, i32
  }
  func.func @transform_8(%arg0: i32) -> (i32, i32) {
    %c0_i32 = arith.constant 0 : i32
    %c0_i32_0 = arith.constant 0 : i32
    %c0_i32_1 = arith.constant 0 : i32
    return %c0_i32, %c0_i32_0 : i32, i32
  }
  func.func @transform_9(%arg0: i32) -> (i32, i32) {
    %c0_i32 = arith.constant 0 : i32
    %c0_i32_0 = arith.constant 0 : i32
    %c0_i32_1 = arith.constant 0 : i32
    return %c0_i32, %c0_i32_0 : i32, i32
  }
}

</mosaic_0001>

<bundles_post_ra>
// kernel: crnn_forward.2
= control target key start
LH: loop header
LB: loop body
LE: loop exit
PB: predicated region body
PF: predicated region fallthrough
CT: control target
= control target key end

     0   :  { %s1047_s18 = smov 0   ;;  %s1156_s0 = inlined_call_operand.vmem [shape: bf16[16,16,32], index: 0, kind: input, shape index: {}]   ;;  %s1157_s1 = inlined_call_operand.vmem [shape: bf16[32,16], index: 1, kind: input, shape index: {}]   ;;  %s1158_s2 = inlined_call_operand.vmem [shape: f32[1,16], index: 2, kind: input, shape index: {}]   ;;  %s1159_s3 = inlined_call_operand.vmem [shape: bf16[16,32], index: 3, kind: input, shape index: {}]   ;;  %s1160_s4 = inlined_call_operand.vmem [shape: f32[1,32], index: 4, kind: input, shape index: {}]   ;;  %s1161_s5 = inlined_call_operand.vmem [shape: f32[16,32], index: 5, kind: output, shape index: {}]  }
   0x1 LB: > { %s1053_s19 = sadd.s32 4294967295, %s1015_s18   ;;  %p896_p0 = scmp.ge.s32.totalorder %s1015_s18, 1  ;;  %s1015_s18 = sphi %s1047_s18, %s15_s18  }
   0x2   : > { %p189_p1 = scmp.lt.s32.totalorder %s1015_s18, 3 }
   0x4   : > { %p190_p2 = pnand %p896_p0, %p189_p1 }
   0x5   : > { %v998_v0 = vld [vmem:[%s1157_s1] sm:$0xff] (!%p190_p2)   ;;  %s897_s22 = sshll.u32 (!%p190_p2), %s1053_s19, 3  ;;  %v999_v1 = vld [vmem:[%s1157_s1 + $0x8] sm:$0xff] (!%p190_p2)   ;;  %vm308_vm0 = vcmask (!%p190_p2), 261120   ;;  %vm533_vm1 = vcmask (!%p190_p2), 130048   ;;  %vm823_vm2 = vcmask (!%p190_p2), 1041409  }
   0x6   : > { %193 = sbr.rel (%p190_p2) target bundleno = 527 (0x20f), region = 40  ;;  %p218_p3 = scmp.lt.s32.totalorder (!%p190_p2), %s897_s22, 15  ;;  %952 = vmatprep.subr.bf16.mxu0 (!%p190_p2), %v998_v0  ;;  %v1008_v10 = vld [vmem:[%s1159_s3] sm:$0xff] (!%p190_p2)   ;;  %vm825_vm3 = vcmask (!%p190_p2), 1042434   ;;  %vm827_vm4 = vcmask (!%p190_p2), 1043459   ;;  %vm829_vm5 = vcmask (!%p190_p2), 1044484  }
   0x7   : > { %953 = vmatpush3.bf16.msra.mxu0 (!%p190_p2), %v998_v0  ;;  %972 = vmatprep.subr.bf16.mxu1 (!%p190_p2), %v1008_v10  ;;  %v1081_v11 = vld [vmem:[%s1158_s2] ss:$0 sm:$0xff] (!%p190_p2)  ;;  %p224_p4 = scmp.lt.s32.totalorder (!%p190_p2), %s1053_s19, 1  ;;  %vm831_vm6 = vcmask (!%p190_p2), 1045509   ;;  %vm833_vm7 = vcmask (!%p190_p2), 1046534   ;;  %vm835_vm8 = vcmask (!%p190_p2), 1047559  }
   0x8   : > { %954 = vmatprep.subr.bf16.mxu0 (!%p190_p2), %v999_v1  ;;  %973 = vmatpush3.bf16.msra.mxu1 (!%p190_p2), %v1008_v10 }
   0xb   : > { %955 = vmatpush3.bf16.msra.mxu0 (!%p190_p2), %v999_v1 }
   0xd   : > { %s1163_s22 = smov (!%p218_p3, %s897_s22), 15  ;;  %s1165_s19 = smov (!%p224_p4, %s1053_s19), 1 }
   0xe   : > { %s932_s25 = sshll.u32 %s1163_s22, 3  ;;  %s900_s10 = sshll.u32 %s1165_s19, 3 }
   0xf   : > { %s222_s28 = scalar_lea.vmem %s1156_s0, %s932_s25  ;;  %s227_s13 = scalar_lea.vmem %s1161_s5, %s900_s10 }
  0x10   : > { %v1000_v2 = vld [vmem:[%s222_s28] sm:$0xff]   ;;  %v1001_v3 = vld [vmem:[%s222_s28 + $0x8] sm:$0xff]   ;;  %v1002_v4 = vld [vmem:[%s222_s28 + $0x10] sm:$0xff]  }
  0x11   : > { %956 = vmatprep.mubr.msk.bf16.mxu0 %vm308_vm0, %v1000_v2  ;;  %v1003_v5 = vld [vmem:[%s222_s28 + $0x18] sm:$0xff]   ;;  %v1004_v6 = vld [vmem:[%s222_s28 + $0x20] sm:$0xff]   ;;  %v1005_v7 = vld [vmem:[%s222_s28 + $0x28] sm:$0xff]  }
  0x12   : > { %957 = vmatmul.mubr.msk.bf16.vlgmr.msra.gmra.mrb[0].mxu0 %vm308_vm0, %v1001_v3  ;;  %v1006_v8 = vld [vmem:[%s222_s28 + $0x30] sm:$0xff]   ;;  %v1007_v9 = vld [vmem:[%s222_s28 + $0x38] sm:$0xff]  }
  0x13   : > { %960 = vmatprep.mubr.msk.bf16.mxu0 %vm308_vm0, %v1002_v4 }
  0x1a   : > { %961 = vmatmul.mubr.msk.bf16.gmra.mrb[4].mxu0 %vm308_vm0, %v1003_v5 }
  0x1b   : > { %964 = vmatprep.mubr.msk.bf16.mxu0 %vm308_vm0, %v1004_v6 }
  0x22   : > { %965 = vmatmul.mubr.msk.bf16.gmra.mrb[8].mxu0 %vm308_vm0, %v1005_v7 }
  0x23   : > { %968 = vmatprep.mubr.msk.bf16.mxu0 %vm308_vm0, %v1006_v8 }
  0x2a   : > { %969 = vmatmul.mubr.msk.bf16.gmra.mrb[12].mxu0 %vm308_vm0, %v1007_v9 }
  0xe5   : > { %v958_v12 = vpop.f32.mrb[0].mxu0 }
  0xe6   : > { %v376_v13 = vadd.f32 %v958_v12, %v1081_v11  ;;  %v367_v14 = vpop.f32.mrb[1].mxu0 }
  0xe7   : > { %v368_v15 = vadd.f32 %v1081_v11, %v367_v14  ;;  %v959_v16 = vpop.f32.mrb[2].mxu0 }
  0xe8   : > { %v432_v17 = vadd.f32 3.0, %v376_v13  ;;  %v379_v18 = vadd.f32 %v959_v16, %v1081_v11  ;;  %v370_v19 = vpop.f32.mrb[3].mxu0 }
  0xe9   : > { %v430_v20 = vadd.f32 3.0, %v368_v15  ;;  %v371_v21 = vadd.f32 %v1081_v11, %v370_v19 }
  0xea   : > { %v448_v22 = vmax.f32 %v432_v17, 0.0  ;;  %v433_v23 = vadd.f32 3.0, %v379_v18 }
  0xeb   : > { %v446_v24 = vmax.f32 %v430_v20, 0.0  ;;  %v431_v25 = vadd.f32 3.0, %v371_v21 }
  0xec   : > { %v464_v26 = vmin.f32 %v448_v22, 6.0  ;;  %v449_v27 = vmax.f32 %v433_v23, 0.0 }
  0xed   : > { %v462_v28 = vmin.f32 %v446_v24, 6.0  ;;  %v447_v29 = vmax.f32 %v431_v25, 0.0  ;;  %v962_v30 = vpop.f32.mrb[4].mxu0 }
  0xee   : > { %v480_v31 = vmul.f32 %v464_v26, %v376_v13  ;;  %v465_v32 = vmin.f32 %v449_v27, 6.0  ;;  %v392_v33 = vadd.f32 %v962_v30, %v1081_v11  ;;  %v383_v34 = vpop.f32.mrb[5].mxu0 }
  0xef   : > { %v478_v35 = vmul.f32 %v462_v28, %v368_v15  ;;  %v463_v36 = vmin.f32 %v447_v29, 6.0  ;;  %v384_v37 = vadd.f32 %v1081_v11, %v383_v34  ;;  %v963_v38 = vpop.f32.mrb[6].mxu0 }
  0xf0   : > { %v481_v39 = vmul.f32 %v465_v32, %v379_v18  ;;  %v436_v40 = vadd.f32 3.0, %v392_v33  ;;  %v395_v41 = vadd.f32 %v963_v38, %v1081_v11  ;;  %v386_v42 = vpop.f32.mrb[7].mxu0  ;;  %v496_v46 = vmul.f32 0.16666667, %v480_v31 }
  0xf1   : > { %v479_v43 = vmul.f32 %v463_v36, %v371_v21  ;;  %v434_v44 = vadd.f32 3.0, %v384_v37  ;;  %v387_v45 = vadd.f32 %v1081_v11, %v386_v42  ;;  %v494_v50 = vmul.f32 0.16666667, %v478_v35 }
  0xf2   : > { %v497_v47 = vmul.f32 0.16666667, %v481_v39  ;;  %v452_v48 = vmax.f32 %v436_v40, 0.0  ;;  %v437_v49 = vadd.f32 3.0, %v395_v41 }
  0xf3   : > { %v495_v51 = vmul.f32 0.16666667, %v479_v43  ;;  %v450_v52 = vmax.f32 %v434_v44, 0.0  ;;  %v435_v53 = vadd.f32 3.0, %v387_v45 }
  0xf4   : > { %v511_v54 = vpack.c.bf16 %v497_v47, %v496_v46  ;;  %v468_v55 = vmin.f32 %v452_v48, 6.0  ;;  %v453_v56 = vmax.f32 %v437_v49, 0.0 }
  0xf5   : > { %v466_v57 = vmin.f32 %v450_v52, 6.0  ;;  %v451_v58 = vmax.f32 %v435_v53, 0.0  ;;  %v966_v59 = vpop.f32.mrb[8].mxu0  ;;  %v510_v60 = vpack.c.bf16 %v495_v51, %v494_v50 }
  0xf6   : > { %v484_v61 = vmul.f32 %v468_v55, %v392_v33  ;;  %v469_v62 = vmin.f32 %v453_v56, 6.0  ;;  %v408_v63 = vadd.f32 %v966_v59, %v1081_v11  ;;  %v399_v0 = vpop.f32.mrb[9].mxu0 }
  0xf7   : > { %v482_v1 = vmul.f32 %v466_v57, %v384_v37  ;;  %v467_v2 = vmin.f32 %v451_v58, 6.0  ;;  %v400_v3 = vadd.f32 %v1081_v11, %v399_v0  ;;  %v967_v4 = vpop.f32.mrb[10].mxu0  ;;  %974 = vmatprep.mubr.msk.bf16.mxu1 %vm533_vm1, %v510_v60 }
  0xf8   : > { %v485_v5 = vmul.f32 %v469_v62, %v395_v41  ;;  %v440_v6 = vadd.f32 3.0, %v408_v63  ;;  %v411_v7 = vadd.f32 %v967_v4, %v1081_v11  ;;  %v402_v8 = vpop.f32.mrb[11].mxu0  ;;  %975 = vmatmul.mubr.msk.bf16.vlgmr.msra.gmra.mrb[0].mxu1 %vm533_vm1, %v511_v54  ;;  %v500_v13 = vmul.f32 0.16666667, %v484_v61  ;;  %v1110_v4 = vld [vmem:[%s1160_s4] ss:$0 sm:$0xff] }
  0xf9   : > { %v483_v9 = vmul.f32 %v467_v2, %v387_v45  ;;  %v438_v10 = vadd.f32 3.0, %v400_v3  ;;  %v403_v12 = vadd.f32 %v1081_v11, %v402_v8  ;;  %v498_v17 = vmul.f32 0.16666667, %v482_v1 }
  0xfa   : > { %v501_v14 = vmul.f32 0.16666667, %v485_v5  ;;  %v456_v15 = vmax.f32 %v440_v6, 0.0  ;;  %v441_v16 = vadd.f32 3.0, %v411_v7 }
  0xfb   : > { %v499_v18 = vmul.f32 0.16666667, %v483_v9  ;;  %v454_v19 = vmax.f32 %v438_v10, 0.0  ;;  %v439_v20 = vadd.f32 3.0, %v403_v12 }
  0xfc   : > { %v513_v21 = vpack.c.bf16 %v501_v14, %v500_v13  ;;  %v472_v22 = vmin.f32 %v456_v15, 6.0  ;;  %v457_v23 = vmax.f32 %v441_v16, 0.0 }
  0xfd   : > { %v512_v24 = vpack.c.bf16 %v499_v18, %v498_v17  ;;  %v470_v25 = vmin.f32 %v454_v19, 6.0  ;;  %v455_v26 = vmax.f32 %v439_v20, 0.0  ;;  %v970_v27 = vpop.f32.mrb[12].mxu0 }
  0xfe   : > { %v488_v28 = vmul.f32 %v472_v22, %v408_v63  ;;  %v473_v29 = vmin.f32 %v457_v23, 6.0  ;;  %v424_v30 = vadd.f32 %v970_v27, %v1081_v11  ;;  %v415_v31 = vpop.f32.mrb[13].mxu0 }
  0xff   : > { %v486_v32 = vmul.f32 %v470_v25, %v400_v3  ;;  %v471_v33 = vmin.f32 %v455_v26, 6.0  ;;  %v416_v34 = vadd.f32 %v1081_v11, %v415_v31  ;;  %v971_v35 = vpop.f32.mrb[14].mxu0  ;;  %978 = vmatprep.mubr.msk.bf16.mxu1 %vm533_vm1, %v512_v24 }
 0x100   : > { %v489_v36 = vmul.f32 %v473_v29, %v411_v7  ;;  %v444_v37 = vadd.f32 3.0, %v424_v30  ;;  %v427_v38 = vadd.f32 %v971_v35, %v1081_v11  ;;  %v418_v39 = vpop.f32.mrb[15].mxu0  ;;  %979 = vmatmul.mubr.msk.bf16.gmra.mrb[4].mxu1 %vm533_vm1, %v513_v21  ;;  %v504_v43 = vmul.f32 0.16666667, %v488_v28 }
 0x101   : > { %v487_v40 = vmul.f32 %v471_v33, %v403_v12  ;;  %v442_v41 = vadd.f32 3.0, %v416_v34  ;;  %v419_v42 = vadd.f32 %v1081_v11, %v418_v39  ;;  %v502_v47 = vmul.f32 0.16666667, %v486_v32 }
 0x102   : > { %v505_v44 = vmul.f32 0.16666667, %v489_v36  ;;  %v460_v45 = vmax.f32 %v444_v37, 0.0  ;;  %v445_v46 = vadd.f32 3.0, %v427_v38 }
 0x103   : > { %v503_v48 = vmul.f32 0.16666667, %v487_v40  ;;  %v458_v49 = vmax.f32 %v442_v41, 0.0  ;;  %v443_v50 = vadd.f32 3.0, %v419_v42 }
 0x104   : > { %v515_v51 = vpack.c.bf16 %v505_v44, %v504_v43  ;;  %v476_v52 = vmin.f32 %v460_v45, 6.0  ;;  %v461_v53 = vmax.f32 %v445_v46, 0.0 }
 0x105   : > { %v514_v54 = vpack.c.bf16 %v503_v48, %v502_v47  ;;  %v474_v55 = vmin.f32 %v458_v49, 6.0  ;;  %v459_v56 = vmax.f32 %v443_v50, 0.0 }
 0x106   : > { %v492_v57 = vmul.f32 %v476_v52, %v424_v30  ;;  %v477_v58 = vmin.f32 %v461_v53, 6.0 }
 0x107   : > { %v490_v59 = vmul.f32 %v474_v55, %v416_v34  ;;  %v475_v60 = vmin.f32 %v459_v56, 6.0  ;;  %982 = vmatprep.mubr.msk.bf16.mxu1 %vm533_vm1, %v514_v54 }
 0x108   : > { %v493_v11 = vmul.f32 %v477_v58, %v427_v38  ;;  %983 = vmatmul.mubr.msk.bf16.gmra.mrb[8].mxu1 %vm533_vm1, %v515_v51  ;;  %v508_v62 = vmul.f32 0.16666667, %v492_v57 }
 0x109   : > { %v491_v61 = vmul.f32 %v475_v60, %v419_v42  ;;  %v506_v0 = vmul.f32 0.16666667, %v490_v59 }
 0x10a   : > { %v509_v63 = vmul.f32 0.16666667, %v493_v11 }
 0x10b   : > { %v507_v1 = vmul.f32 0.16666667, %v491_v61 }
 0x10c   : > { %v517_v2 = vpack.c.bf16 %v509_v63, %v508_v62 }
 0x10d   : > { %v516_v3 = vpack.c.bf16 %v507_v1, %v506_v0 }
 0x10f   : > { %986 = vmatprep.mubr.msk.bf16.mxu1 %vm533_vm1, %v516_v3 }
 0x110   : > { %987 = vmatmul.mubr.msk.bf16.gmra.mrb[12].mxu1 %vm533_vm1, %v517_v2 }
 0x1cb   : > { %v976_v5 = vpop.f32.mrb[0].mxu1 }
 0x1cc   : > { %v601_v6 = vadd.f32 %v976_v5, %v1110_v4  ;;  %v592_v7 = vpop.f32.mrb[1].mxu1 }
 0x1cd   : > { %v593_v8 = vadd.f32 %v1110_v4, %v592_v7  ;;  %v977_v9 = vpop.f32.mrb[2].mxu1 }
 0x1ce   : > { %v657_v10 = vadd.f32 3.0, %v601_v6  ;;  %v604_v12 = vadd.f32 %v977_v9, %v1110_v4  ;;  %v595_v13 = vpop.f32.mrb[3].mxu1 }
 0x1cf   : > { %v655_v14 = vadd.f32 3.0, %v593_v8  ;;  %v596_v15 = vadd.f32 %v1110_v4, %v595_v13 }
 0x1d0   : > { %v673_v16 = vmax.f32 %v657_v10, 0.0  ;;  %v658_v17 = vadd.f32 3.0, %v604_v12 }
 0x1d1   : > { %v671_v18 = vmax.f32 %v655_v14, 0.0  ;;  %v656_v19 = vadd.f32 3.0, %v596_v15 }
 0x1d2   : > { %v689_v20 = vmin.f32 %v673_v16, 6.0  ;;  %v674_v21 = vmax.f32 %v658_v17, 0.0 }
 0x1d3   : > { %v687_v22 = vmin.f32 %v671_v18, 6.0  ;;  %v672_v23 = vmax.f32 %v656_v19, 0.0  ;;  %v980_v24 = vpop.f32.mrb[4].mxu1 }
 0x1d4   : > { %v705_v25 = vmul.f32 %v689_v20, %v601_v6  ;;  %v690_v26 = vmin.f32 %v674_v21, 6.0  ;;  %v617_v27 = vadd.f32 %v980_v24, %v1110_v4  ;;  %v608_v28 = vpop.f32.mrb[5].mxu1 }
 0x1d5   : > { %v703_v29 = vmul.f32 %v687_v22, %v593_v8  ;;  %v688_v30 = vmin.f32 %v672_v23, 6.0  ;;  %v609_v31 = vadd.f32 %v1110_v4, %v608_v28  ;;  %v981_v32 = vpop.f32.mrb[6].mxu1 }
 0x1d6   : > { %v721_v33 = vmul.f32 0.16666667, %v705_v25  ;;  %v706_v34 = vmul.f32 %v690_v26, %v604_v12  ;;  %v661_v35 = vadd.f32 3.0, %v617_v27  ;;  %v620_v36 = vadd.f32 %v981_v32, %v1110_v4  ;;  %v611_v37 = vpop.f32.mrb[7].mxu1 }
 0x1d7   : > { %v719_v38 = vmul.f32 0.16666667, %v703_v29  ;;  %v704_v39 = vmul.f32 %v688_v30, %v596_v15  ;;  %v659_v40 = vadd.f32 3.0, %v609_v31  ;;  %v612_v41 = vadd.f32 %v1110_v4, %v611_v37 }
 0x1d8   : > { %v722_v42 = vmul.f32 0.16666667, %v706_v34  ;;  %v677_v43 = vmax.f32 %v661_v35, 0.0  ;;  %v662_v44 = vadd.f32 3.0, %v620_v36  ;;  %v744_v45 = vsel %vm308_vm0, %v721_v33, 0.0 }
 0x1d9   : > { %v720_v46 = vmul.f32 0.16666667, %v704_v39  ;;  %v675_v47 = vmax.f32 %v659_v40, 0.0  ;;  %v660_v48 = vadd.f32 3.0, %v612_v41  ;;  %v735_v49 = vsel %vm308_vm0, %v719_v38, 0.0 }
 0x1da   : > { %v745_v50 = vsel %vm308_vm0, %v722_v42, 0.0  ;;  %v693_v51 = vmin.f32 %v677_v43, 6.0  ;;  %v678_v52 = vmax.f32 %v662_v44, 0.0 }
 0x1db   : > { %v746_v53 = vadd.f32 %v745_v50, %v744_v45  ;;  %v736_v54 = vsel %vm308_vm0, %v720_v46, 0.0  ;;  %v691_v55 = vmin.f32 %v675_v47, 6.0  ;;  %v676_v56 = vmax.f32 %v660_v48, 0.0  ;;  %v984_v57 = vpop.f32.mrb[8].mxu1 }
 0x1dc   : > { %v737_v58 = vadd.f32 %v736_v54, %v735_v49  ;;  %v709_v59 = vmul.f32 %v693_v51, %v617_v27  ;;  %v694_v60 = vmin.f32 %v678_v52, 6.0  ;;  %v633_v11 = vadd.f32 %v984_v57, %v1110_v4  ;;  %v624_v61 = vpop.f32.mrb[9].mxu1 }
 0x1dd   : > { %v747_v62 = vrot.slane %v746_v53, 4  ;;  %v707_v63 = vmul.f32 %v691_v55, %v609_v31  ;;  %v692_v0 = vmin.f32 %v676_v56, 6.0  ;;  %v625_v1 = vadd.f32 %v1110_v4, %v624_v61  ;;  %v985_v2 = vpop.f32.mrb[10].mxu1 }
 0x1de   : > { %v738_v3 = vrot.slane %v737_v58, 4  ;;  %v725_v5 = vmul.f32 0.16666667, %v709_v59  ;;  %v710_v6 = vmul.f32 %v694_v60, %v620_v36  ;;  %v665_v7 = vadd.f32 3.0, %v633_v11  ;;  %v627_v8 = vpop.f32.mrb[11].mxu1 }
 0x1df   : > { %v748_v9 = vadd.f32 %v747_v62, %v746_v53  ;;  %v723_v10 = vmul.f32 0.16666667, %v707_v63  ;;  %v708_v12 = vmul.f32 %v692_v0, %v612_v41  ;;  %v663_v13 = vadd.f32 3.0, %v625_v1 }
 0x1e0   : > { %v739_v14 = vadd.f32 %v738_v3, %v737_v58  ;;  %v762_v15 = vsel %vm308_vm0, %v725_v5, 0.0  ;;  %v726_v16 = vmul.f32 0.16666667, %v710_v6  ;;  %v681_v17 = vmax.f32 %v665_v7, 0.0 }
 0x1e1   : > { %v749_v18 = vrot.slane %v748_v9, 2  ;;  %v753_v19 = vsel %vm308_vm0, %v723_v10, 0.0  ;;  %v724_v20 = vmul.f32 0.16666667, %v708_v12  ;;  %v679_v21 = vmax.f32 %v663_v13, 0.0 }
 0x1e2   : > { %v740_v22 = vrot.slane %v739_v14, 2  ;;  %v763_v23 = vsel %vm308_vm0, %v726_v16, 0.0  ;;  %v697_v24 = vmin.f32 %v681_v17, 6.0  ;;  %v636_v25 = vadd.f32 %v985_v2, %v1110_v4 }
 0x1e3   : > { %v750_v26 = vadd.f32 %v749_v18, %v748_v9  ;;  %v764_v27 = vadd.f32 %v763_v23, %v762_v15  ;;  %v754_v28 = vsel %vm308_vm0, %v724_v20, 0.0  ;;  %v695_v29 = vmin.f32 %v679_v21, 6.0  ;;  %v988_v30 = vpop.f32.mrb[12].mxu1 }
 0x1e4   : > { %v741_v31 = vadd.f32 %v740_v22, %v739_v14  ;;  %v755_v32 = vadd.f32 %v754_v28, %v753_v19  ;;  %v713_v33 = vmul.f32 %v697_v24, %v633_v11  ;;  %v666_v34 = vadd.f32 3.0, %v636_v25  ;;  %v640_v35 = vpop.f32.mrb[13].mxu1 }
 0x1e5   : > { %v751_v36 = vrot.slane %v750_v26, 1  ;;  %v765_v37 = vrot.slane %v764_v27, 4  ;;  %v711_v38 = vmul.f32 %v695_v29, %v625_v1  ;;  %v628_v39 = vadd.f32 %v1110_v4, %v627_v8  ;;  %v989_v40 = vpop.f32.mrb[14].mxu1 }
 0x1e6   : > { %v742_v41 = vrot.slane %v741_v31, 1  ;;  %v756_v42 = vrot.slane %v755_v32, 4  ;;  %v729_v43 = vmul.f32 0.16666667, %v713_v33  ;;  %v682_v44 = vmax.f32 %v666_v34, 0.0  ;;  %v643_v45 = vpop.f32.mrb[15].mxu1 }
 0x1e7   : > { %v752_v46 = vadd.f32 %v751_v36, %v750_v26  ;;  %v766_v47 = vadd.f32 %v765_v37, %v764_v27  ;;  %v664_v48 = vadd.f32 3.0, %v628_v39  ;;  %v727_v51 = vmul.f32 0.16666667, %v711_v38 }
 0x1e8   : > { %v743_v49 = vadd.f32 %v742_v41, %v741_v31  ;;  %v757_v50 = vadd.f32 %v756_v42, %v755_v32  ;;  %v698_v52 = vmin.f32 %v682_v44, 6.0  ;;  %v780_v55 = vsel %vm308_vm0, %v729_v43, 0.0 }
 0x1e9   : > { %v808_v53 = vmul.f32 0.0625, %v752_v46  ;;  %v767_v54 = vrot.slane %v766_v47, 2  ;;  %v680_v56 = vmax.f32 %v664_v48, 0.0  ;;  %v649_v60 = vadd.f32 %v988_v30, %v1110_v4 }
 0x1ea   : > { %v807_v57 = vmul.f32 0.0625, %v743_v49  ;;  %v758_v58 = vrot.slane %v757_v50, 2  ;;  %v714_v59 = vmul.f32 %v698_v52, %v636_v25  ;;  %v641_v62 = vadd.f32 %v1110_v4, %v640_v35 }
 0x1eb   : > { %v768_v11 = vadd.f32 %v767_v54, %v766_v47  ;;  %v696_v61 = vmin.f32 %v680_v56, 6.0  ;;  %v652_v63 = vadd.f32 %v989_v40, %v1110_v4  ;;  %v669_v3 = vadd.f32 3.0, %v649_v60 }
 0x1ec   : > { %v824_v0 = vsel %vm823_vm2, %v808_v53, %v807_v57  ;;  %v759_v1 = vadd.f32 %v758_v58, %v757_v50  ;;  %v730_v2 = vmul.f32 0.16666667, %v714_v59  ;;  %v667_v7 = vadd.f32 3.0, %v641_v62 }
 0x1ed   : > { %v769_v5 = vrot.slane %v768_v11, 1  ;;  %v712_v6 = vmul.f32 %v696_v61, %v628_v39  ;;  %v670_v8 = vadd.f32 3.0, %v652_v63  ;;  %v685_v12 = vmax.f32 %v669_v3, 0.0 }
 0x1ee   : > { %v760_v9 = vrot.slane %v759_v1, 1  ;;  %v781_v10 = vsel %vm308_vm0, %v730_v2, 0.0  ;;  %v644_v13 = vadd.f32 %v1110_v4, %v643_v45  ;;  %v683_v17 = vmax.f32 %v667_v7, 0.0 }
 0x1ef   : > { %v770_v14 = vadd.f32 %v769_v5, %v768_v11  ;;  %v782_v15 = vadd.f32 %v781_v10, %v780_v55  ;;  %v728_v16 = vmul.f32 0.16666667, %v712_v6  ;;  %v701_v19 = vmin.f32 %v685_v12, 6.0 }
 0x1f0   : > { %v761_v18 = vadd.f32 %v760_v9, %v759_v1  ;;  %v686_v20 = vmax.f32 %v670_v8, 0.0  ;;  %v668_v21 = vadd.f32 3.0, %v644_v13  ;;  %v771_v22 = vsel %vm308_vm0, %v727_v51, 0.0 }
 0x1f1   : > { %v783_v23 = vrot.slane %v782_v15, 4  ;;  %v772_v24 = vsel %vm308_vm0, %v728_v16, 0.0  ;;  %v699_v25 = vmin.f32 %v683_v17, 6.0  ;;  %v717_v28 = vmul.f32 %v701_v19, %v649_v60 }
 0x1f2   : > { %v809_v26 = vmul.f32 0.0625, %v761_v18  ;;  %v773_v27 = vadd.f32 %v772_v24, %v771_v22  ;;  %v702_v29 = vmin.f32 %v686_v20, 6.0  ;;  %v810_v30 = vmul.f32 0.0625, %v770_v14 }
 0x1f3   : > { %v784_v4 = vadd.f32 %v783_v23, %v782_v15  ;;  %v715_v31 = vmul.f32 %v699_v25, %v641_v62  ;;  %v684_v32 = vmax.f32 %v668_v21, 0.0  ;;  %v733_v35 = vmul.f32 0.16666667, %v717_v28 }
 0x1f4   : > { %v826_v33 = vsel %vm825_vm3, %v809_v26, %v824_v0  ;;  %v774_v34 = vrot.slane %v773_v27, 4  ;;  %v718_v36 = vmul.f32 %v702_v29, %v652_v63 }
 0x1f5   : > { %v785_v37 = vrot.slane %v784_v4, 2  ;;  %v828_v38 = vsel %vm827_vm4, %v810_v30, %v826_v33  ;;  %v700_v39 = vmin.f32 %v684_v32, 6.0  ;;  %v731_v43 = vmul.f32 0.16666667, %v715_v31 }
 0x1f6   : > { %v775_v40 = vadd.f32 %v774_v34, %v773_v27  ;;  %v734_v41 = vmul.f32 0.16666667, %v718_v36  ;;  %v798_v46 = vsel %vm308_vm0, %v733_v35, 0.0 }
 0x1f7   : > { %v786_v42 = vadd.f32 %v785_v37, %v784_v4  ;;  %v716_v44 = vmul.f32 %v700_v39, %v644_v13  ;;  %v789_v52 = vsel %vm308_vm0, %v731_v43, 0.0 }
 0x1f8   : > { %v776_v45 = vrot.slane %v775_v40, 2  ;;  %v799_v47 = vsel %vm308_vm0, %v734_v41, 0.0 }
 0x1f9   : > { %v787_v48 = vrot.slane %v786_v42, 1  ;;  %v800_v49 = vadd.f32 %v799_v47, %v798_v46  ;;  %v732_v50 = vmul.f32 0.16666667, %v716_v44 }
 0x1fa   : > { %v777_v51 = vadd.f32 %v776_v45, %v775_v40 }
 0x1fb   : > { %v801_v53 = vrot.slane %v800_v49, 4  ;;  %v790_v54 = vsel %vm308_vm0, %v732_v50, 0.0  ;;  %v788_v57 = vadd.f32 %v787_v48, %v786_v42 }
 0x1fc   : > { %v778_v55 = vrot.slane %v777_v51, 1  ;;  %v791_v56 = vadd.f32 %v790_v54, %v789_v52 }
 0x1fd   : > { %v802_v58 = vadd.f32 %v801_v53, %v800_v49  ;;  %v812_v63 = vmul.f32 0.0625, %v788_v57 }
 0x1fe   : > { %v779_v59 = vadd.f32 %v778_v55, %v777_v51  ;;  %v792_v60 = vrot.slane %v791_v56, 4 }
 0x1ff   : > { %v803_v11 = vrot.slane %v802_v58, 2 }
 0x200   : > { %v811_v61 = vmul.f32 0.0625, %v779_v59  ;;  %v793_v62 = vadd.f32 %v792_v60, %v791_v56 }
 0x201   : > { %v804_v0 = vadd.f32 %v803_v11, %v802_v58 }
 0x202   : > { %v830_v1 = vsel %vm829_vm5, %v811_v61, %v828_v38  ;;  %v794_v2 = vrot.slane %v793_v62, 2 }
 0x203   : > { %v805_v3 = vrot.slane %v804_v0, 1  ;;  %v832_v5 = vsel %vm831_vm6, %v812_v63, %v830_v1 }
 0x204   : > { %v795_v6 = vadd.f32 %v794_v2, %v793_v62 }
 0x205   : > { %v806_v8 = vadd.f32 %v805_v3, %v804_v0 }
 0x206   : > { %v796_v7 = vrot.slane %v795_v6, 1 }
 0x207   : > { %v814_v12 = vmul.f32 0.0625, %v806_v8 }
 0x208   : > { %v797_v9 = vadd.f32 %v796_v7, %v795_v6 }
 0x20a   : > { %v813_v10 = vmul.f32 0.0625, %v797_v9 }
 0x20c   : > { %v834_v13 = vsel %vm833_vm7, %v813_v10, %v832_v5 }
 0x20d   : > { %v836_v14 = vsel %vm835_vm8, %v814_v12, %v834_v13 }
 0x20e   : > { %838 = vst.msk [vmem:[%s227_s13] sm:$0xff] %vm308_vm0, %v836_v14 }
 0x20f PF: > { %s15_s18 = sadd.s32 1, %s1015_s18  }
 0x210   : > { %p12_p5 = scmp.ge.s32.totalorder %s15_s18, 4  }
 0x212   :  { %14 = sbr.rel (!%p12_p5) target bundleno = 1 (0x1), region = 70 }

// kernel: crnn_forward.3
= control target key start
LH: loop header
LB: loop body
LE: loop exit
PB: predicated region body
PF: predicated region fallthrough
CT: control target
= control target key end

     0   :  { %v3812_v1 = vmov 0   ;;  %v3813_v2 = vmov 0.0   ;;  %vm3814_vm0 = vmmov 0   ;;  %vm72_vm1 = vcmask 261120   ;;  %s3816_s28 = smov 32   ;;  %s4676_s1 = inlined_call_operand.vmem [shape: bf16[32,256], index: 1, kind: input, shape index: {}]   ;;  %s4677_s0 = inlined_call_operand.vmem [shape: f32[16,32], index: 0, kind: input, shape index: {}]   ;;  %s4678_s3 = inlined_call_operand.vmem [shape: bf16[2,32,128], index: 3, kind: input, shape index: {}]   ;;  %s4679_s2 = inlined_call_operand.vmem [shape: f32[1,256], index: 2, kind: input, shape index: {}]   ;;  %s4680_s4 = inlined_call_operand.vmem [shape: bf16[64,256], index: 4, kind: input, shape index: {}]   ;;  %s4681_s6 = inlined_call_operand.vmem [shape: bf16[2,32,128], index: 6, kind: input, shape index: {}]   ;;  %s4682_s5 = inlined_call_operand.vmem [shape: f32[1,256], index: 5, kind: input, shape index: {}]   ;;  %s4683_s7 = inlined_call_operand.vmem [shape: bf16[64,128], index: 7, kind: input, shape index: {}]   ;;  %s4684_s8 = inlined_call_operand.vmem [shape: f32[1,128], index: 8, kind: input, shape index: {}]   ;;  %s4685_s9 = inlined_call_operand.vmem [shape: f32[16,128], index: 9, kind: output, shape index: {}]  }
   0x1   :  { %v3522_v0 = vld [vmem:[%s4676_s1 + $0x4] ss:$8 sps:$4 sm:$0xff]   ;;  %108 = vmatprep.mubr.bf16.mxu0 %v3812_v1  ;;  %3249 = vmatprep.subr.bf16.mxu1 %v3813_v2  ;;  %v3524_v3 = vld [vmem:[%s4676_s1] ss:$8 sps:$4 sm:$0xff]   ;;  %v3525_v4 = vld [vmem:[%s4676_s1 + $0x14] ss:$8 sps:$4 sm:$0xff]   ;;  %v42_v13 = vlaneseq }
   0x2   :  { %3253 = vmatprep.mubr.msk.bf16.mxu1 %vm3814_vm0, %v3813_v2  ;;  %76 = vmatprep.subr.bf16.mxu0 %v3522_v0  ;;  %v3527_v5 = vld [vmem:[%s4676_s1 + $0x10] ss:$8 sps:$4 sm:$0xff]   ;;  %v33_v6 = vld [vmem:[%s4677_s0] sm:$0xff]  ;;  %v34_v7 = vld [vmem:[%s4677_s0 + $0x8] sm:$0xff]  ;;  %vm298_vm2 = vcmask 254976   ;;  %vm304_vm3 = vcmask 523526  }
   0x3   :  { %77 = vmatpush1.bf16.msra.mxu0 %v3524_v3  ;;  %v3892_v8 = vld [vmem:[%s4678_s3] sm:$0xff]   ;;  %v35_v9 = vpack.c.bf16 %v34_v7, %v33_v6  ;;  %v3898_v10 = vld [vmem:[%s4678_s3 + $0x8] sm:$0xff]   ;;  %v3903_v11 = vld [vmem:[%s4678_s3 + $0x10] sm:$0xff]   ;;  %v3935_v14 = vshrl.u32 %v42_v13, 7  ;;  %vm469_vm4 = vcmask 257026   ;;  %vm475_vm5 = vcmask 521476  }
   0x4   :  { %78 = vmatprep.subr.bf16.mxu0 %v3525_v4  ;;  %3250 = vmatpush3.bf16.msra.mxu1 %v3892_v8  ;;  %v3913_v12 = vld [vmem:[%s4678_s3 + $0x18] sm:$0xff]   ;;  %v40_v16 = vld [vmem:[%s4679_s2] sm:$0x3]  ;;  %s3815_s2 = smov 64   ;;  %vm641_vm6 = vcmask 259076   ;;  %vm647_vm7 = vcmask 519426  }
   0x5   :  { %3251 = vmatprep.subr.bf16.mxu1 %v3813_v2  ;;  %v44_v15 = vsub.s32 0, %v3935_v14  ;;  %v48_v17 = vsub.s32 1, %v3935_v14  ;;  %vm810_vm8 = vcmask 261126   ;;  %vm816_vm9 = vcmask 517376  }
   0x6   :  { %vm1553_vm10 = vcmask 523264  }
   0x7   :  { %79 = vmatpush1.bf16.msra.mxu0 %v3527_v5  ;;  %v45_v18 = vrot.slane %v40_v16, %v44_v15  ;;  %v49_v19 = vrot.slane %v40_v16, %v48_v17 }
   0x8   :  { %3257 = vmatprep.subr.bf16.mxu0 %v3813_v2  ;;  %3252 = vmatpush3.bf16.msra.mxu1 %v3898_v10 }
   0x9   :  { %3265 = vmatprep.subr.bf16.mxu1 %v3813_v2 }
   0xa   :  { %3056 = vmatmul.mubr.msk.bf16.vlgmr.msra.gmra.mrb[0].mxu0 %vm72_vm1, %v35_v9 }
   0xb   :  { %3258 = vmatpush3.bf16.msra.mxu0 %v3903_v11  ;;  %3261 = vmatprep.mubr.msk.bf16.mxu0 %vm3814_vm0, %v3813_v2 }
   0xc   :  { %3259 = vmatprep.subr.bf16.mxu0 %v3813_v2  ;;  %3254 = vmatmul.mubr.bf16.vlgmr.msra.gmra.mrb[0].mxu1 %v3812_v1 }
   0xd   :  { %3266 = vmatpush3.bf16.msra.mxu1 %v3892_v8  ;;  %3269 = vmatprep.mubr.msk.bf16.mxu1 %vm3814_vm0, %v3813_v2 }
   0xe   :  { %3267 = vmatprep.subr.bf16.mxu1 %v3813_v2 }
   0xf   :  { %3260 = vmatpush3.bf16.msra.mxu0 %v3913_v12 }
  0x10   :  { %3273 = vmatprep.subr.bf16.mxu0 %v3813_v2 }
  0x11   :  { %3268 = vmatpush3.bf16.msra.mxu1 %v3898_v10 }
  0x12   :  { %3262 = vmatmul.mubr.bf16.vlgmr.msra.gmra.mrb[4].mxu0 %v3812_v1  ;;  %3281 = vmatprep.subr.bf16.mxu1 %v3813_v2 }
  0x13   :  { %3274 = vmatpush3.bf16.msra.mxu0 %v3903_v11  ;;  %3277 = vmatprep.mubr.msk.bf16.mxu0 %vm3814_vm0, %v3813_v2 }
  0x14   :  { %3275 = vmatprep.subr.bf16.mxu0 %v3813_v2 }
  0x17   :  { %3276 = vmatpush3.bf16.msra.mxu0 %v3913_v12 }
  0x18   :  { %3289 = vmatprep.subr.bf16.mxu0 %v3813_v2 }
  0xdd   :  { %v110_v20 = vpop.f32.mrb[0].mxu0 }
  0xde   :  { %v111_v21 = vadd.f32 %v110_v20, %v45_v18  ;;  %v112_v22 = vpop.f32.mrb[1].mxu0 }
  0xdf   :  { %v113_v23 = vadd.f32 %v112_v22, %v49_v19  ;;  %v114_v24 = vpop.f32.mrb[2].mxu0  ;;  %v182_v27 = vpop.f32.mrb[0].mxu1 }
  0xe0   :  { %119 = vst [vmem:[#allocation2] sm:$0xff] %v111_v21  ;;  %v115_v25 = vadd.f32 %v114_v24, %v45_v18  ;;  %v116_v26 = vpop.f32.mrb[3].mxu0  ;;  %v3255_v29 = vpop.f32.mrb[1].mxu1 }
  0xe1   :  { %120 = vst [vmem:[#allocation2 + $0x8] sm:$0xff] %v113_v23  ;;  %v117_v28 = vadd.f32 %v116_v26, %v49_v19  ;;  %v185_v30 = vpop.f32.mrb[2].mxu1 }
  0xe2   :  { %121 = vst [vmem:[#allocation2 + $0x10] sm:$0xff] %v115_v25  ;;  %v3256_v31 = vpop.f32.mrb[3].mxu1 }
  0xe3   :  { %122 = vst [vmem:[#allocation2 + $0x18] sm:$0xff] %v117_v28 }
  0xe5   :  { %v236_v32 = vpop.f32.mrb[4].mxu0 }
  0xe6   :  { %v3263_v33 = vpop.f32.mrb[5].mxu0  ;;  %v243_v35 = vrot.slane %v236_v32, 2 }
  0xe7   :  { %v132_v34 = vld [vmem:[#allocation2] sm:$0x3]  ;;  %v239_v36 = vpop.f32.mrb[6].mxu0  ;;  %v306_v20 = vld [vmem:[#allocation2] sm:$0xc] }
  0xe8   :  { %v188_v37 = vadd.f32 %v182_v27, %v132_v34  ;;  %v3264_v38 = vpop.f32.mrb[7].mxu0 }
  0xea   :  { %3552 = vtanh.f32 %v188_v37  ;;  %v189_v39 = vld [vmem:[#allocation2 + $0x18] sm:$0xc0]  ;;  %v3065_v43 = vmul.f32 -1.442695, %v188_v37  ;;  %v358_v27 = vld [vmem:[#allocation2 + $0x18] sm:$0x30] }
  0xeb   :  { %v245_v40 = vadd.f32 %v243_v35, %v189_v39 }
  0xed   :  { %3554 = vtanh.f32 %v245_v40  ;;  %v3066_v44 = vmul.f32 -1.442695, %v245_v40 }
  0xee   :  { %3556 = vpow2.f32 %v3065_v43 }
  0xef   :  { %3558 = vpow2.f32 %v3066_v44 }
  0xf4   :  { %v3553_v41 = vpop.eup %3552 }
  0xf5   :  { %255 = vrot.lane.b32.xlu0 %v3553_v41, %s3815_s2 }
  0xf7   :  { %v3555_v42 = vpop.eup %3554 }
  0xf8   :  { %v3557_v45 = vpop.eup %3556 }
  0xf9   :  { %279 = vrot.lane.b32.xlu0 %v3555_v42, %s3815_s2  ;;  %v249_v46 = vadd.f32 1.0, %v3557_v45  ;;  %v3559_v47 = vpop.eup %3558 }
  0xfa   :  { %v273_v48 = vadd.f32 1.0, %v3559_v47 }
  0xfb   :  { %3560 = vrcp.f32 %v249_v46 }
  0xfc   :  { %3562 = vrcp.f32 %v273_v48 }
 0x105   :  { %v3561_v49 = vpop.eup %3560 }
 0x106   :  { %v3563_v52 = vpop.eup %3562  ;;  %v253_v55 = vmul.f32 0.0, %v3561_v49 }
 0x107   :  { %v277_v58 = vmul.f32 0.0, %v3563_v52 }
 0x167   :  { %v256_v50 = vpop.permute.xlu0 %255 }
 0x168   :  { %v258_v51 = vmul.f32 %v3561_v49, %v256_v50 }
 0x16a   :  { %260 = vrot.lane.b32.xlu1 %v258_v51, %s3816_s28 }
 0x16b   :  { %v280_v53 = vpop.permute.xlu0 %279 }
 0x16c   :  { %v282_v54 = vmul.f32 %v3563_v52, %v280_v53 }
 0x16e   :  { %284 = vrot.lane.b32.xlu1 %v282_v54, %s3816_s28 }
 0x1dc   :  { %v261_v56 = vpop.permute.xlu1 %260 }
 0x1dd   :  { %v3950_v57 = vadd.f32 %v261_v56, %v253_v55 }
 0x1df   :  { %3564 = vtanh.f32 %v3950_v57  ;;  %v419_v45 = vrot.slane %v3950_v57, 6 }
 0x1e0   :  { %v285_v59 = vpop.permute.xlu1 %284 }
 0x1e1   :  { %v3953_v60 = vadd.f32 %v285_v59, %v277_v58 }
 0x1e3   :  { %3566 = vtanh.f32 %v3953_v60 }
 0x1e9   :  { %v3565_v61 = vpop.eup %3564 }
 0x1ea   :  { %266 = vrot.lane.b32.xlu0 %v3565_v61, %s3815_s2 }
 0x1ed   :  { %v3567_v62 = vpop.eup %3566 }
 0x1ee   :  { %290 = vrot.lane.b32.xlu1 %v3567_v62, %s3815_s2 }
 0x25c   :  { %v267_v63 = vpop.permute.xlu0 %266 }
 0x25d   :  { %v3958_v0 = vmul.f32 %v3561_v49, %v267_v63  ;;  %v446_v49 = vrot.slane %v3953_v60, 2 }
 0x25f   :  { %v307_v3 = vpack.c.bf16 %v3958_v0, %v3958_v0 }
 0x260   :  { %v291_v4 = vpop.permute.xlu1 %290 }
 0x261   :  { %v3962_v5 = vmul.f32 %v3563_v52, %v291_v4  ;;  %309 = vrot.lane.b32.xlu0 %v307_v3, %s3816_s28 }
 0x263   :  { %v359_v6 = vpack.c.bf16 %v3962_v5, %v3962_v5 }
 0x265   :  { %v361_v7 = vrot.slane %v359_v6, 3 }
 0x267   :  { %362 = vrot.lane.b32.xlu1 %v361_v7, %s3816_s28 }
 0x2d3   :  { %v310_v9 = vpop.permute.xlu0 %309 }
 0x2d4   :  { %3270 = vmatmul.mubr.msk.bf16.vlgmr.msra.gmra.mrb[4].mxu1 %vm72_vm1, %v310_v9  ;;  %v477_v9 = vld [vmem:[#allocation2] sm:$0x30] }
 0x2d5   :  { %3282 = vmatpush3.bf16.msra.mxu1 %v3892_v8  ;;  %3285 = vmatprep.mubr.msk.bf16.mxu1 %vm3814_vm0, %v3813_v2 }
 0x2d6   :  { %3283 = vmatprep.subr.bf16.mxu1 %v3813_v2 }
 0x2d9   :  { %v363_v13 = vpop.permute.xlu1 %362  ;;  %3284 = vmatpush3.bf16.msra.mxu1 %v3898_v10 }
 0x2da   :  { %3278 = vmatmul.mubr.msk.bf16.vlgmr.msra.gmra.mrb[8].mxu0 %vm72_vm1, %v363_v13  ;;  %3297 = vmatprep.subr.bf16.mxu1 %v3813_v2 }
 0x2db   :  { %3290 = vmatpush3.bf16.msra.mxu0 %v3903_v11  ;;  %3293 = vmatprep.mubr.msk.bf16.mxu0 %vm3814_vm0, %v3813_v2 }
 0x2dc   :  { %3291 = vmatprep.subr.bf16.mxu0 %v3813_v2 }
 0x2df   :  { %3292 = vmatpush3.bf16.msra.mxu0 %v3913_v12 }
 0x2e0   :  { %3305 = vmatprep.subr.bf16.mxu0 %v3813_v2 }
 0x3a7   :  { %v348_v16 = vpop.f32.mrb[4].mxu1 }
 0x3a8   :  { %v355_v18 = vrot.slane %v348_v16, 6  ;;  %v3271_v19 = vpop.f32.mrb[5].mxu1 }
 0x3a9   :  { %v351_v21 = vpop.f32.mrb[6].mxu1 }
 0x3aa   :  { %v357_v22 = vadd.f32 %v355_v18, %v306_v20  ;;  %v3272_v23 = vpop.f32.mrb[7].mxu1 }
 0x3ac   :  { %3568 = vtanh.f32 %v357_v22  ;;  %v3069_v33 = vmul.f32 -1.442695, %v357_v22  ;;  %v530_v22 = vld [vmem:[#allocation2 + $0x18] sm:$0xc] }
 0x3ad   :  { %v401_v24 = vpop.f32.mrb[8].mxu0 }
 0x3ae   :  { %v408_v25 = vrot.slane %v401_v24, 4  ;;  %v3279_v26 = vpop.f32.mrb[9].mxu0 }
 0x3af   :  { %v404_v28 = vpop.f32.mrb[10].mxu0 }
 0x3b0   :  { %v410_v29 = vadd.f32 %v408_v25, %v358_v27  ;;  %v3280_v30 = vpop.f32.mrb[11].mxu0 }
 0x3b2   :  { %3570 = vtanh.f32 %v410_v29  ;;  %v3070_v34 = vmul.f32 -1.442695, %v410_v29 }
 0x3b3   :  { %3572 = vpow2.f32 %v3069_v33 }
 0x3b4   :  { %3574 = vpow2.f32 %v3070_v34 }
 0x3b6   :  { %v3569_v31 = vpop.eup %3568 }
 0x3b7   :  { %423 = vrot.lane.b32.xlu0 %v3569_v31, %s3815_s2 }
 0x3bc   :  { %v3571_v32 = vpop.eup %3570 }
 0x3bd   :  { %450 = vrot.lane.b32.xlu1 %v3571_v32, %s3815_s2  ;;  %v3573_v35 = vpop.eup %3572 }
 0x3be   :  { %v414_v36 = vadd.f32 1.0, %v3573_v35  ;;  %v3575_v37 = vpop.eup %3574 }
 0x3bf   :  { %v441_v38 = vadd.f32 1.0, %v3575_v37 }
 0x3c0   :  { %3576 = vrcp.f32 %v414_v36 }
 0x3c1   :  { %3578 = vrcp.f32 %v441_v38 }
 0x3ca   :  { %v3577_v39 = vpop.eup %3576 }
 0x3cb   :  { %v3579_v42 = vpop.eup %3578  ;;  %v421_v46 = vmul.f32 %v3577_v39, %v419_v45 }
 0x3cc   :  { %v448_v50 = vmul.f32 %v3579_v42, %v446_v49 }
 0x429   :  { %v424_v40 = vpop.permute.xlu0 %423 }
 0x42a   :  { %v426_v41 = vmul.f32 %v3577_v39, %v424_v40 }
 0x42c   :  { %428 = vrot.lane.b32.xlu0 %v426_v41, %s3816_s28 }
 0x42f   :  { %v451_v43 = vpop.permute.xlu1 %450 }
 0x430   :  { %v453_v44 = vmul.f32 %v3579_v42, %v451_v43 }
 0x432   :  { %455 = vrot.lane.b32.xlu1 %v453_v44, %s3816_s28 }
 0x49e   :  { %v429_v47 = vpop.permute.xlu0 %428 }
 0x49f   :  { %v3987_v48 = vadd.f32 %v429_v47, %v421_v46 }
 0x4a1   :  { %3580 = vtanh.f32 %v3987_v48  ;;  %v591_v40 = vrot.slane %v3987_v48, 6 }
 0x4a4   :  { %v456_v51 = vpop.permute.xlu1 %455 }
 0x4a5   :  { %v3991_v52 = vadd.f32 %v456_v51, %v448_v50 }
 0x4a7   :  { %3582 = vtanh.f32 %v3991_v52  ;;  %v618_v44 = vrot.slane %v3991_v52, 2 }
 0x4ab   :  { %v3581_v53 = vpop.eup %3580 }
 0x4ac   :  { %434 = vrot.lane.b32.xlu0 %v3581_v53, %s3815_s2 }
 0x4b1   :  { %v3583_v54 = vpop.eup %3582 }
 0x4b2   :  { %461 = vrot.lane.b32.xlu1 %v3583_v54, %s3815_s2 }
 0x51e   :  { %v435_v55 = vpop.permute.xlu0 %434 }
 0x51f   :  { %v3996_v56 = vmul.f32 %v3577_v39, %v435_v55 }
 0x521   :  { %v478_v57 = vpack.c.bf16 %v3996_v56, %v3996_v56 }
 0x523   :  { %v480_v58 = vrot.slane %v478_v57, 1 }
 0x524   :  { %v462_v59 = vpop.permute.xlu1 %461 }
 0x525   :  { %v4000_v60 = vmul.f32 %v3579_v42, %v462_v59  ;;  %481 = vrot.lane.b32.xlu0 %v480_v58, %s3816_s28 }
 0x527   :  { %v531_v61 = vpack.c.bf16 %v4000_v60, %v4000_v60 }
 0x529   :  { %v533_v62 = vrot.slane %v531_v61, 2 }
 0x52b   :  { %534 = vrot.lane.b32.xlu1 %v533_v62, %s3816_s28 }
 0x597   :  { %v482_v63 = vpop.permute.xlu0 %481 }
 0x598   :  { %3286 = vmatmul.mubr.msk.bf16.vlgmr.msra.gmra.mrb[8].mxu1 %vm72_vm1, %v482_v63 }
 0x599   :  { %3298 = vmatpush3.bf16.msra.mxu1 %v3892_v8  ;;  %3301 = vmatprep.mubr.msk.bf16.mxu1 %vm3814_vm0, %v3813_v2 }
 0x59a   :  { %3299 = vmatprep.subr.bf16.mxu1 %v3813_v2 }
 0x59d   :  { %v535_v3 = vpop.permute.xlu1 %534  ;;  %3300 = vmatpush3.bf16.msra.mxu1 %v3898_v10 }
 0x59e   :  { %3294 = vmatmul.mubr.msk.bf16.vlgmr.msra.gmra.mrb[12].mxu0 %vm72_vm1, %v535_v3  ;;  %3313 = vmatprep.subr.bf16.mxu1 %v3813_v2 }
 0x59f   :  { %3306 = vmatpush3.bf16.msra.mxu0 %v3903_v11  ;;  %3309 = vmatprep.mubr.msk.bf16.mxu0 %vm3814_vm0, %v3813_v2 }
 0x5a0   :  { %3307 = vmatprep.subr.bf16.mxu0 %v3813_v2 }
 0x5a3   :  { %3308 = vmatpush3.bf16.msra.mxu0 %v3913_v12 }
 0x5a4   :  { %3321 = vmatprep.subr.bf16.mxu0 %v3813_v2 }
 0x66b   :  { %v520_v4 = vpop.f32.mrb[8].mxu1 }
 0x66c   :  { %v527_v6 = vrot.slane %v520_v4, 4  ;;  %v3287_v7 = vpop.f32.mrb[9].mxu1  ;;  %v649_v4 = vld [vmem:[#allocation2] sm:$0xc0] }
 0x66d   :  { %v523_v13 = vpop.f32.mrb[10].mxu1 }
 0x66e   :  { %v529_v16 = vadd.f32 %v527_v6, %v477_v9  ;;  %v3288_v18 = vpop.f32.mrb[11].mxu1  ;;  %v702_v13 = vld [vmem:[#allocation2 + $0x18] sm:$0x3] }
 0x670   :  { %3584 = vtanh.f32 %v529_v16  ;;  %v3073_v28 = vmul.f32 -1.442695, %v529_v16 }
 0x671   :  { %v573_v19 = vpop.f32.mrb[12].mxu0 }
 0x672   :  { %v580_v20 = vrot.slane %v573_v19, 6  ;;  %v3295_v21 = vpop.f32.mrb[13].mxu0 }
 0x673   :  { %v576_v23 = vpop.f32.mrb[14].mxu0 }
 0x674   :  { %v582_v24 = vadd.f32 %v580_v20, %v530_v22  ;;  %v3296_v25 = vpop.f32.mrb[15].mxu0 }
 0x676   :  { %3586 = vtanh.f32 %v582_v24  ;;  %v3074_v29 = vmul.f32 -1.442695, %v582_v24 }
 0x677   :  { %3588 = vpow2.f32 %v3073_v28 }
 0x678   :  { %3590 = vpow2.f32 %v3074_v29 }
 0x67a   :  { %v3585_v26 = vpop.eup %3584 }
 0x67b   :  { %595 = vrot.lane.b32.xlu0 %v3585_v26, %s3815_s2 }
 0x680   :  { %v3587_v27 = vpop.eup %3586 }
 0x681   :  { %622 = vrot.lane.b32.xlu1 %v3587_v27, %s3815_s2  ;;  %v3589_v30 = vpop.eup %3588 }
 0x682   :  { %v586_v31 = vadd.f32 1.0, %v3589_v30  ;;  %v3591_v32 = vpop.eup %3590 }
 0x683   :  { %v613_v33 = vadd.f32 1.0, %v3591_v32 }
 0x684   :  { %3592 = vrcp.f32 %v586_v31 }
 0x685   :  { %3594 = vrcp.f32 %v613_v33 }
 0x68e   :  { %v3593_v34 = vpop.eup %3592 }
 0x68f   :  { %v3595_v37 = vpop.eup %3594  ;;  %v593_v41 = vmul.f32 %v3593_v34, %v591_v40 }
 0x690   :  { %v620_v45 = vmul.f32 %v3595_v37, %v618_v44 }
 0x6ed   :  { %v596_v35 = vpop.permute.xlu0 %595 }
 0x6ee   :  { %v598_v36 = vmul.f32 %v3593_v34, %v596_v35 }
 0x6f0   :  { %600 = vrot.lane.b32.xlu0 %v598_v36, %s3816_s28 }
 0x6f3   :  { %v623_v38 = vpop.permute.xlu1 %622 }
 0x6f4   :  { %v625_v39 = vmul.f32 %v3595_v37, %v623_v38 }
 0x6f6   :  { %627 = vrot.lane.b32.xlu1 %v625_v39, %s3816_s28 }
 0x762   :  { %v601_v42 = vpop.permute.xlu0 %600 }
 0x763   :  { %v4025_v43 = vadd.f32 %v601_v42, %v593_v41 }
 0x765   :  { %3596 = vtanh.f32 %v4025_v43  ;;  %v760_v36 = vrot.slane %v4025_v43, 6 }
 0x768   :  { %v628_v46 = vpop.permute.xlu1 %627 }
 0x769   :  { %v4029_v47 = vadd.f32 %v628_v46, %v620_v45 }
 0x76b   :  { %3598 = vtanh.f32 %v4029_v47  ;;  %v787_v39 = vrot.slane %v4029_v47, 2 }
 0x76f   :  { %v3597_v49 = vpop.eup %3596 }
 0x770   :  { %606 = vrot.lane.b32.xlu0 %v3597_v49, %s3815_s2 }
 0x775   :  { %v3599_v50 = vpop.eup %3598 }
 0x776   :  { %633 = vrot.lane.b32.xlu1 %v3599_v50, %s3815_s2 }
 0x7e2   :  { %v607_v48 = vpop.permute.xlu0 %606 }
 0x7e3   :  { %v4034_v51 = vmul.f32 %v3593_v34, %v607_v48 }
 0x7e5   :  { %v650_v52 = vpack.c.bf16 %v4034_v51, %v4034_v51 }
 0x7e7   :  { %v652_v53 = vrot.slane %v650_v52, 2 }
 0x7e8   :  { %v634_v54 = vpop.permute.xlu1 %633 }
 0x7e9   :  { %v4038_v55 = vmul.f32 %v3595_v37, %v634_v54  ;;  %653 = vrot.lane.b32.xlu0 %v652_v53, %s3816_s28 }
 0x7eb   :  { %v703_v57 = vpack.c.bf16 %v4038_v55, %v4038_v55 }
 0x7ed   :  { %v705_v58 = vrot.slane %v703_v57, 1 }
 0x7ef   :  { %706 = vrot.lane.b32.xlu1 %v705_v58, %s3816_s28  ;;  %v818_v58 = vld [vmem:[#allocation2 + $0x10] sm:$0x3] }
 0x85b   :  { %v654_v59 = vpop.permute.xlu0 %653 }
 0x85c   :  { %3302 = vmatmul.mubr.msk.bf16.vlgmr.msra.gmra.mrb[12].mxu1 %vm72_vm1, %v654_v59 }
 0x85d   :  { %3314 = vmatpush3.bf16.msra.mxu1 %v3892_v8  ;;  %3317 = vmatprep.mubr.msk.bf16.mxu1 %vm3814_vm0, %v3813_v2 }
 0x85e   :  { %3315 = vmatprep.subr.bf16.mxu1 %v3813_v2 }
 0x861   :  { %v707_v61 = vpop.permute.xlu1 %706  ;;  %3316 = vmatpush3.bf16.msra.mxu1 %v3898_v10 }
 0x862   :  { %3310 = vmatmul.mubr.msk.bf16.vlgmr.msra.gmra.mrb[16].mxu0 %vm72_vm1, %v707_v61  ;;  %3329 = vmatprep.subr.bf16.mxu1 %v3813_v2 }
 0x863   :  { %3322 = vmatpush3.bf16.msra.mxu0 %v3903_v11  ;;  %3325 = vmatprep.mubr.msk.bf16.mxu0 %vm3814_vm0, %v3813_v2 }
 0x864   :  { %3323 = vmatprep.subr.bf16.mxu0 %v3813_v2 }
 0x867   :  { %3324 = vmatpush3.bf16.msra.mxu0 %v3913_v12 }
 0x868   :  { %3337 = vmatprep.subr.bf16.mxu0 %v3813_v2 }
 0x92f   :  { %v692_v62 = vpop.f32.mrb[12].mxu1 }
 0x930   :  { %v699_v63 = vrot.slane %v692_v62, 2  ;;  %v3303_v3 = vpop.f32.mrb[13].mxu1 }
 0x931   :  { %v695_v6 = vpop.f32.mrb[14].mxu1 }
 0x932   :  { %v701_v7 = vadd.f32 %v699_v63, %v649_v4  ;;  %v3304_v9 = vpop.f32.mrb[15].mxu1 }
 0x933   :  { %v868_v9 = vld [vmem:[#allocation2 + $0x8] sm:$0xc0] }
 0x934   :  { %3600 = vtanh.f32 %v701_v7  ;;  %v3077_v24 = vmul.f32 -1.442695, %v701_v7 }
 0x935   :  { %v745_v16 = vpop.f32.mrb[16].mxu0 }
 0x936   :  { %v751_v18 = vadd.f32 %v745_v16, %v702_v13  ;;  %v3311_v19 = vpop.f32.mrb[17].mxu0 }
 0x937   :  { %v748_v20 = vpop.f32.mrb[18].mxu0 }
 0x938   :  { %3602 = vtanh.f32 %v751_v18  ;;  %v3312_v21 = vpop.f32.mrb[19].mxu0  ;;  %v3078_v25 = vmul.f32 -1.442695, %v751_v18 }
 0x939   :  { %3604 = vpow2.f32 %v3077_v24 }
 0x93a   :  { %3606 = vpow2.f32 %v3078_v25 }
 0x93e   :  { %v3601_v22 = vpop.eup %3600 }
 0x93f   :  { %764 = vrot.lane.b32.xlu0 %v3601_v22, %s3815_s2 }
 0x942   :  { %v3603_v23 = vpop.eup %3602 }
 0x943   :  { %791 = vrot.lane.b32.xlu1 %v3603_v23, %s3815_s2  ;;  %v3605_v26 = vpop.eup %3604 }
 0x944   :  { %v755_v27 = vadd.f32 1.0, %v3605_v26  ;;  %v3607_v28 = vpop.eup %3606 }
 0x945   :  { %v782_v29 = vadd.f32 1.0, %v3607_v28 }
 0x946   :  { %3608 = vrcp.f32 %v755_v27 }
 0x947   :  { %3610 = vrcp.f32 %v782_v29 }
 0x950   :  { %v3609_v30 = vpop.eup %3608 }
 0x951   :  { %v3611_v33 = vpop.eup %3610  ;;  %v762_v37 = vmul.f32 %v3609_v30, %v760_v36 }
 0x952   :  { %v789_v41 = vmul.f32 %v3611_v33, %v787_v39 }
 0x9b1   :  { %v765_v31 = vpop.permute.xlu0 %764 }
 0x9b2   :  { %v767_v32 = vmul.f32 %v3609_v30, %v765_v31 }
 0x9b4   :  { %769 = vrot.lane.b32.xlu0 %v767_v32, %s3816_s28 }
 0x9b5   :  { %v792_v34 = vpop.permute.xlu1 %791 }
 0x9b6   :  { %v794_v35 = vmul.f32 %v3611_v33, %v792_v34 }
 0x9b8   :  { %796 = vrot.lane.b32.xlu1 %v794_v35, %s3816_s28 }
 0xa26   :  { %v770_v38 = vpop.permute.xlu0 %769 }
 0xa27   :  { %v4064_v40 = vadd.f32 %v770_v38, %v762_v37 }
 0xa29   :  { %3612 = vtanh.f32 %v4064_v40 }
 0xa2a   :  { %v797_v42 = vpop.permute.xlu1 %796 }
 0xa2b   :  { %v4067_v44 = vadd.f32 %v797_v42, %v789_v41 }
 0xa2d   :  { %3614 = vtanh.f32 %v4067_v44  ;;  %v955_v36 = vrot.slane %v4067_v44, 2 }
 0xa33   :  { %v3613_v45 = vpop.eup %3612 }
 0xa34   :  { %775 = vrot.lane.b32.xlu0 %v3613_v45, %s3815_s2 }
 0xa37   :  { %v3615_v46 = vpop.eup %3614 }
 0xa38   :  { %802 = vrot.lane.b32.xlu1 %v3615_v46, %s3815_s2 }
 0xaa6   :  { %v776_v43 = vpop.permute.xlu0 %775 }
 0xaa7   :  { %v4072_v49 = vmul.f32 %v3609_v30, %v776_v43 }
 0xaa9   :  { %v819_v47 = vpack.c.bf16 %v4072_v49, %v4072_v49 }
 0xaaa   :  { %v803_v50 = vpop.permute.xlu1 %802 }
 0xaab   :  { %v4076_v48 = vmul.f32 %v3611_v33, %v803_v50  ;;  %v821_v52 = vrot.slane %v819_v47, 3  ;;  %v928_v33 = vrot.slane %v4064_v40, 6 }
 0xaad   :  { %v869_v53 = vpack.c.bf16 %v4076_v48, %v4076_v48  ;;  %822 = vrot.lane.b32.xlu1 %v821_v52, %s3816_s28 }
 0xaaf   :  { %871 = vrot.lane.b32.xlu0 %v869_v53, %s3816_s28 }
 0xb1f   :  { %v823_v54 = vpop.permute.xlu1 %822 }
 0xb20   :  { %3318 = vmatmul.mubr.msk.bf16.vlgmr.msra.gmra.mrb[16].mxu1 %vm72_vm1, %v823_v54 }
 0xb21   :  { %v872_v57 = vpop.permute.xlu0 %871  ;;  %3330 = vmatpush3.bf16.msra.mxu1 %v3892_v8  ;;  %3333 = vmatprep.mubr.msk.bf16.mxu1 %vm3814_vm0, %v3813_v2 }
 0xb22   :  { %3326 = vmatmul.mubr.msk.bf16.vlgmr.msra.gmra.mrb[20].mxu0 %vm72_vm1, %v872_v57  ;;  %3331 = vmatprep.subr.bf16.mxu1 %v3813_v2 }
 0xb23   :  { %3338 = vmatpush3.bf16.msra.mxu0 %v3903_v11  ;;  %3341 = vmatprep.mubr.msk.bf16.mxu0 %vm3814_vm0, %v3813_v2 }
 0xb24   :  { %3339 = vmatprep.subr.bf16.mxu0 %v3813_v2 }
 0xb25   :  { %3332 = vmatpush3.bf16.msra.mxu1 %v3898_v10 }
 0xb26   :  { %3345 = vmatprep.subr.bf16.mxu1 %v3813_v2 }
 0xb27   :  { %3340 = vmatpush3.bf16.msra.mxu0 %v3913_v12 }
 0xb28   :  { %3353 = vmatprep.subr.bf16.mxu0 %v3813_v2 }
 0xbf3   :  { %v861_v59 = vpop.f32.mrb[16].mxu1 }
 0xbf4   :  { %v867_v61 = vadd.f32 %v861_v59, %v818_v58  ;;  %v3319_v62 = vpop.f32.mrb[17].mxu1 }
 0xbf5   :  { %v864_v63 = vpop.f32.mrb[18].mxu1  ;;  %v910_v3 = vpop.f32.mrb[20].mxu0 }
 0xbf6   :  { %3616 = vtanh.f32 %v867_v61  ;;  %v917_v4 = vrot.slane %v910_v3, 2  ;;  %v3320_v6 = vpop.f32.mrb[19].mxu1  ;;  %v3327_v7 = vpop.f32.mrb[21].mxu0  ;;  %v3081_v21 = vmul.f32 -1.442695, %v867_v61 }
 0xbf7   :  { %v913_v13 = vpop.f32.mrb[22].mxu0  ;;  %v984_v61 = vld [vmem:[#allocation2 + $0x10] sm:$0xc] }
 0xbf8   :  { %v919_v16 = vadd.f32 %v917_v4, %v868_v9  ;;  %v3328_v18 = vpop.f32.mrb[23].mxu0  ;;  %v1036_v9 = vld [vmem:[#allocation2 + $0x8] sm:$0x30] }
 0xbfa   :  { %3618 = vtanh.f32 %v919_v16  ;;  %v3082_v22 = vmul.f32 -1.442695, %v919_v16 }
 0xbfb   :  { %3620 = vpow2.f32 %v3081_v21 }
 0xbfc   :  { %3622 = vpow2.f32 %v3082_v22 }
 0xc00   :  { %v3617_v19 = vpop.eup %3616 }
 0xc01   :  { %932 = vrot.lane.b32.xlu0 %v3617_v19, %s3815_s2 }
 0xc04   :  { %v3619_v20 = vpop.eup %3618 }
 0xc05   :  { %959 = vrot.lane.b32.xlu1 %v3619_v20, %s3815_s2  ;;  %v3621_v23 = vpop.eup %3620 }
 0xc06   :  { %v923_v24 = vadd.f32 1.0, %v3621_v23  ;;  %v3623_v25 = vpop.eup %3622 }
 0xc07   :  { %v950_v26 = vadd.f32 1.0, %v3623_v25 }
 0xc08   :  { %3624 = vrcp.f32 %v923_v24 }
 0xc09   :  { %3626 = vrcp.f32 %v950_v26 }
 0xc12   :  { %v3625_v27 = vpop.eup %3624 }
 0xc13   :  { %v3627_v30 = vpop.eup %3626  ;;  %v930_v34 = vmul.f32 %v3625_v27, %v928_v33 }
 0xc14   :  { %v957_v38 = vmul.f32 %v3627_v30, %v955_v36 }
 0xc73   :  { %v933_v28 = vpop.permute.xlu0 %932 }
 0xc74   :  { %v935_v29 = vmul.f32 %v3625_v27, %v933_v28 }
 0xc76   :  { %937 = vrot.lane.b32.xlu0 %v935_v29, %s3816_s28 }
 0xc77   :  { %v960_v31 = vpop.permute.xlu1 %959 }
 0xc78   :  { %v962_v32 = vmul.f32 %v3627_v30, %v960_v31 }
 0xc7a   :  { %964 = vrot.lane.b32.xlu1 %v962_v32, %s3816_s28 }
 0xce8   :  { %v938_v35 = vpop.permute.xlu0 %937 }
 0xce9   :  { %v4102_v37 = vadd.f32 %v938_v35, %v930_v34 }
 0xceb   :  { %3628 = vtanh.f32 %v4102_v37  ;;  %v1097_v33 = vrot.slane %v4102_v37, 6 }
 0xcec   :  { %v965_v39 = vpop.permute.xlu1 %964 }
 0xced   :  { %v4105_v41 = vadd.f32 %v965_v39, %v957_v38 }
 0xcef   :  { %3630 = vtanh.f32 %v4105_v41  ;;  %v1124_v38 = vrot.slane %v4105_v41, 2 }
 0xcf5   :  { %v3629_v42 = vpop.eup %3628 }
 0xcf6   :  { %943 = vrot.lane.b32.xlu0 %v3629_v42, %s3815_s2 }
 0xcf9   :  { %v3631_v45 = vpop.eup %3630 }
 0xcfa   :  { %970 = vrot.lane.b32.xlu1 %v3631_v45, %s3815_s2 }
 0xd68   :  { %v944_v40 = vpop.permute.xlu0 %943 }
 0xd69   :  { %v4110_v46 = vmul.f32 %v3625_v27, %v944_v40 }
 0xd6b   :  { %v985_v44 = vpack.c.bf16 %v4110_v46, %v4110_v46 }
 0xd6c   :  { %v971_v43 = vpop.permute.xlu1 %970 }
 0xd6d   :  { %v4114_v47 = vmul.f32 %v3627_v30, %v971_v43  ;;  %987 = vrot.lane.b32.xlu0 %v985_v44, %s3816_s28 }
 0xd6f   :  { %v1037_v50 = vpack.c.bf16 %v4114_v47, %v4114_v47 }
 0xd71   :  { %v1039_v52 = vrot.slane %v1037_v50, 3 }
 0xd73   :  { %1040 = vrot.lane.b32.xlu1 %v1039_v52, %s3816_s28 }
 0xddf   :  { %v988_v53 = vpop.permute.xlu0 %987 }
 0xde0   :  { %3334 = vmatmul.mubr.msk.bf16.vlgmr.msra.gmra.mrb[20].mxu1 %vm72_vm1, %v988_v53 }
 0xde1   :  { %3346 = vmatpush3.bf16.msra.mxu1 %v3892_v8  ;;  %3349 = vmatprep.mubr.msk.bf16.mxu1 %vm3814_vm0, %v3813_v2 }
 0xde2   :  { %3347 = vmatprep.subr.bf16.mxu1 %v3813_v2 }
 0xde5   :  { %v1041_v54 = vpop.permute.xlu1 %1040  ;;  %3348 = vmatpush3.bf16.msra.mxu1 %v3898_v10 }
 0xde6   :  { %3342 = vmatmul.mubr.msk.bf16.vlgmr.msra.gmra.mrb[24].mxu0 %vm72_vm1, %v1041_v54  ;;  %3361 = vmatprep.subr.bf16.mxu1 %v3813_v2 }
 0xde7   :  { %3354 = vmatpush3.bf16.msra.mxu0 %v3903_v11  ;;  %3357 = vmatprep.mubr.msk.bf16.mxu0 %vm3814_vm0, %v3813_v2 }
 0xde8   :  { %3355 = vmatprep.subr.bf16.mxu0 %v3813_v2 }
 0xdeb   :  { %3356 = vmatpush3.bf16.msra.mxu0 %v3913_v12 }
 0xdec   :  { %3369 = vmatprep.subr.bf16.mxu0 %v3813_v2 }
 0xeb3   :  { %v1026_v57 = vpop.f32.mrb[20].mxu1 }
 0xeb4   :  { %v1033_v58 = vrot.slane %v1026_v57, 6  ;;  %v3335_v59 = vpop.f32.mrb[21].mxu1 }
 0xeb5   :  { %v1029_v62 = vpop.f32.mrb[22].mxu1 }
 0xeb6   :  { %v1035_v63 = vadd.f32 %v1033_v58, %v984_v61  ;;  %v3336_v3 = vpop.f32.mrb[23].mxu1 }
 0xeb8   :  { %3632 = vtanh.f32 %v1035_v63  ;;  %v3085_v21 = vmul.f32 -1.442695, %v1035_v63  ;;  %v1153_v63 = vld [vmem:[#allocation2 + $0x10] sm:$0x30] }
 0xeb9   :  { %v1079_v4 = vpop.f32.mrb[24].mxu0 }
 0xeba   :  { %v1086_v6 = vrot.slane %v1079_v4, 4  ;;  %v3343_v7 = vpop.f32.mrb[25].mxu0 }
 0xebb   :  { %v1082_v13 = vpop.f32.mrb[26].mxu0 }
 0xebc   :  { %v1088_v16 = vadd.f32 %v1086_v6, %v1036_v9  ;;  %v3344_v18 = vpop.f32.mrb[27].mxu0  ;;  %v1206_v9 = vld [vmem:[#allocation2 + $0x8] sm:$0xc] }
 0xebe   :  { %3634 = vtanh.f32 %v1088_v16  ;;  %v3086_v22 = vmul.f32 -1.442695, %v1088_v16 }
 0xebf   :  { %3636 = vpow2.f32 %v3085_v21 }
 0xec0   :  { %3638 = vpow2.f32 %v3086_v22 }
 0xec2   :  { %v3633_v19 = vpop.eup %3632 }
 0xec3   :  { %1101 = vrot.lane.b32.xlu0 %v3633_v19, %s3815_s2 }
 0xec8   :  { %v3635_v20 = vpop.eup %3634 }
 0xec9   :  { %1128 = vrot.lane.b32.xlu1 %v3635_v20, %s3815_s2  ;;  %v3637_v23 = vpop.eup %3636 }
 0xeca   :  { %v1092_v24 = vadd.f32 1.0, %v3637_v23  ;;  %v3639_v25 = vpop.eup %3638 }
 0xecb   :  { %v1119_v26 = vadd.f32 1.0, %v3639_v25 }
 0xecc   :  { %3640 = vrcp.f32 %v1092_v24 }
 0xecd   :  { %3642 = vrcp.f32 %v1119_v26 }
 0xed6   :  { %v3641_v27 = vpop.eup %3640 }
 0xed7   :  { %v3643_v30 = vpop.eup %3642  ;;  %v1099_v34 = vmul.f32 %v3641_v27, %v1097_v33 }
 0xed8   :  { %v1126_v39 = vmul.f32 %v3643_v30, %v1124_v38 }
 0xf35   :  { %v1102_v28 = vpop.permute.xlu0 %1101 }
 0xf36   :  { %v1104_v29 = vmul.f32 %v3641_v27, %v1102_v28 }
 0xf38   :  { %1106 = vrot.lane.b32.xlu0 %v1104_v29, %s3816_s28 }
 0xf3b   :  { %v1129_v31 = vpop.permute.xlu1 %1128 }
 0xf3c   :  { %v1131_v32 = vmul.f32 %v3643_v30, %v1129_v31 }
 0xf3e   :  { %1133 = vrot.lane.b32.xlu1 %v1131_v32, %s3816_s28 }
 0xfaa   :  { %v1107_v35 = vpop.permute.xlu0 %1106 }
 0xfab   :  { %v4139_v36 = vadd.f32 %v1107_v35, %v1099_v34 }
 0xfad   :  { %3644 = vtanh.f32 %v4139_v36  ;;  %v1267_v32 = vrot.slane %v4139_v36, 6 }
 0xfb0   :  { %v1134_v42 = vpop.permute.xlu1 %1133 }
 0xfb1   :  { %v4143_v45 = vadd.f32 %v1134_v42, %v1126_v39 }
 0xfb3   :  { %3646 = vtanh.f32 %v4143_v45  ;;  %v1294_v38 = vrot.slane %v4143_v45, 2 }
 0xfb7   :  { %v3645_v40 = vpop.eup %3644 }
 0xfb8   :  { %1112 = vrot.lane.b32.xlu0 %v3645_v40, %s3815_s2 }
 0xfbd   :  { %v3647_v44 = vpop.eup %3646 }
 0xfbe   :  { %1139 = vrot.lane.b32.xlu1 %v3647_v44, %s3815_s2 }
0x102a   :  { %v1113_v37 = vpop.permute.xlu0 %1112 }
0x102b   :  { %v4148_v43 = vmul.f32 %v3641_v27, %v1113_v37 }
0x102d   :  { %v1154_v41 = vpack.c.bf16 %v4148_v43, %v4148_v43 }
0x102f   :  { %v1156_v50 = vrot.slane %v1154_v41, 1 }
0x1030   :  { %v1140_v52 = vpop.permute.xlu1 %1139 }
0x1031   :  { %v4152_v53 = vmul.f32 %v3643_v30, %v1140_v52  ;;  %1157 = vrot.lane.b32.xlu0 %v1156_v50, %s3816_s28 }
0x1033   :  { %v1207_v54 = vpack.c.bf16 %v4152_v53, %v4152_v53 }
0x1035   :  { %v1209_v57 = vrot.slane %v1207_v54, 2 }
0x1037   :  { %1210 = vrot.lane.b32.xlu1 %v1209_v57, %s3816_s28 }
0x10a3   :  { %v1158_v58 = vpop.permute.xlu0 %1157 }
0x10a4   :  { %3350 = vmatmul.mubr.msk.bf16.vlgmr.msra.gmra.mrb[24].mxu1 %vm72_vm1, %v1158_v58 }
0x10a5   :  { %3362 = vmatpush3.bf16.msra.mxu1 %v3892_v8  ;;  %3365 = vmatprep.mubr.msk.bf16.mxu1 %vm3814_vm0, %v3813_v2 }
0x10a6   :  { %3363 = vmatprep.subr.bf16.mxu1 %v3813_v2 }
0x10a9   :  { %v1211_v59 = vpop.permute.xlu1 %1210  ;;  %3364 = vmatpush3.bf16.msra.mxu1 %v3898_v10 }
0x10aa   :  { %3358 = vmatmul.mubr.msk.bf16.vlgmr.msra.gmra.mrb[28].mxu0 %vm72_vm1, %v1211_v59 }
0x10ab   :  { %3370 = vmatpush3.bf16.msra.mxu0 %v3903_v11  ;;  %3373 = vmatprep.mubr.msk.bf16.mxu0 %vm3814_vm0, %v3813_v2 }
0x10ac   :  { %3371 = vmatprep.subr.bf16.mxu0 %v3813_v2 }
0x10af   :  { %3372 = vmatpush3.bf16.msra.mxu0 %v3913_v12 }
0x10b0   :  { %3377 = vmatprep.subr.bf16.mxu0 %v3813_v2 }
0x1177   :  { %v1196_v8 = vpop.f32.mrb[24].mxu1 }
0x1178   :  { %v1203_v61 = vrot.slane %v1196_v8, 4  ;;  %v3351_v62 = vpop.f32.mrb[25].mxu1 }
0x1179   :  { %v1199_v3 = vpop.f32.mrb[26].mxu1 }
0x117a   :  { %v1205_v4 = vadd.f32 %v1203_v61, %v1153_v63  ;;  %v3352_v10 = vpop.f32.mrb[27].mxu1  ;;  %v1323_v3 = vld [vmem:[#allocation2 + $0x10] sm:$0xc0] }
0x117c   :  { %3648 = vtanh.f32 %v1205_v4  ;;  %v3089_v20 = vmul.f32 -1.442695, %v1205_v4 }
0x117d   :  { %v1249_v6 = vpop.f32.mrb[28].mxu0 }
0x117e   :  { %v1256_v7 = vrot.slane %v1249_v6, 6  ;;  %v3359_v11 = vpop.f32.mrb[29].mxu0 }
0x117f   :  { %v1252_v13 = vpop.f32.mrb[30].mxu0 }
0x1180   :  { %v1258_v16 = vadd.f32 %v1256_v7, %v1206_v9  ;;  %v3360_v18 = vpop.f32.mrb[31].mxu0  ;;  %v1376_v7 = vld [vmem:[#allocation2 + $0x8] sm:$0x3] }
0x1182   :  { %3650 = vtanh.f32 %v1258_v16  ;;  %v3090_v21 = vmul.f32 -1.442695, %v1258_v16 }
0x1183   :  { %3652 = vpow2.f32 %v3089_v20 }
0x1184   :  { %3654 = vpow2.f32 %v3090_v21 }
0x1186   :  { %v3649_v19 = vpop.eup %3648 }
0x1187   :  { %1271 = vrot.lane.b32.xlu0 %v3649_v19, %s3815_s2 }
0x118c   :  { %v3651_v12 = vpop.eup %3650 }
0x118d   :  { %1298 = vrot.lane.b32.xlu1 %v3651_v12, %s3815_s2  ;;  %v3653_v22 = vpop.eup %3652 }
0x118e   :  { %v1262_v23 = vadd.f32 1.0, %v3653_v22  ;;  %v3655_v24 = vpop.eup %3654 }
0x118f   :  { %v1289_v25 = vadd.f32 1.0, %v3655_v24 }
0x1190   :  { %3656 = vrcp.f32 %v1262_v23 }
0x1191   :  { %3658 = vrcp.f32 %v1289_v25 }
0x119a   :  { %v3657_v26 = vpop.eup %3656 }
0x119b   :  { %v3659_v29 = vpop.eup %3658  ;;  %v1269_v33 = vmul.f32 %v3657_v26, %v1267_v32 }
0x119c   :  { %v1296_v39 = vmul.f32 %v3659_v29, %v1294_v38 }
0x11f9   :  { %v1272_v27 = vpop.permute.xlu0 %1271 }
0x11fa   :  { %v1274_v28 = vmul.f32 %v3657_v26, %v1272_v27 }
0x11fc   :  { %1276 = vrot.lane.b32.xlu0 %v1274_v28, %s3816_s28 }
0x11ff   :  { %v1299_v30 = vpop.permute.xlu1 %1298 }
0x1200   :  { %v1301_v31 = vmul.f32 %v3659_v29, %v1299_v30 }
0x1202   :  { %1303 = vrot.lane.b32.xlu1 %v1301_v31, %s3816_s28 }
0x126e   :  { %v1277_v34 = vpop.permute.xlu0 %1276 }
0x126f   :  { %v4176_v35 = vadd.f32 %v1277_v34, %v1269_v33 }
0x1271   :  { %3660 = vtanh.f32 %v4176_v35  ;;  %v1434_v32 = vrot.slane %v4176_v35, 6 }
0x1274   :  { %v1304_v42 = vpop.permute.xlu1 %1303 }
0x1275   :  { %v4180_v40 = vadd.f32 %v1304_v42, %v1296_v39 }
0x1277   :  { %3662 = vtanh.f32 %v4180_v40  ;;  %v1461_v38 = vrot.slane %v4180_v40, 2 }
0x127b   :  { %v3661_v44 = vpop.eup %3660 }
0x127c   :  { %1282 = vrot.lane.b32.xlu0 %v3661_v44, %s3815_s2 }
0x1281   :  { %v3663_v37 = vpop.eup %3662 }
0x1282   :  { %1309 = vrot.lane.b32.xlu1 %v3663_v37, %s3815_s2 }
0x12ee   :  { %v1283_v36 = vpop.permute.xlu0 %1282 }
0x12ef   :  { %v4185_v41 = vmul.f32 %v3657_v26, %v1283_v36 }
0x12f1   :  { %v1324_v45 = vpack.c.bf16 %v4185_v41, %v4185_v41 }
0x12f3   :  { %v1326_v50 = vrot.slane %v1324_v45, 2 }
0x12f4   :  { %v1310_v52 = vpop.permute.xlu1 %1309 }
0x12f5   :  { %v4189_v54 = vmul.f32 %v3659_v29, %v1310_v52  ;;  %1327 = vrot.lane.b32.xlu0 %v1326_v50, %s3816_s28  ;;  %v4294_v52 = vld [vmem:[%s4681_s6 + $0x18] sm:$0xff]  }
0x12f7   :  { %v1377_v57 = vpack.c.bf16 %v4189_v54, %v4189_v54 }
0x12f9   :  { %v1379_v58 = vrot.slane %v1377_v57, 1 }
0x12fb   :  { %1380 = vrot.lane.b32.xlu1 %v1379_v58, %s3816_s28 }
0x1367   :  { %v1328_v59 = vpop.permute.xlu0 %1327 }
0x1368   :  { %3366 = vmatmul.mubr.msk.bf16.vlgmr.msra.gmra.mrb[28].mxu1 %vm72_vm1, %v1328_v59 }
0x1369   :  { %1589 = vmatprep.mubr.bf16.mxu1 %v3812_v1 }
0x136d   :  { %v1381_v8 = vpop.permute.xlu1 %1380 }
0x136e   :  { %3374 = vmatmul.mubr.msk.bf16.vlgmr.msra.gmra.mrb[32].mxu0 %vm72_vm1, %v1381_v8 }
0x136f   :  { %3381 = vmatprep.mubr.msk.bf16.mxu0 %vm3814_vm0, %v3813_v2 }
0x143b   :  { %v1366_v61 = vpop.f32.mrb[28].mxu1 }
0x143c   :  { %v1373_v62 = vrot.slane %v1366_v61, 2  ;;  %v3367_v63 = vpop.f32.mrb[29].mxu1 }
0x143d   :  { %v1369_v4 = vpop.f32.mrb[30].mxu1 }
0x143e   :  { %v1375_v10 = vadd.f32 %v1373_v62, %v1323_v3  ;;  %v3368_v6 = vpop.f32.mrb[31].mxu1 }
0x1440   :  { %3664 = vtanh.f32 %v1375_v10  ;;  %v3093_v20 = vmul.f32 -1.442695, %v1375_v10 }
0x1441   :  { %v1419_v11 = vpop.f32.mrb[32].mxu0 }
0x1442   :  { %v1425_v9 = vadd.f32 %v1419_v11, %v1376_v7  ;;  %v3375_v13 = vpop.f32.mrb[33].mxu0 }
0x1443   :  { %v1422_v16 = vpop.f32.mrb[34].mxu0 }
0x1444   :  { %3666 = vtanh.f32 %v1425_v9  ;;  %v3376_v18 = vpop.f32.mrb[35].mxu0  ;;  %v3094_v21 = vmul.f32 -1.442695, %v1425_v9 }
0x1445   :  { %3668 = vpow2.f32 %v3093_v20 }
0x1446   :  { %3670 = vpow2.f32 %v3094_v21 }
0x144a   :  { %v3665_v19 = vpop.eup %3664 }
0x144b   :  { %1438 = vrot.lane.b32.xlu0 %v3665_v19, %s3815_s2 }
0x144e   :  { %v3667_v12 = vpop.eup %3666 }
0x144f   :  { %1465 = vrot.lane.b32.xlu1 %v3667_v12, %s3815_s2  ;;  %v3669_v22 = vpop.eup %3668 }
0x1450   :  { %v1429_v23 = vadd.f32 1.0, %v3669_v22  ;;  %v3671_v24 = vpop.eup %3670 }
0x1451   :  { %v1456_v25 = vadd.f32 1.0, %v3671_v24 }
0x1452   :  { %3672 = vrcp.f32 %v1429_v23 }
0x1453   :  { %3674 = vrcp.f32 %v1456_v25  ;;  %v1501_v25 = vld [vmem:[%s4682_s5] sm:$0x3] }
0x145c   :  { %v3673_v26 = vpop.eup %3672 }
0x145d   :  { %v4203_v29 = vpop.eup %3674  ;;  %v1436_v33 = vmul.f32 %v3673_v26, %v1434_v32 }
0x145e   :  { %v1463_v42 = vmul.f32 %v4203_v29, %v1461_v38 }
0x14bd   :  { %v1439_v27 = vpop.permute.xlu0 %1438 }
0x14be   :  { %v1441_v28 = vmul.f32 %v3673_v26, %v1439_v27  ;;  %v1510_v27 = vrot.slane %v1501_v25, %v48_v17 }
0x14c0   :  { %1443 = vrot.lane.b32.xlu0 %v1441_v28, %s3816_s28 }
0x14c1   :  { %v1466_v30 = vpop.permute.xlu1 %1465 }
0x14c2   :  { %v1468_v31 = vmul.f32 %v4203_v29, %v1466_v30 }
0x14c4   :  { %1470 = vrot.lane.b32.xlu1 %v1468_v31, %s3816_s28 }
0x1532   :  { %v1444_v34 = vpop.permute.xlu0 %1443 }
0x1533   :  { %v1446_v39 = vadd.f32 %v1444_v34, %v1436_v33 }
0x1535   :  { %3676 = vtanh.f32 %v1446_v39 }
0x1536   :  { %v1471_v44 = vpop.permute.xlu1 %1470 }
0x1537   :  { %v1473_v37 = vadd.f32 %v1471_v44, %v1463_v42 }
0x1539   :  { %3678 = vtanh.f32 %v1473_v37 }
0x153f   :  { %v3677_v36 = vpop.eup %3676 }
0x1540   :  { %1449 = vrot.lane.b32.xlu0 %v3677_v36, %s3815_s2 }
0x1543   :  { %v3679_v45 = vpop.eup %3678 }
0x1544   :  { %1476 = vrot.lane.b32.xlu1 %v3679_v45, %s3815_s2  ;;  %295 = vrot.lane.b32.xlu0 %v3958_v0, %s3816_s28  ;;  %v3532_v0 = vld [vmem:[%s4680_s4] ss:$8 sps:$4 sm:$0xff]  }
0x1548   :  { %301 = vrot.lane.b32.xlu1 %v3962_v5, %s3815_s2  ;;  %466 = vrot.lane.b32.xlu0 %v3996_v56, %s3816_s28  ;;  %v3534_v5 = vld [vmem:[%s4680_s4 + $0x4] ss:$8 sps:$4 sm:$0xff]   ;;  %v3535_v56 = vld [vmem:[%s4680_s4 + $0x10] ss:$8 sps:$4 sm:$0xff]  }
0x1549   :  { %1557 = vmatprep.subr.bf16.mxu1 %v3534_v5 }
0x154a   :  { %1558 = vmatpush1.bf16.msra.mxu1 %v3532_v0 }
0x154c   :  { %472 = vrot.lane.b32.xlu1 %v4000_v60, %s3815_s2  ;;  %638 = vrot.lane.b32.xlu0 %v4034_v51, %s3816_s28  ;;  %v3537_v60 = vld [vmem:[%s4680_s4 + $0x14] ss:$8 sps:$4 sm:$0xff]   ;;  %v3538_v51 = vld [vmem:[%s4680_s4 + $0x20] ss:$8 sps:$4 sm:$0xff]  }
0x154d   :  { %1559 = vmatprep.subr.bf16.mxu1 %v3537_v60 }
0x154e   :  { %1560 = vmatpush1.bf16.msra.mxu1 %v3535_v56 }
0x1550   :  { %644 = vrot.lane.b32.xlu1 %v4038_v55, %s3815_s2  ;;  %807 = vrot.lane.b32.xlu0 %v4072_v49, %s3816_s28  ;;  %v3540_v55 = vld [vmem:[%s4680_s4 + $0x24] ss:$8 sps:$4 sm:$0xff]  }
0x1551   :  { %v4261_v49 = vld [vmem:[%s4681_s6] sm:$0xff]   ;;  %1561 = vmatprep.subr.bf16.mxu1 %v3540_v55 }
0x1552   :  { %1562 = vmatpush1.bf16.msra.mxu1 %v3538_v51  ;;  %3378 = vmatpush3.bf16.msra.mxu0 %v4261_v49 }
0x1553   :  { %3379 = vmatprep.subr.bf16.mxu0 %v3813_v2 }
0x1554   :  { %813 = vrot.lane.b32.xlu1 %v4076_v48, %s3815_s2  ;;  %975 = vrot.lane.b32.xlu0 %v4110_v46, %s3816_s28  ;;  %v3542_v48 = vld [vmem:[%s4680_s4 + $0x30] ss:$8 sps:$4 sm:$0xff]   ;;  %v3544_v46 = vld [vmem:[%s4680_s4 + $0x34] ss:$8 sps:$4 sm:$0xff]  }
0x1555   :  { %1563 = vmatprep.subr.bf16.mxu1 %v3544_v46 }
0x1556   :  { %1564 = vmatpush1.bf16.msra.mxu1 %v3542_v48 }
0x1557   :  { %3393 = vmatprep.subr.bf16.mxu1 %v3813_v2 }
0x1558   :  { %980 = vrot.lane.b32.xlu1 %v4114_v47, %s3815_s2  ;;  %1144 = vrot.lane.b32.xlu0 %v4148_v43, %s3816_s28  ;;  %v4273_v47 = vld [vmem:[%s4681_s6 + $0x8] sm:$0xff]  }
0x1559   :  { %3380 = vmatpush3.bf16.msra.mxu0 %v4273_v47 }
0x155a   :  { %3385 = vmatprep.subr.bf16.mxu0 %v3813_v2 }
0x155c   :  { %1149 = vrot.lane.b32.xlu1 %v4152_v53, %s3815_s2  ;;  %1314 = vrot.lane.b32.xlu0 %v4185_v41, %s3816_s28  ;;  %v4284_v41 = vld [vmem:[%s4681_s6 + $0x10] sm:$0xff]  }
0x155d   :  { %3382 = vmatmul.mubr.bf16.vlgmr.msra.gmra.mrb[36].mxu0 %v3812_v1 }
0x155e   :  { %3389 = vmatprep.mubr.msk.bf16.mxu0 %vm3814_vm0, %v3813_v2  ;;  %3386 = vmatpush3.bf16.msra.mxu0 %v4284_v41 }
0x155f   :  { %3387 = vmatprep.subr.bf16.mxu0 %v3813_v2 }
0x1560   :  { %1319 = vrot.lane.b32.xlu1 %v4189_v54, %s3815_s2 }
0x1562   :  { %3388 = vmatpush3.bf16.msra.mxu0 %v4294_v52 }
0x1563   :  { %3401 = vmatprep.subr.bf16.mxu0 %v3813_v2 }
0x1565   :  { %3390 = vmatmul.mubr.bf16.vlgmr.msra.gmra.mrb[40].mxu0 %v3812_v1 }
0x1566   :  { %3402 = vmatpush3.bf16.msra.mxu0 %v4284_v41  ;;  %3405 = vmatprep.mubr.msk.bf16.mxu0 %vm3814_vm0, %v3813_v2 }
0x1567   :  { %3403 = vmatprep.subr.bf16.mxu0 %v3813_v2 }
0x156a   :  { %3404 = vmatpush3.bf16.msra.mxu0 %v4294_v52 }
0x156b   :  { %3417 = vmatprep.subr.bf16.mxu0 %v3813_v2 }
0x15b2   :  { %v1450_v43 = vpop.permute.xlu0 %1449 }
0x15b3   :  { %v1452_v53 = vmul.f32 %v3673_v26, %v1450_v43  ;;  %v1506_v26 = vrot.slane %v1501_v25, %v44_v15 }
0x15b5   :  { %1481 = vrot.lane.b32.xlu0 %v1452_v53, %s3816_s28 }
0x15b6   :  { %v1477_v35 = vpop.permute.xlu1 %1476  ;;  %v296_v40 = vpop.permute.xlu0 %295 }
0x15b7   :  { %v1479_v50 = vmul.f32 %v4203_v29, %v1477_v35  ;;  %299 = vst.msk [vmem:[#allocation3] sm:$0x3] %vm298_vm2, %v296_v40 }
0x15b9   :  { %1486 = vrot.lane.b32.xlu1 %v1479_v50, %s3815_s2 }
0x15ba   :  { %v302_v54 = vpop.permute.xlu1 %301  ;;  %v467_v57 = vpop.permute.xlu0 %466 }
0x15bb   :  { %305 = vst.msk [vmem:[#allocation3 + $0x8] sm:$0xc0] %vm304_vm3, %v302_v54 }
0x15bc   :  { %470 = vst.msk [vmem:[#allocation3] sm:$0xc] %vm469_vm4, %v467_v57 }
0x15be   :  { %v473_v58 = vpop.permute.xlu1 %472  ;;  %v639_v59 = vpop.permute.xlu0 %638 }
0x15bf   :  { %476 = vst.msk [vmem:[#allocation3 + $0x8] sm:$0x30] %vm475_vm5, %v473_v58 }
0x15c0   :  { %642 = vst.msk [vmem:[#allocation3] sm:$0x30] %vm641_vm6, %v639_v59 }
0x15c2   :  { %v645_v8 = vpop.permute.xlu1 %644  ;;  %v808_v61 = vpop.permute.xlu0 %807 }
0x15c3   :  { %648 = vst.msk [vmem:[#allocation3 + $0x8] sm:$0xc] %vm647_vm7, %v645_v8 }
0x15c4   :  { %811 = vst.msk [vmem:[#allocation3] sm:$0xc0] %vm810_vm8, %v808_v61 }
0x15c6   :  { %v814_v1 = vpop.permute.xlu1 %813  ;;  %v976_v62 = vpop.permute.xlu0 %975 }
0x15c7   :  { %817 = vst.msk [vmem:[#allocation3 + $0x8] sm:$0x3] %vm816_vm9, %v814_v1 }
0x15c8   :  { %978 = vst.msk [vmem:[#allocation3 + $0x8] sm:$0x3] %vm298_vm2, %v976_v62 }
0x15ca   :  { %v981_v63 = vpop.permute.xlu1 %980  ;;  %v1145_v3 = vpop.permute.xlu0 %1144 }
0x15cb   :  { %983 = vst.msk [vmem:[#allocation3] sm:$0xc0] %vm304_vm3, %v981_v63 }
0x15cc   :  { %1147 = vst.msk [vmem:[#allocation3 + $0x8] sm:$0xc] %vm469_vm4, %v1145_v3 }
0x15ce   :  { %v1150_v4 = vpop.permute.xlu1 %1149  ;;  %v1315_v10 = vpop.permute.xlu0 %1314 }
0x15cf   :  { %1152 = vst.msk [vmem:[#allocation3] sm:$0x30] %vm475_vm5, %v1150_v4 }
0x15d0   :  { %1317 = vst.msk [vmem:[#allocation3 + $0x8] sm:$0x30] %vm641_vm6, %v1315_v10 }
0x15d2   :  { %v1320_v6 = vpop.permute.xlu1 %1319 }
0x15d3   :  { %1322 = vst.msk [vmem:[#allocation3] sm:$0xc] %vm647_vm7, %v1320_v6 }
0x1627   :  { %v1482_v7 = vpop.permute.xlu0 %1481 }
0x1628   :  { %1484 = vst.msk [vmem:[#allocation3 + $0x8] sm:$0xc0] %vm810_vm8, %v1482_v7 }
0x162b   :  { %v1487_v11 = vpop.permute.xlu1 %1486 }
0x162c   :  { %1489 = vst.msk [vmem:[#allocation3] sm:$0x3] %vm816_vm9, %v1487_v11 }
0x162f   :  { %v1491_v13 = vld [vmem:[#allocation3 + $0x8] sm:$0xff] }
0x1630   :  { %v1660_v18 = vpop.f32.mrb[36].mxu0 }
0x1631   :  { %v3383_v19 = vpop.f32.mrb[37].mxu0 }
0x1632   :  { %v1663_v12 = vpop.f32.mrb[38].mxu0 }
0x1633   :  { %v1490_v9 = vld [vmem:[#allocation3] sm:$0xff]  ;;  %v3384_v20 = vpop.f32.mrb[39].mxu0 }
0x1634   :  { %v1492_v16 = vpack.c.bf16 %v1491_v13, %v1490_v9 }
0x1636   :  { %3103 = vmatmul.mubr.msk.bf16.vlgmr.msra.gmra.mrb[32].mxu1 %vm1553_vm10, %v1492_v16 }
0x1637   :  { %3394 = vmatpush3.bf16.msra.mxu1 %v4261_v49  ;;  %3397 = vmatprep.mubr.msk.bf16.mxu1 %vm3814_vm0, %v3813_v2 }
0x1638   :  { %3395 = vmatprep.subr.bf16.mxu1 %v3813_v2  ;;  %v1714_v21 = vpop.f32.mrb[40].mxu0 }
0x1639   :  { %v3391_v22 = vpop.f32.mrb[41].mxu0  ;;  %v1721_v42 = vrot.slane %v1714_v21, 2 }
0x163a   :  { %v1717_v23 = vpop.f32.mrb[42].mxu0 }
0x163b   :  { %3396 = vmatpush3.bf16.msra.mxu1 %v4273_v47  ;;  %v3392_v24 = vpop.f32.mrb[43].mxu0 }
0x163c   :  { %3409 = vmatprep.subr.bf16.mxu1 %v3813_v2 }
0x1709   :  { %v1591_v28 = vpop.f32.mrb[32].mxu1 }
0x170a   :  { %v1592_v29 = vadd.f32 %v1591_v28, %v1506_v26  ;;  %v1593_v30 = vpop.f32.mrb[33].mxu1 }
0x170b   :  { %v1594_v31 = vadd.f32 %v1593_v30, %v1510_v27  ;;  %v1595_v32 = vpop.f32.mrb[34].mxu1 }
0x170c   :  { %1600 = vst [vmem:[#allocation2] sm:$0xff] %v1592_v29  ;;  %v1596_v33 = vadd.f32 %v1595_v32, %v1506_v26  ;;  %v1597_v34 = vpop.f32.mrb[35].mxu1 }
0x170d   :  { %1601 = vst [vmem:[#allocation2 + $0x8] sm:$0xff] %v1594_v31  ;;  %v1598_v38 = vadd.f32 %v1597_v34, %v1510_v27 }
0x170e   :  { %1602 = vst [vmem:[#allocation2 + $0x10] sm:$0xff] %v1596_v33 }
0x170f   :  { %1603 = vst [vmem:[#allocation2 + $0x18] sm:$0xff] %v1598_v38 }
0x1713   :  { %v1613_v39 = vld [vmem:[#allocation2] sm:$0x3]  ;;  %v1782_v16 = vld [vmem:[#allocation2] sm:$0xc] }
0x1714   :  { %v1666_v44 = vadd.f32 %v1660_v18, %v1613_v39 }
0x1716   :  { %3680 = vtanh.f32 %v1666_v44  ;;  %v1667_v15 = vld [vmem:[#allocation2 + $0x18] sm:$0xc0]  ;;  %v3112_v36 = vmul.f32 -1.442695, %v1666_v44  ;;  %v1834_v23 = vld [vmem:[#allocation2 + $0x18] sm:$0x30] }
0x1717   :  { %v1723_v37 = vadd.f32 %v1721_v42, %v1667_v15 }
0x1719   :  { %3682 = vtanh.f32 %v1723_v37  ;;  %v3113_v45 = vmul.f32 -1.442695, %v1723_v37 }
0x171a   :  { %3684 = vpow2.f32 %v3112_v36 }
0x171b   :  { %3686 = vpow2.f32 %v3113_v45 }
0x1720   :  { %v3681_v14 = vpop.eup %3680 }
0x1721   :  { %1733 = vrot.lane.b32.xlu0 %v3681_v14, %s3815_s2 }
0x1723   :  { %v3683_v17 = vpop.eup %3682 }
0x1724   :  { %1757 = vrot.lane.b32.xlu1 %v3683_v17, %s3815_s2  ;;  %v3685_v0 = vpop.eup %3684 }
0x1725   :  { %v3687_v5 = vpop.eup %3686  ;;  %v1727_v56 = vadd.f32 1.0, %v3685_v0 }
0x1726   :  { %v1751_v60 = vadd.f32 1.0, %v3687_v5 }
0x1727   :  { %3688 = vrcp.f32 %v1727_v56 }
0x1728   :  { %3690 = vrcp.f32 %v1751_v60 }
0x1731   :  { %v3689_v51 = vpop.eup %3688 }
0x1732   :  { %v3691_v46 = vpop.eup %3690  ;;  %v1731_v35 = vmul.f32 0.0, %v3689_v51 }
0x1733   :  { %v1755_v54 = vmul.f32 0.0, %v3691_v46 }
0x1793   :  { %v1734_v55 = vpop.permute.xlu0 %1733 }
0x1794   :  { %v1736_v48 = vmul.f32 %v3689_v51, %v1734_v55 }
0x1796   :  { %v1758_v43 = vpop.permute.xlu1 %1757  ;;  %1738 = vrot.lane.b32.xlu0 %v1736_v48, %s3816_s28 }
0x1797   :  { %v1760_v53 = vmul.f32 %v3691_v46, %v1758_v43 }
0x1799   :  { %1762 = vrot.lane.b32.xlu1 %v1760_v53, %s3816_s28 }
0x1808   :  { %v1739_v40 = vpop.permute.xlu0 %1738 }
0x1809   :  { %v4340_v50 = vadd.f32 %v1739_v40, %v1731_v35 }
0x180b   :  { %3692 = vtanh.f32 %v4340_v50  ;;  %v1763_v57 = vpop.permute.xlu1 %1762  ;;  %v1895_v14 = vrot.slane %v4340_v50, 6 }
0x180c   :  { %v4343_v58 = vadd.f32 %v1763_v57, %v1755_v54 }
0x180e   :  { %3694 = vtanh.f32 %v4343_v58  ;;  %v1922_v0 = vrot.slane %v4343_v58, 2 }
0x1815   :  { %v3693_v59 = vpop.eup %3692 }
0x1816   :  { %1744 = vrot.lane.b32.xlu0 %v3693_v59, %s3815_s2 }
0x1818   :  { %v3695_v8 = vpop.eup %3694 }
0x1819   :  { %1768 = vrot.lane.b32.xlu1 %v3695_v8, %s3815_s2 }
0x1888   :  { %v1745_v61 = vpop.permute.xlu0 %1744 }
0x1889   :  { %v4348_v1 = vmul.f32 %v3689_v51, %v1745_v61 }
0x188b   :  { %v1783_v62 = vpack.c.bf16 %v4348_v1, %v4348_v1  ;;  %v1769_v63 = vpop.permute.xlu1 %1768 }
0x188c   :  { %v4352_v3 = vmul.f32 %v3691_v46, %v1769_v63 }
0x188d   :  { %1785 = vrot.lane.b32.xlu0 %v1783_v62, %s3816_s28  ;;  %v1951_v62 = vld [vmem:[#allocation2] sm:$0x30] }
0x188e   :  { %v1835_v4 = vpack.c.bf16 %v4352_v3, %v4352_v3 }
0x1890   :  { %v1837_v10 = vrot.slane %v1835_v4, 3 }
0x1892   :  { %1838 = vrot.lane.b32.xlu1 %v1837_v10, %s3816_s28 }
0x18ff   :  { %v1786_v6 = vpop.permute.xlu0 %1785 }
0x1900   :  { %3398 = vmatmul.mubr.msk.bf16.vlgmr.msra.gmra.mrb[36].mxu1 %vm72_vm1, %v1786_v6 }
0x1901   :  { %3410 = vmatpush3.bf16.msra.mxu1 %v4261_v49  ;;  %3413 = vmatprep.mubr.msk.bf16.mxu1 %vm3814_vm0, %v3813_v2 }
0x1902   :  { %3411 = vmatprep.subr.bf16.mxu1 %v3813_v2 }
0x1904   :  { %v1839_v7 = vpop.permute.xlu1 %1838 }
0x1905   :  { %3406 = vmatmul.mubr.msk.bf16.vlgmr.msra.gmra.mrb[44].mxu0 %vm72_vm1, %v1839_v7  ;;  %3412 = vmatpush3.bf16.msra.mxu1 %v4273_v47 }
0x1906   :  { %3418 = vmatpush3.bf16.msra.mxu0 %v4284_v41  ;;  %3421 = vmatprep.mubr.msk.bf16.mxu0 %vm3814_vm0, %v3813_v2 }
0x1907   :  { %3419 = vmatprep.subr.bf16.mxu0 %v3813_v2  ;;  %3425 = vmatprep.subr.bf16.mxu1 %v3813_v2 }
0x190a   :  { %3420 = vmatpush3.bf16.msra.mxu0 %v4294_v52 }
0x190b   :  { %3433 = vmatprep.subr.bf16.mxu0 %v3813_v2 }
0x19d3   :  { %v1824_v11 = vpop.f32.mrb[36].mxu1 }
0x19d4   :  { %v1831_v9 = vrot.slane %v1824_v11, 6  ;;  %v3399_v13 = vpop.f32.mrb[37].mxu1 }
0x19d5   :  { %v1827_v18 = vpop.f32.mrb[38].mxu1 }
0x19d6   :  { %v1833_v19 = vadd.f32 %v1831_v9, %v1782_v16  ;;  %v3400_v12 = vpop.f32.mrb[39].mxu1  ;;  %v2004_v9 = vld [vmem:[#allocation2 + $0x18] sm:$0xc] }
0x19d8   :  { %3696 = vtanh.f32 %v1833_v19  ;;  %v1877_v20 = vpop.f32.mrb[44].mxu0  ;;  %v3116_v29 = vmul.f32 -1.442695, %v1833_v19 }
0x19d9   :  { %v1884_v21 = vrot.slane %v1877_v20, 4  ;;  %v3407_v22 = vpop.f32.mrb[45].mxu0 }
0x19da   :  { %v1880_v24 = vpop.f32.mrb[46].mxu0 }
0x19db   :  { %v1886_v25 = vadd.f32 %v1884_v21, %v1834_v23  ;;  %v3408_v26 = vpop.f32.mrb[47].mxu0 }
0x19dd   :  { %3698 = vtanh.f32 %v1886_v25  ;;  %v3117_v30 = vmul.f32 -1.442695, %v1886_v25 }
0x19de   :  { %3700 = vpow2.f32 %v3116_v29 }
0x19df   :  { %3702 = vpow2.f32 %v3117_v30 }
0x19e2   :  { %v3697_v27 = vpop.eup %3696 }
0x19e3   :  { %1899 = vrot.lane.b32.xlu0 %v3697_v27, %s3815_s2 }
0x19e7   :  { %v3699_v28 = vpop.eup %3698 }
0x19e8   :  { %1926 = vrot.lane.b32.xlu1 %v3699_v28, %s3815_s2  ;;  %v3701_v31 = vpop.eup %3700 }
0x19e9   :  { %v1890_v32 = vadd.f32 1.0, %v3701_v31  ;;  %v3703_v33 = vpop.eup %3702 }
0x19ea   :  { %v1917_v34 = vadd.f32 1.0, %v3703_v33 }
0x19eb   :  { %3704 = vrcp.f32 %v1890_v32 }
0x19ec   :  { %3706 = vrcp.f32 %v1917_v34 }
0x19f5   :  { %v3705_v38 = vpop.eup %3704 }
0x19f6   :  { %v3707_v44 = vpop.eup %3706  ;;  %v1897_v17 = vmul.f32 %v3705_v38, %v1895_v14 }
0x19f7   :  { %v1924_v5 = vmul.f32 %v3707_v44, %v1922_v0 }
0x1a55   :  { %v1900_v39 = vpop.permute.xlu0 %1899 }
0x1a56   :  { %v1902_v42 = vmul.f32 %v3705_v38, %v1900_v39 }
0x1a58   :  { %1904 = vrot.lane.b32.xlu0 %v1902_v42, %s3816_s28 }
0x1a5a   :  { %v1927_v15 = vpop.permute.xlu1 %1926 }
0x1a5b   :  { %v1929_v37 = vmul.f32 %v3707_v44, %v1927_v15 }
0x1a5d   :  { %1931 = vrot.lane.b32.xlu1 %v1929_v37, %s3816_s28 }
0x1aca   :  { %v1905_v36 = vpop.permute.xlu0 %1904 }
0x1acb   :  { %v4377_v45 = vadd.f32 %v1905_v36, %v1897_v17 }
0x1acd   :  { %3708 = vtanh.f32 %v4377_v45  ;;  %v2065_v32 = vrot.slane %v4377_v45, 6 }
0x1acf   :  { %v1932_v56 = vpop.permute.xlu1 %1931 }
0x1ad0   :  { %v4381_v60 = vadd.f32 %v1932_v56, %v1924_v5 }
0x1ad2   :  { %3710 = vtanh.f32 %v4381_v60  ;;  %v2092_v39 = vrot.slane %v4381_v60, 2 }
0x1ad7   :  { %v3709_v51 = vpop.eup %3708 }
0x1ad8   :  { %1910 = vrot.lane.b32.xlu0 %v3709_v51, %s3815_s2 }
0x1adc   :  { %v3711_v55 = vpop.eup %3710 }
0x1add   :  { %1937 = vrot.lane.b32.xlu1 %v3711_v55, %s3815_s2 }
0x1b4a   :  { %v1911_v48 = vpop.permute.xlu0 %1910 }
0x1b4b   :  { %v4386_v46 = vmul.f32 %v3705_v38, %v1911_v48 }
0x1b4d   :  { %v1952_v43 = vpack.c.bf16 %v4386_v46, %v4386_v46 }
0x1b4f   :  { %v1954_v53 = vrot.slane %v1952_v43, 1  ;;  %v1938_v35 = vpop.permute.xlu1 %1937 }
0x1b50   :  { %v4390_v40 = vmul.f32 %v3707_v44, %v1938_v35 }
0x1b51   :  { %1955 = vrot.lane.b32.xlu0 %v1954_v53, %s3816_s28 }
0x1b52   :  { %v2005_v50 = vpack.c.bf16 %v4390_v40, %v4390_v40 }
0x1b54   :  { %v2007_v54 = vrot.slane %v2005_v50, 2  ;;  %v2121_v50 = vld [vmem:[#allocation2] sm:$0xc0] }
0x1b56   :  { %2008 = vrot.lane.b32.xlu1 %v2007_v54, %s3816_s28 }
0x1bc3   :  { %v1956_v57 = vpop.permute.xlu0 %1955 }
0x1bc4   :  { %3414 = vmatmul.mubr.msk.bf16.vlgmr.msra.gmra.mrb[40].mxu1 %vm72_vm1, %v1956_v57 }
0x1bc5   :  { %3426 = vmatpush3.bf16.msra.mxu1 %v4261_v49  ;;  %3429 = vmatprep.mubr.msk.bf16.mxu1 %vm3814_vm0, %v3813_v2 }
0x1bc6   :  { %3427 = vmatprep.subr.bf16.mxu1 %v3813_v2 }
0x1bc8   :  { %v2009_v58 = vpop.permute.xlu1 %2008 }
0x1bc9   :  { %3422 = vmatmul.mubr.msk.bf16.vlgmr.msra.gmra.mrb[48].mxu0 %vm72_vm1, %v2009_v58  ;;  %3428 = vmatpush3.bf16.msra.mxu1 %v4273_v47 }
0x1bca   :  { %3434 = vmatpush3.bf16.msra.mxu0 %v4284_v41  ;;  %3437 = vmatprep.mubr.msk.bf16.mxu0 %vm3814_vm0, %v3813_v2 }
0x1bcb   :  { %3435 = vmatprep.subr.bf16.mxu0 %v3813_v2  ;;  %3441 = vmatprep.subr.bf16.mxu1 %v3813_v2 }
0x1bce   :  { %3436 = vmatpush3.bf16.msra.mxu0 %v4294_v52 }
0x1bcf   :  { %3449 = vmatprep.subr.bf16.mxu0 %v3813_v2 }
0x1c97   :  { %v1994_v59 = vpop.f32.mrb[40].mxu1 }
0x1c98   :  { %v2001_v8 = vrot.slane %v1994_v59, 4  ;;  %v3415_v61 = vpop.f32.mrb[41].mxu1  ;;  %v2174_v59 = vld [vmem:[#allocation2 + $0x18] sm:$0x3] }
0x1c99   :  { %v1997_v63 = vpop.f32.mrb[42].mxu1 }
0x1c9a   :  { %v2003_v4 = vadd.f32 %v2001_v8, %v1951_v62  ;;  %v3416_v10 = vpop.f32.mrb[43].mxu1 }
0x1c9c   :  { %3712 = vtanh.f32 %v2003_v4  ;;  %v2047_v6 = vpop.f32.mrb[48].mxu0  ;;  %v3120_v20 = vmul.f32 -1.442695, %v2003_v4 }
0x1c9d   :  { %v2054_v7 = vrot.slane %v2047_v6, 6  ;;  %v3423_v11 = vpop.f32.mrb[49].mxu0 }
0x1c9e   :  { %v2050_v13 = vpop.f32.mrb[50].mxu0 }
0x1c9f   :  { %v2056_v16 = vadd.f32 %v2054_v7, %v2004_v9  ;;  %v3424_v18 = vpop.f32.mrb[51].mxu0 }
0x1ca1   :  { %3714 = vtanh.f32 %v2056_v16  ;;  %v3121_v21 = vmul.f32 -1.442695, %v2056_v16 }
0x1ca2   :  { %3716 = vpow2.f32 %v3120_v20 }
0x1ca3   :  { %3718 = vpow2.f32 %v3121_v21 }
0x1ca6   :  { %v3713_v19 = vpop.eup %3712 }
0x1ca7   :  { %2069 = vrot.lane.b32.xlu0 %v3713_v19, %s3815_s2 }
0x1cab   :  { %v3715_v12 = vpop.eup %3714 }
0x1cac   :  { %2096 = vrot.lane.b32.xlu1 %v3715_v12, %s3815_s2  ;;  %v3717_v22 = vpop.eup %3716 }
0x1cad   :  { %v2060_v23 = vadd.f32 1.0, %v3717_v22  ;;  %v3719_v24 = vpop.eup %3718 }
0x1cae   :  { %v2087_v25 = vadd.f32 1.0, %v3719_v24 }
0x1caf   :  { %3720 = vrcp.f32 %v2060_v23 }
0x1cb0   :  { %3722 = vrcp.f32 %v2087_v25 }
0x1cb9   :  { %v3721_v26 = vpop.eup %3720 }
0x1cba   :  { %v3723_v29 = vpop.eup %3722  ;;  %v2067_v33 = vmul.f32 %v3721_v26, %v2065_v32 }
0x1cbb   :  { %v2094_v42 = vmul.f32 %v3723_v29, %v2092_v39 }
0x1d19   :  { %v2070_v27 = vpop.permute.xlu0 %2069 }
0x1d1a   :  { %v2072_v28 = vmul.f32 %v3721_v26, %v2070_v27 }
0x1d1c   :  { %2074 = vrot.lane.b32.xlu0 %v2072_v28, %s3816_s28 }
0x1d1e   :  { %v2097_v30 = vpop.permute.xlu1 %2096 }
0x1d1f   :  { %v2099_v31 = vmul.f32 %v3723_v29, %v2097_v30 }
0x1d21   :  { %2101 = vrot.lane.b32.xlu1 %v2099_v31, %s3816_s28 }
0x1d8e   :  { %v2075_v34 = vpop.permute.xlu0 %2074 }
0x1d8f   :  { %v4415_v38 = vadd.f32 %v2075_v34, %v2067_v33 }
0x1d91   :  { %3724 = vtanh.f32 %v4415_v38  ;;  %v2232_v24 = vrot.slane %v4415_v38, 6 }
0x1d93   :  { %v2102_v44 = vpop.permute.xlu1 %2101 }
0x1d94   :  { %v4419_v15 = vadd.f32 %v2102_v44, %v2094_v42 }
0x1d96   :  { %3726 = vtanh.f32 %v4419_v15 }
0x1d9b   :  { %v3725_v37 = vpop.eup %3724 }
0x1d9c   :  { %2080 = vrot.lane.b32.xlu0 %v3725_v37, %s3815_s2 }
0x1da0   :  { %v3727_v14 = vpop.eup %3726 }
0x1da1   :  { %2107 = vrot.lane.b32.xlu1 %v3727_v14, %s3815_s2 }
0x1e0e   :  { %v2081_v17 = vpop.permute.xlu0 %2080 }
0x1e0f   :  { %v4424_v36 = vmul.f32 %v3721_v26, %v2081_v17  ;;  %v2259_v26 = vrot.slane %v4419_v15, 2 }
0x1e11   :  { %v2122_v45 = vpack.c.bf16 %v4424_v36, %v4424_v36 }
0x1e13   :  { %v2124_v0 = vrot.slane %v2122_v45, 2  ;;  %v2108_v5 = vpop.permute.xlu1 %2107  ;;  %v2288_v45 = vld [vmem:[#allocation2 + $0x10] sm:$0x3] }
0x1e14   :  { %v4428_v56 = vmul.f32 %v3723_v29, %v2108_v5 }
0x1e15   :  { %2125 = vrot.lane.b32.xlu0 %v2124_v0, %s3816_s28 }
0x1e16   :  { %v2175_v60 = vpack.c.bf16 %v4428_v56, %v4428_v56 }
0x1e18   :  { %v2177_v51 = vrot.slane %v2175_v60, 1 }
0x1e1a   :  { %2178 = vrot.lane.b32.xlu1 %v2177_v51, %s3816_s28 }
0x1e87   :  { %v2126_v55 = vpop.permute.xlu0 %2125 }
0x1e88   :  { %3430 = vmatmul.mubr.msk.bf16.vlgmr.msra.gmra.mrb[44].mxu1 %vm72_vm1, %v2126_v55 }
0x1e89   :  { %3442 = vmatpush3.bf16.msra.mxu1 %v4261_v49  ;;  %3445 = vmatprep.mubr.msk.bf16.mxu1 %vm3814_vm0, %v3813_v2 }
0x1e8a   :  { %3443 = vmatprep.subr.bf16.mxu1 %v3813_v2 }
0x1e8c   :  { %v2179_v48 = vpop.permute.xlu1 %2178 }
0x1e8d   :  { %3438 = vmatmul.mubr.msk.bf16.vlgmr.msra.gmra.mrb[52].mxu0 %vm72_vm1, %v2179_v48  ;;  %3444 = vmatpush3.bf16.msra.mxu1 %v4273_v47 }
0x1e8e   :  { %3450 = vmatpush3.bf16.msra.mxu0 %v4284_v41  ;;  %3453 = vmatprep.mubr.msk.bf16.mxu0 %vm3814_vm0, %v3813_v2 }
0x1e8f   :  { %3451 = vmatprep.subr.bf16.mxu0 %v3813_v2  ;;  %3457 = vmatprep.subr.bf16.mxu1 %v3813_v2 }
0x1e92   :  { %3452 = vmatpush3.bf16.msra.mxu0 %v4294_v52 }
0x1e93   :  { %3465 = vmatprep.subr.bf16.mxu0 %v3813_v2 }
0x1f5b   :  { %v2164_v43 = vpop.f32.mrb[44].mxu1 }
0x1f5c   :  { %v2171_v53 = vrot.slane %v2164_v43, 2  ;;  %v3431_v35 = vpop.f32.mrb[45].mxu1 }
0x1f5d   :  { %v2167_v54 = vpop.f32.mrb[46].mxu1 }
0x1f5e   :  { %v2173_v57 = vadd.f32 %v2171_v53, %v2121_v50  ;;  %v3432_v58 = vpop.f32.mrb[47].mxu1  ;;  %v2338_v53 = vld [vmem:[#allocation2 + $0x8] sm:$0xc0] }
0x1f60   :  { %3728 = vtanh.f32 %v2173_v57  ;;  %v2217_v8 = vpop.f32.mrb[52].mxu0  ;;  %v3124_v7 = vmul.f32 -1.442695, %v2173_v57 }
0x1f61   :  { %v2223_v61 = vadd.f32 %v2217_v8, %v2174_v59  ;;  %v3439_v62 = vpop.f32.mrb[53].mxu0 }
0x1f62   :  { %v2220_v63 = vpop.f32.mrb[54].mxu0 }
0x1f63   :  { %3730 = vtanh.f32 %v2223_v61  ;;  %v3440_v4 = vpop.f32.mrb[55].mxu0  ;;  %v3125_v11 = vmul.f32 -1.442695, %v2223_v61 }
0x1f64   :  { %3732 = vpow2.f32 %v3124_v7 }
0x1f65   :  { %3734 = vpow2.f32 %v3125_v11 }
0x1f6a   :  { %v3729_v10 = vpop.eup %3728 }
0x1f6b   :  { %2236 = vrot.lane.b32.xlu0 %v3729_v10, %s3815_s2 }
0x1f6d   :  { %v3731_v6 = vpop.eup %3730 }
0x1f6e   :  { %2263 = vrot.lane.b32.xlu1 %v3731_v6, %s3815_s2  ;;  %v3733_v9 = vpop.eup %3732 }
0x1f6f   :  { %v3735_v13 = vpop.eup %3734  ;;  %v2227_v16 = vadd.f32 1.0, %v3733_v9 }
0x1f70   :  { %v2254_v18 = vadd.f32 1.0, %v3735_v13 }
0x1f71   :  { %3736 = vrcp.f32 %v2227_v16 }
0x1f72   :  { %3738 = vrcp.f32 %v2254_v18 }
0x1f7b   :  { %v3737_v19 = vpop.eup %3736 }
0x1f7c   :  { %v3739_v21 = vpop.eup %3738  ;;  %v2234_v25 = vmul.f32 %v3737_v19, %v2232_v24 }
0x1f7d   :  { %v2261_v29 = vmul.f32 %v3739_v21, %v2259_v26 }
0x1fdd   :  { %v2237_v12 = vpop.permute.xlu0 %2236 }
0x1fde   :  { %v2239_v20 = vmul.f32 %v3737_v19, %v2237_v12 }
0x1fe0   :  { %v2264_v22 = vpop.permute.xlu1 %2263  ;;  %2241 = vrot.lane.b32.xlu0 %v2239_v20, %s3816_s28 }
0x1fe1   :  { %v2266_v23 = vmul.f32 %v3739_v21, %v2264_v22 }
0x1fe3   :  { %2268 = vrot.lane.b32.xlu1 %v2266_v23, %s3816_s28 }
0x2052   :  { %v2242_v27 = vpop.permute.xlu0 %2241 }
0x2053   :  { %v4454_v28 = vadd.f32 %v2242_v27, %v2234_v25 }
0x2055   :  { %3740 = vtanh.f32 %v4454_v28  ;;  %v2269_v30 = vpop.permute.xlu1 %2268  ;;  %v2398_v18 = vrot.slane %v4454_v28, 6 }
0x2056   :  { %v4457_v31 = vadd.f32 %v2269_v30, %v2261_v29 }
0x2058   :  { %3742 = vtanh.f32 %v4457_v31  ;;  %v2425_v12 = vrot.slane %v4457_v31, 2 }
0x205f   :  { %v3741_v32 = vpop.eup %3740 }
0x2060   :  { %2247 = vrot.lane.b32.xlu0 %v3741_v32, %s3815_s2 }
0x2062   :  { %v3743_v33 = vpop.eup %3742 }
0x2063   :  { %2274 = vrot.lane.b32.xlu1 %v3743_v33, %s3815_s2 }
0x20d2   :  { %v2248_v34 = vpop.permute.xlu0 %2247 }
0x20d3   :  { %v4462_v38 = vmul.f32 %v3737_v19, %v2248_v34 }
0x20d5   :  { %v2289_v39 = vpack.c.bf16 %v4462_v38, %v4462_v38  ;;  %v2275_v42 = vpop.permute.xlu1 %2274 }
0x20d6   :  { %v4466_v44 = vmul.f32 %v3739_v21, %v2275_v42 }
0x20d7   :  { %v2291_v15 = vrot.slane %v2289_v39, 3 }
0x20d8   :  { %v2339_v37 = vpack.c.bf16 %v4466_v44, %v4466_v44 }
0x20d9   :  { %2292 = vrot.lane.b32.xlu1 %v2291_v15, %s3816_s28 }
0x20da   :  { %2341 = vrot.lane.b32.xlu0 %v2339_v37, %s3816_s28  ;;  %v2454_v37 = vld [vmem:[#allocation2 + $0x10] sm:$0xc] }
0x214b   :  { %v2293_v14 = vpop.permute.xlu1 %2292 }
0x214c   :  { %3446 = vmatmul.mubr.msk.bf16.vlgmr.msra.gmra.mrb[48].mxu1 %vm72_vm1, %v2293_v14  ;;  %v2342_v17 = vpop.permute.xlu0 %2341 }
0x214d   :  { %3454 = vmatmul.mubr.msk.bf16.vlgmr.msra.gmra.mrb[56].mxu0 %vm72_vm1, %v2342_v17  ;;  %3458 = vmatpush3.bf16.msra.mxu1 %v4261_v49 }
0x214e   :  { %3459 = vmatprep.subr.bf16.mxu1 %v3813_v2  ;;  %3466 = vmatpush3.bf16.msra.mxu0 %v4284_v41 }
0x214f   :  { %3461 = vmatprep.mubr.msk.bf16.mxu1 %vm3814_vm0, %v3813_v2  ;;  %3467 = vmatprep.subr.bf16.mxu0 %v3813_v2 }
0x2150   :  { %3469 = vmatprep.mubr.msk.bf16.mxu0 %vm3814_vm0, %v3813_v2 }
0x2151   :  { %3460 = vmatpush3.bf16.msra.mxu1 %v4273_v47 }
0x2152   :  { %3468 = vmatpush3.bf16.msra.mxu0 %v4294_v52  ;;  %3473 = vmatprep.subr.bf16.mxu1 %v3813_v2 }
0x2153   :  { %3481 = vmatprep.subr.bf16.mxu0 %v3813_v2 }
0x221f   :  { %v2331_v0 = vpop.f32.mrb[48].mxu1 }
0x2220   :  { %v2337_v5 = vadd.f32 %v2331_v0, %v2288_v45  ;;  %v3447_v60 = vpop.f32.mrb[49].mxu1  ;;  %v2380_v51 = vpop.f32.mrb[56].mxu0 }
0x2221   :  { %v2387_v55 = vrot.slane %v2380_v51, 2  ;;  %v2334_v48 = vpop.f32.mrb[50].mxu1  ;;  %v3455_v43 = vpop.f32.mrb[57].mxu0 }
0x2222   :  { %3744 = vtanh.f32 %v2337_v5  ;;  %v3448_v35 = vpop.f32.mrb[51].mxu1  ;;  %v2383_v50 = vpop.f32.mrb[58].mxu0  ;;  %v3128_v8 = vmul.f32 -1.442695, %v2337_v5  ;;  %v2506_v5 = vld [vmem:[#allocation2 + $0x8] sm:$0x30] }
0x2223   :  { %v2389_v54 = vadd.f32 %v2387_v55, %v2338_v53  ;;  %v3456_v57 = vpop.f32.mrb[59].mxu0 }
0x2225   :  { %3746 = vtanh.f32 %v2389_v54  ;;  %v3129_v61 = vmul.f32 -1.442695, %v2389_v54 }
0x2226   :  { %3748 = vpow2.f32 %v3128_v8 }
0x2227   :  { %3750 = vpow2.f32 %v3129_v61 }
0x222c   :  { %v3745_v58 = vpop.eup %3744 }
0x222d   :  { %2402 = vrot.lane.b32.xlu0 %v3745_v58, %s3815_s2 }
0x222f   :  { %v3747_v59 = vpop.eup %3746 }
0x2230   :  { %2429 = vrot.lane.b32.xlu1 %v3747_v59, %s3815_s2  ;;  %v3749_v62 = vpop.eup %3748 }
0x2231   :  { %v3751_v63 = vpop.eup %3750  ;;  %v2393_v4 = vadd.f32 1.0, %v3749_v62 }
0x2232   :  { %v2420_v10 = vadd.f32 1.0, %v3751_v63 }
0x2233   :  { %3752 = vrcp.f32 %v2393_v4 }
0x2234   :  { %3754 = vrcp.f32 %v2420_v10 }
0x223d   :  { %v3753_v6 = vpop.eup %3752 }
0x223e   :  { %v3755_v9 = vpop.eup %3754  ;;  %v2400_v19 = vmul.f32 %v3753_v6, %v2398_v18 }
0x223f   :  { %v2427_v22 = vmul.f32 %v3755_v9, %v2425_v12 }
0x229f   :  { %v2403_v7 = vpop.permute.xlu0 %2402 }
0x22a0   :  { %v2405_v11 = vmul.f32 %v3753_v6, %v2403_v7 }
0x22a2   :  { %v2430_v13 = vpop.permute.xlu1 %2429  ;;  %2407 = vrot.lane.b32.xlu0 %v2405_v11, %s3816_s28 }
0x22a3   :  { %v2432_v16 = vmul.f32 %v3755_v9, %v2430_v13 }
0x22a5   :  { %2434 = vrot.lane.b32.xlu1 %v2432_v16, %s3816_s28 }
0x2314   :  { %v2408_v20 = vpop.permute.xlu0 %2407 }
0x2315   :  { %v4492_v21 = vadd.f32 %v2408_v20, %v2400_v19 }
0x2317   :  { %3756 = vtanh.f32 %v4492_v21  ;;  %v2435_v23 = vpop.permute.xlu1 %2434  ;;  %v2567_v4 = vrot.slane %v4492_v21, 6 }
0x2318   :  { %v4495_v24 = vadd.f32 %v2435_v23, %v2427_v22 }
0x231a   :  { %3758 = vtanh.f32 %v4495_v24  ;;  %v2594_v11 = vrot.slane %v4495_v24, 2 }
0x2321   :  { %v3757_v25 = vpop.eup %3756 }
0x2322   :  { %2413 = vrot.lane.b32.xlu0 %v3757_v25, %s3815_s2 }
0x2324   :  { %v3759_v26 = vpop.eup %3758 }
0x2325   :  { %2440 = vrot.lane.b32.xlu1 %v3759_v26, %s3815_s2 }
0x2394   :  { %v2414_v27 = vpop.permute.xlu0 %2413 }
0x2395   :  { %v4500_v28 = vmul.f32 %v3753_v6, %v2414_v27 }
0x2397   :  { %v2455_v29 = vpack.c.bf16 %v4500_v28, %v4500_v28  ;;  %v2441_v30 = vpop.permute.xlu1 %2440 }
0x2398   :  { %v4504_v31 = vmul.f32 %v3755_v9, %v2441_v30 }
0x2399   :  { %2457 = vrot.lane.b32.xlu0 %v2455_v29, %s3816_s28  ;;  %v3808_v29 = vld [vmem:[%s4681_s6] sm:$0xff]  }
0x239a   :  { %v2507_v32 = vpack.c.bf16 %v4504_v31, %v4504_v31 }
0x239c   :  { %v2509_v33 = vrot.slane %v2507_v32, 3  ;;  %v3809_v32 = vld [vmem:[%s4681_s6 + $0x8] sm:$0xff]  }
0x239e   :  { %2510 = vrot.lane.b32.xlu1 %v2509_v33, %s3816_s28  ;;  %v3810_v33 = vld [vmem:[%s4681_s6 + $0x10] sm:$0xff]  }
0x240b   :  { %v2458_v34 = vpop.permute.xlu0 %2457 }
0x240c   :  { %3462 = vmatmul.mubr.msk.bf16.vlgmr.msra.gmra.mrb[52].mxu1 %vm72_vm1, %v2458_v34  ;;  %v3811_v34 = vld [vmem:[%s4681_s6 + $0x18] sm:$0xff]  }
0x240d   :  { %3474 = vmatpush3.bf16.msra.mxu1 %v4261_v49  ;;  %3477 = vmatprep.mubr.msk.bf16.mxu1 %vm3814_vm0, %v3813_v2 }
0x240e   :  { %3475 = vmatprep.subr.bf16.mxu1 %v3813_v2 }
0x2410   :  { %v2511_v39 = vpop.permute.xlu1 %2510 }
0x2411   :  { %3470 = vmatmul.mubr.msk.bf16.vlgmr.msra.gmra.mrb[60].mxu0 %vm72_vm1, %v2511_v39  ;;  %3476 = vmatpush3.bf16.msra.mxu1 %v4273_v47 }
0x2412   :  { %3482 = vmatpush3.bf16.msra.mxu0 %v4284_v41  ;;  %3485 = vmatprep.mubr.msk.bf16.mxu0 %vm3814_vm0, %v3813_v2 }
0x2413   :  { %3483 = vmatprep.subr.bf16.mxu0 %v3813_v2  ;;  %3489 = vmatprep.subr.bf16.mxu1 %v3813_v2 }
0x2416   :  { %3484 = vmatpush3.bf16.msra.mxu0 %v4294_v52 }
0x2417   :  { %3497 = vmatprep.subr.bf16.mxu0 %v3813_v2 }
0x24df   :  { %v2496_v49 = vpop.f32.mrb[52].mxu1 }
0x24e0   :  { %v2503_v42 = vrot.slane %v2496_v49, 6  ;;  %v3463_v15 = vpop.f32.mrb[53].mxu1 }
0x24e1   :  { %v2499_v14 = vpop.f32.mrb[54].mxu1  ;;  %v2623_v15 = vld [vmem:[#allocation2 + $0x10] sm:$0x30] }
0x24e2   :  { %v2505_v17 = vadd.f32 %v2503_v42, %v2454_v37  ;;  %v3464_v47 = vpop.f32.mrb[55].mxu1 }
0x24e4   :  { %3760 = vtanh.f32 %v2505_v17  ;;  %v2549_v41 = vpop.f32.mrb[60].mxu0  ;;  %v3132_v43 = vmul.f32 -1.442695, %v2505_v17 }
0x24e5   :  { %v2556_v45 = vrot.slane %v2549_v41, 4  ;;  %v3471_v0 = vpop.f32.mrb[61].mxu0 }
0x24e6   :  { %v2552_v60 = vpop.f32.mrb[62].mxu0  ;;  %v2676_v0 = vld [vmem:[#allocation2 + $0x8] sm:$0xc] }
0x24e7   :  { %v2558_v51 = vadd.f32 %v2556_v45, %v2506_v5  ;;  %v3472_v55 = vpop.f32.mrb[63].mxu0 }
0x24e9   :  { %3762 = vtanh.f32 %v2558_v51  ;;  %v3133_v53 = vmul.f32 -1.442695, %v2558_v51 }
0x24ea   :  { %3764 = vpow2.f32 %v3132_v43 }
0x24eb   :  { %3766 = vpow2.f32 %v3133_v53 }
0x24ee   :  { %v3761_v48 = vpop.eup %3760 }
0x24ef   :  { %2571 = vrot.lane.b32.xlu0 %v3761_v48, %s3815_s2 }
0x24f3   :  { %v3763_v52 = vpop.eup %3762 }
0x24f4   :  { %2598 = vrot.lane.b32.xlu1 %v3763_v52, %s3815_s2  ;;  %v3765_v35 = vpop.eup %3764 }
0x24f5   :  { %v2562_v50 = vadd.f32 1.0, %v3765_v35  ;;  %v3767_v54 = vpop.eup %3766 }
0x24f6   :  { %v2589_v57 = vadd.f32 1.0, %v3767_v54 }
0x24f7   :  { %3768 = vrcp.f32 %v2562_v50 }
0x24f8   :  { %3770 = vrcp.f32 %v2589_v57 }
0x2501   :  { %v3769_v58 = vpop.eup %3768 }
0x2502   :  { %v3771_v61 = vpop.eup %3770  ;;  %v2569_v10 = vmul.f32 %v3769_v58, %v2567_v4 }
0x2503   :  { %v2596_v9 = vmul.f32 %v3771_v61, %v2594_v11 }
0x2561   :  { %v2572_v59 = vpop.permute.xlu0 %2571 }
0x2562   :  { %v2574_v8 = vmul.f32 %v3769_v58, %v2572_v59 }
0x2564   :  { %2576 = vrot.lane.b32.xlu0 %v2574_v8, %s3816_s28 }
0x2566   :  { %v2599_v62 = vpop.permute.xlu1 %2598 }
0x2567   :  { %v2601_v63 = vmul.f32 %v3771_v61, %v2599_v62 }
0x2569   :  { %2603 = vrot.lane.b32.xlu1 %v2601_v63, %s3816_s28 }
0x25d6   :  { %v2577_v6 = vpop.permute.xlu0 %2576 }
0x25d7   :  { %v4529_v7 = vadd.f32 %v2577_v6, %v2569_v10 }
0x25d9   :  { %3772 = vtanh.f32 %v4529_v7  ;;  %v2737_v63 = vrot.slane %v4529_v7, 6 }
0x25db   :  { %v2604_v13 = vpop.permute.xlu1 %2603 }
0x25dc   :  { %v4533_v16 = vadd.f32 %v2604_v13, %v2596_v9 }
0x25de   :  { %3774 = vtanh.f32 %v4533_v16  ;;  %v2764_v11 = vrot.slane %v4533_v16, 2 }
0x25e3   :  { %v3773_v18 = vpop.eup %3772 }
0x25e4   :  { %2582 = vrot.lane.b32.xlu0 %v3773_v18, %s3815_s2 }
0x25e8   :  { %v3775_v19 = vpop.eup %3774 }
0x25e9   :  { %2609 = vrot.lane.b32.xlu1 %v3775_v19, %s3815_s2 }
0x2656   :  { %v2583_v12 = vpop.permute.xlu0 %2582 }
0x2657   :  { %v4538_v20 = vmul.f32 %v3769_v58, %v2583_v12 }
0x2659   :  { %v2624_v21 = vpack.c.bf16 %v4538_v20, %v4538_v20 }
0x265b   :  { %v2626_v22 = vrot.slane %v2624_v21, 1  ;;  %v2610_v23 = vpop.permute.xlu1 %2609 }
0x265c   :  { %v4542_v24 = vmul.f32 %v3771_v61, %v2610_v23 }
0x265d   :  { %2627 = vrot.lane.b32.xlu0 %v2626_v22, %s3816_s28 }
0x265e   :  { %v2677_v25 = vpack.c.bf16 %v4542_v24, %v4542_v24 }
0x2660   :  { %v2679_v26 = vrot.slane %v2677_v25, 2 }
0x2662   :  { %2680 = vrot.lane.b32.xlu1 %v2679_v26, %s3816_s28 }
0x26cf   :  { %v2628_v27 = vpop.permute.xlu0 %2627 }
0x26d0   :  { %3478 = vmatmul.mubr.msk.bf16.vlgmr.msra.gmra.mrb[56].mxu1 %vm72_vm1, %v2628_v27 }
0x26d1   :  { %3490 = vmatpush3.bf16.msra.mxu1 %v3808_v29  ;;  %3493 = vmatprep.mubr.msk.bf16.mxu1 %vm3814_vm0, %v3813_v2 }
0x26d2   :  { %3491 = vmatprep.subr.bf16.mxu1 %v3813_v2 }
0x26d4   :  { %v2681_v30 = vpop.permute.xlu1 %2680 }
0x26d5   :  { %3486 = vmatmul.mubr.msk.bf16.vlgmr.msra.gmra.mrb[64].mxu0 %vm72_vm1, %v2681_v30  ;;  %3492 = vmatpush3.bf16.msra.mxu1 %v3809_v32 }
0x26d6   :  { %3498 = vmatpush3.bf16.msra.mxu0 %v3810_v33  ;;  %3501 = vmatprep.mubr.msk.bf16.mxu0 %vm3814_vm0, %v3813_v2 }
0x26d7   :  { %3499 = vmatprep.subr.bf16.mxu0 %v3813_v2  ;;  %3505 = vmatprep.subr.bf16.mxu1 %v3813_v2 }
0x26da   :  { %3500 = vmatpush3.bf16.msra.mxu0 %v3811_v34 }
0x27a3   :  { %v2666_v39 = vpop.f32.mrb[56].mxu1 }
0x27a4   :  { %v2673_v49 = vrot.slane %v2666_v39, 4  ;;  %v3479_v42 = vpop.f32.mrb[57].mxu1  ;;  %v2793_v39 = vld [vmem:[#allocation2 + $0x10] sm:$0xc0] }
0x27a5   :  { %v2669_v37 = vpop.f32.mrb[58].mxu1 }
0x27a6   :  { %v2675_v14 = vadd.f32 %v2673_v49, %v2623_v15  ;;  %v3480_v17 = vpop.f32.mrb[59].mxu1  ;;  %v2846_v37 = vld [vmem:[#allocation2 + $0x8] sm:$0x3] }
0x27a8   :  { %3776 = vtanh.f32 %v2675_v14  ;;  %v2719_v47 = vpop.f32.mrb[64].mxu0  ;;  %v3136_v52 = vmul.f32 -1.442695, %v2675_v14 }
0x27a9   :  { %v2726_v41 = vrot.slane %v2719_v47, 6  ;;  %v3487_v45 = vpop.f32.mrb[65].mxu0 }
0x27aa   :  { %v2722_v5 = vpop.f32.mrb[66].mxu0 }
0x27ab   :  { %v2728_v60 = vadd.f32 %v2726_v41, %v2676_v0  ;;  %v3488_v51 = vpop.f32.mrb[67].mxu0 }
0x27ad   :  { %3778 = vtanh.f32 %v2728_v60  ;;  %v3137_v43 = vmul.f32 -1.442695, %v2728_v60 }
0x27ae   :  { %3780 = vpow2.f32 %v3136_v52 }
0x27af   :  { %3782 = vpow2.f32 %v3137_v43 }
0x27b2   :  { %v3777_v55 = vpop.eup %3776 }
0x27b3   :  { %2741 = vrot.lane.b32.xlu0 %v3777_v55, %s3815_s2 }
0x27b7   :  { %v3779_v48 = vpop.eup %3778 }
0x27b8   :  { %2768 = vrot.lane.b32.xlu1 %v3779_v48, %s3815_s2  ;;  %v3781_v53 = vpop.eup %3780 }
0x27b9   :  { %v2732_v35 = vadd.f32 1.0, %v3781_v53  ;;  %v3783_v50 = vpop.eup %3782 }
0x27ba   :  { %v2759_v54 = vadd.f32 1.0, %v3783_v50 }
0x27bb   :  { %3784 = vrcp.f32 %v2732_v35 }
0x27bc   :  { %3786 = vrcp.f32 %v2759_v54 }
0x27c5   :  { %v3785_v57 = vpop.eup %3784 }
0x27c6   :  { %v3787_v8 = vpop.eup %3786  ;;  %v2739_v4 = vmul.f32 %v3785_v57, %v2737_v63 }
0x27c7   :  { %v2766_v9 = vmul.f32 %v3787_v8, %v2764_v11 }
0x2825   :  { %v2742_v58 = vpop.permute.xlu0 %2741 }
0x2826   :  { %v2744_v59 = vmul.f32 %v3785_v57, %v2742_v58 }
0x2828   :  { %2746 = vrot.lane.b32.xlu0 %v2744_v59, %s3816_s28 }
0x282a   :  { %v2769_v61 = vpop.permute.xlu1 %2768 }
0x282b   :  { %v2771_v62 = vmul.f32 %v3787_v8, %v2769_v61 }
0x282d   :  { %2773 = vrot.lane.b32.xlu1 %v2771_v62, %s3816_s28 }
0x289a   :  { %v2747_v10 = vpop.permute.xlu0 %2746 }
0x289b   :  { %v4574_v6 = vadd.f32 %v2747_v10, %v2739_v4 }
0x289d   :  { %3788 = vtanh.f32 %v4574_v6  ;;  %v2904_v59 = vrot.slane %v4574_v6, 6 }
0x289f   :  { %v2774_v13 = vpop.permute.xlu1 %2773 }
0x28a0   :  { %v4578_v18 = vadd.f32 %v2774_v13, %v2766_v9 }
0x28a2   :  { %3790 = vtanh.f32 %v4578_v18  ;;  %v2931_v61 = vrot.slane %v4578_v18, 2 }
0x28a7   :  { %v3789_v19 = vpop.eup %3788 }
0x28a8   :  { %2752 = vrot.lane.b32.xlu0 %v3789_v19, %s3815_s2 }
0x28ac   :  { %v3791_v12 = vpop.eup %3790 }
0x28ad   :  { %2779 = vrot.lane.b32.xlu1 %v3791_v12, %s3815_s2 }
0x291a   :  { %v2753_v7 = vpop.permute.xlu0 %2752 }
0x291b   :  { %v4583_v21 = vmul.f32 %v3785_v57, %v2753_v7 }
0x291d   :  { %v2794_v16 = vpack.c.bf16 %v4583_v21, %v4583_v21 }
0x291f   :  { %v2796_v22 = vrot.slane %v2794_v16, 2  ;;  %v2780_v23 = vpop.permute.xlu1 %2779 }
0x2920   :  { %v4587_v25 = vmul.f32 %v3787_v8, %v2780_v23 }
0x2921   :  { %2797 = vrot.lane.b32.xlu0 %v2796_v22, %s3816_s28 }
0x2922   :  { %v2847_v26 = vpack.c.bf16 %v4587_v25, %v4587_v25 }
0x2924   :  { %v2849_v27 = vrot.slane %v2847_v26, 1 }
0x2926   :  { %2850 = vrot.lane.b32.xlu1 %v2849_v27, %s3816_s28 }
0x2993   :  { %v2798_v29 = vpop.permute.xlu0 %2797 }
0x2994   :  { %3494 = vmatmul.mubr.msk.bf16.vlgmr.msra.gmra.mrb[60].mxu1 %vm72_vm1, %v2798_v29 }
0x2995   :  { %3513 = vmatprep.mubr.msk.bf16.mxu1 %vm3814_vm0, %v3813_v2 }
0x2998   :  { %v2851_v30 = vpop.permute.xlu1 %2850 }
0x2999   :  { %3502 = vmatmul.mubr.msk.bf16.vlgmr.msra.gmra.mrb[68].mxu0 %vm72_vm1, %v2851_v30 }
0x2a67   :  { %v2836_v32 = vpop.f32.mrb[60].mxu1 }
0x2a68   :  { %v2843_v33 = vrot.slane %v2836_v32, 2  ;;  %v3495_v34 = vpop.f32.mrb[61].mxu1  ;;  %v3142_v32 = vld [vmem:[%s4684_s8] ss:$0 sm:$0xff] }
0x2a69   :  { %v2839_v49 = vpop.f32.mrb[62].mxu1 }
0x2a6a   :  { %v2845_v42 = vadd.f32 %v2843_v33, %v2793_v39  ;;  %v3496_v15 = vpop.f32.mrb[63].mxu1 }
0x2a6c   :  { %3792 = vtanh.f32 %v2845_v42  ;;  %v2889_v14 = vpop.f32.mrb[68].mxu0  ;;  %v3140_v60 = vmul.f32 -1.442695, %v2845_v42 }
0x2a6d   :  { %v2895_v17 = vadd.f32 %v2889_v14, %v2846_v37  ;;  %v3503_v47 = vpop.f32.mrb[69].mxu0 }
0x2a6e   :  { %v2892_v41 = vpop.f32.mrb[70].mxu0 }
0x2a6f   :  { %3794 = vtanh.f32 %v2895_v17  ;;  %v3504_v45 = vpop.f32.mrb[71].mxu0  ;;  %v3141_v51 = vmul.f32 -1.442695, %v2895_v17 }
0x2a70   :  { %3796 = vpow2.f32 %v3140_v60 }
0x2a71   :  { %3798 = vpow2.f32 %v3141_v51 }
0x2a76   :  { %v3793_v0 = vpop.eup %3792 }
0x2a77   :  { %2908 = vrot.lane.b32.xlu0 %v3793_v0, %s3815_s2 }
0x2a79   :  { %v3795_v5 = vpop.eup %3794 }
0x2a7a   :  { %2935 = vrot.lane.b32.xlu1 %v3795_v5, %s3815_s2  ;;  %v3797_v55 = vpop.eup %3796 }
0x2a7b   :  { %v3799_v48 = vpop.eup %3798  ;;  %v2899_v52 = vadd.f32 1.0, %v3797_v55 }
0x2a7c   :  { %v2926_v43 = vadd.f32 1.0, %v3799_v48 }
0x2a7d   :  { %3800 = vrcp.f32 %v2899_v52 }
0x2a7e   :  { %3802 = vrcp.f32 %v2926_v43 }
0x2a87   :  { %v3801_v53 = vpop.eup %3800 }
0x2a88   :  { %v3803_v54 = vpop.eup %3802  ;;  %v2906_v8 = vmul.f32 %v3801_v53, %v2904_v59 }
0x2a89   :  { %v2933_v4 = vmul.f32 %v3803_v54, %v2931_v61 }
0x2ae9   :  { %v2909_v35 = vpop.permute.xlu0 %2908 }
0x2aea   :  { %v2911_v50 = vmul.f32 %v3801_v53, %v2909_v35 }
0x2aec   :  { %v2936_v57 = vpop.permute.xlu1 %2935  ;;  %2913 = vrot.lane.b32.xlu0 %v2911_v50, %s3816_s28 }
0x2aed   :  { %v2938_v58 = vmul.f32 %v3803_v54, %v2936_v57 }
0x2aef   :  { %2940 = vrot.lane.b32.xlu1 %v2938_v58, %s3816_s28 }
0x2b5e   :  { %v2914_v62 = vpop.permute.xlu0 %2913 }
0x2b5f   :  { %v2916_v63 = vadd.f32 %v2914_v62, %v2906_v8 }
0x2b61   :  { %3804 = vtanh.f32 %v2916_v63  ;;  %v2941_v10 = vpop.permute.xlu1 %2940 }
0x2b62   :  { %v2943_v11 = vadd.f32 %v2941_v10, %v2933_v4 }
0x2b64   :  { %3806 = vtanh.f32 %v2943_v11 }
0x2b6b   :  { %v3805_v9 = vpop.eup %3804 }
0x2b6c   :  { %2919 = vrot.lane.b32.xlu0 %v3805_v9, %s3815_s2 }
0x2b6e   :  { %v3807_v13 = vpop.eup %3806 }
0x2b6f   :  { %2946 = vrot.lane.b32.xlu1 %v3807_v13, %s3815_s2 }
0x2b70   :  { %1773 = vrot.lane.b32.xlu0 %v4348_v1, %s3816_s28  ;;  %v3548_v1 = vld [vmem:[%s4683_s7] sm:$0xff]  }
0x2b71   :  { %3506 = vmatpush3.bf16.msra.mxu1 %v3548_v1 }
0x2b72   :  { %3507 = vmatprep.subr.bf16.mxu1 %v3813_v2 }
0x2b73   :  { %1778 = vrot.lane.b32.xlu1 %v4352_v3, %s3815_s2  ;;  %v3549_v3 = vld [vmem:[%s4683_s7 + $0x8] sm:$0xff]  }
0x2b74   :  { %1942 = vrot.lane.b32.xlu0 %v4386_v46, %s3816_s28  ;;  %v3550_v46 = vld [vmem:[%s4683_s7 + $0x10] sm:$0xff]  }
0x2b75   :  { %3508 = vmatpush3.bf16.msra.mxu1 %v3549_v3 }
0x2b76   :  { %3509 = vmatprep.subr.bf16.mxu1 %v3813_v2 }
0x2b77   :  { %1947 = vrot.lane.b32.xlu1 %v4390_v40, %s3815_s2  ;;  %v3551_v40 = vld [vmem:[%s4683_s7 + $0x18] sm:$0xff]  }
0x2b78   :  { %2112 = vrot.lane.b32.xlu0 %v4424_v36, %s3816_s28 }
0x2b79   :  { %3510 = vmatpush3.bf16.msra.mxu1 %v3550_v46 }
0x2b7a   :  { %3511 = vmatprep.subr.bf16.mxu1 %v3813_v2 }
0x2b7b   :  { %2117 = vrot.lane.b32.xlu1 %v4428_v56, %s3815_s2 }
0x2b7c   :  { %2279 = vrot.lane.b32.xlu0 %v4462_v38, %s3816_s28 }
0x2b7d   :  { %3512 = vmatpush3.bf16.msra.mxu1 %v3551_v40 }
0x2b7f   :  { %2284 = vrot.lane.b32.xlu1 %v4466_v44, %s3815_s2 }
0x2b80   :  { %2445 = vrot.lane.b32.xlu0 %v4500_v28, %s3816_s28 }
0x2b83   :  { %2450 = vrot.lane.b32.xlu1 %v4504_v31, %s3815_s2 }
0x2b84   :  { %2614 = vrot.lane.b32.xlu0 %v4538_v20, %s3816_s28 }
0x2b87   :  { %2619 = vrot.lane.b32.xlu1 %v4542_v24, %s3815_s2 }
0x2b88   :  { %2784 = vrot.lane.b32.xlu0 %v4583_v21, %s3816_s28 }
0x2b8b   :  { %2789 = vrot.lane.b32.xlu1 %v4587_v25, %s3815_s2 }
0x2bde   :  { %v2920_v36 = vpop.permute.xlu0 %2919 }
0x2bdf   :  { %v2922_v56 = vmul.f32 %v3801_v53, %v2920_v36 }
0x2be1   :  { %v2947_v38 = vpop.permute.xlu1 %2946  ;;  %2951 = vrot.lane.b32.xlu0 %v2922_v56, %s3816_s28 }
0x2be2   :  { %v2949_v44 = vmul.f32 %v3803_v54, %v2947_v38  ;;  %v1774_v28 = vpop.permute.xlu0 %1773 }
0x2be3   :  { %1776 = vst.msk [vmem:[#allocation4] sm:$0x3] %vm298_vm2, %v1774_v28 }
0x2be4   :  { %2956 = vrot.lane.b32.xlu1 %v2949_v44, %s3815_s2 }
0x2be5   :  { %v1779_v31 = vpop.permute.xlu1 %1778 }
0x2be6   :  { %1781 = vst.msk [vmem:[#allocation4 + $0x8] sm:$0xc0] %vm304_vm3, %v1779_v31  ;;  %v1943_v20 = vpop.permute.xlu0 %1942 }
0x2be7   :  { %1945 = vst.msk [vmem:[#allocation4] sm:$0xc] %vm469_vm4, %v1943_v20 }
0x2be9   :  { %v1948_v24 = vpop.permute.xlu1 %1947 }
0x2bea   :  { %1950 = vst.msk [vmem:[#allocation4 + $0x8] sm:$0x30] %vm475_vm5, %v1948_v24  ;;  %v2113_v2 = vpop.permute.xlu0 %2112 }
0x2beb   :  { %2115 = vst.msk [vmem:[#allocation4] sm:$0x30] %vm641_vm6, %v2113_v2 }
0x2bed   :  { %v2118_v6 = vpop.permute.xlu1 %2117 }
0x2bee   :  { %2120 = vst.msk [vmem:[#allocation4 + $0x8] sm:$0xc] %vm647_vm7, %v2118_v6  ;;  %v2280_v18 = vpop.permute.xlu0 %2279 }
0x2bef   :  { %2282 = vst.msk [vmem:[#allocation4] sm:$0xc0] %vm810_vm8, %v2280_v18 }
0x2bf1   :  { %v2285_v19 = vpop.permute.xlu1 %2284 }
0x2bf2   :  { %2287 = vst.msk [vmem:[#allocation4 + $0x8] sm:$0x3] %vm816_vm9, %v2285_v19  ;;  %v2446_v12 = vpop.permute.xlu0 %2445 }
0x2bf3   :  { %2448 = vst.msk [vmem:[#allocation4 + $0x8] sm:$0x3] %vm298_vm2, %v2446_v12 }
0x2bf5   :  { %v2451_v7 = vpop.permute.xlu1 %2450 }
0x2bf6   :  { %2453 = vst.msk [vmem:[#allocation4] sm:$0xc0] %vm304_vm3, %v2451_v7  ;;  %v2615_v21 = vpop.permute.xlu0 %2614 }
0x2bf7   :  { %2617 = vst.msk [vmem:[#allocation4 + $0x8] sm:$0xc] %vm469_vm4, %v2615_v21 }
0x2bf9   :  { %v2620_v16 = vpop.permute.xlu1 %2619 }
0x2bfa   :  { %2622 = vst.msk [vmem:[#allocation4] sm:$0x30] %vm475_vm5, %v2620_v16  ;;  %v2785_v22 = vpop.permute.xlu0 %2784 }
0x2bfb   :  { %2787 = vst.msk [vmem:[#allocation4 + $0x8] sm:$0x30] %vm641_vm6, %v2785_v22 }
0x2bfd   :  { %v2790_v23 = vpop.permute.xlu1 %2789 }
0x2bfe   :  { %2792 = vst.msk [vmem:[#allocation4] sm:$0xc] %vm647_vm7, %v2790_v23 }
0x2c53   :  { %v2952_v25 = vpop.permute.xlu0 %2951 }
0x2c54   :  { %2954 = vst.msk [vmem:[#allocation4 + $0x8] sm:$0xc0] %vm810_vm8, %v2952_v25 }
0x2c56   :  { %v2957_v26 = vpop.permute.xlu1 %2956 }
0x2c57   :  { %2959 = vst.msk [vmem:[#allocation4] sm:$0x3] %vm816_vm9, %v2957_v26 }
0x2c5b   :  { %v2961_v29 = vld [vmem:[#allocation4 + $0x8] sm:$0xff] }
0x2c5e   :  { %v2960_v27 = vld [vmem:[#allocation4] sm:$0xff] }
0x2c5f   :  { %v2962_v30 = vpack.c.bf16 %v2961_v29, %v2960_v27 }
0x2c61   :  { %3514 = vmatmul.mubr.msk.bf16.vlgmr.msra.gmra.mrb[64].mxu1 %vm1553_vm10, %v2962_v30 }
0x2d34   :  { %v3039_v33 = vpop.f32.mrb[64].mxu1 }
0x2d35   :  { %v3040_v34 = vadd.f32 %v3142_v32, %v3039_v33  ;;  %v3515_v39 = vpop.f32.mrb[65].mxu1 }
0x2d36   :  { %v3042_v49 = vpop.f32.mrb[66].mxu1 }
0x2d37   :  { %3046 = vst [vmem:[%s4685_s9] sm:$0xff] %v3040_v34  ;;  %v3043_v42 = vadd.f32 %v3142_v32, %v3042_v49  ;;  %v3516_v15 = vpop.f32.mrb[67].mxu1 }
0x2d39   :  { %3047 = vst [vmem:[%s4685_s9 + $0x8] sm:$0xff] %v3043_v42 }

</bundles_post_ra>
